<compile_context>
chip_gen: v6e
topology: v6e:2x2x1
jax: 0.10.0
libtpu: 0.0.40
codegen_flags: <defaults>
</compile_context>

<pallas_src>
import functools

import jax
import jax.numpy as jnp
from jax.experimental import pallas as pl

B = 2
C, H, W = 20, 28, 28
K = C * H * W            # 15680
N_OUT = 10
NEG_SLOPE = 0.01         # F.leaky_relu default


def _net_kernel(x_ref, w_ref, b_ref, o_ref):
    """Fused leaky_relu -> matmul -> +bias -> log_softmax, one shot.

    x_ref : (B, K)      flattened NCHW activations, f32
    w_ref : (K, N_OUT)  linear weight (pre-transposed from torch (out,in)), bf16
    b_ref : (1, N_OUT)  linear bias, f32
    o_ref : (B, N_OUT)  log-softmax output, f32
    """
    x = x_ref[...]
    # F.leaky_relu, fused (VPU work hides under the weight DMA).
    x = jnp.where(x >= 0, x, NEG_SLOPE * x)

    # bf16 x bf16 MXU matmul, f32 accumulation.
    logits = jnp.dot(x.astype(jnp.bfloat16), w_ref[...],
                     preferred_element_type=jnp.float32)
    logits = logits + b_ref[...]

    # Numerically stable log_softmax over the 10 classes.
    m = jnp.max(logits, axis=-1, keepdims=True)
    lse = jnp.log(jnp.sum(jnp.exp(logits - m), axis=-1, keepdims=True)) + m
    o_ref[...] = (logits - lse).astype(o_ref.dtype)


@functools.partial(jax.jit, static_argnames=())
def simple_net_forward(x_nchw, weight_bf16, bias):
    """x_nchw: (B, 20, 28, 28) f32.

    weight_bf16: (K, 10) bf16 — PyTorch's (10, K) weight transposed and cast
    ONCE offline; there are no per-call pad/cast/transpose ops on the jitted
    path.  bias: (10,) f32.
    """
    b = x_nchw.shape[0]
    # Flatten exactly like torch's x.reshape(x.shape[0], -1) on NCHW (free).
    x_flat = x_nchw.reshape(b, K)
    b2d = bias.reshape(1, N_OUT)

    cost = pl.CostEstimate(
        flops=2 * b * K * N_OUT,
        transcendentals=b * (N_OUT + 1),
        bytes_accessed=(b * K * 4) + (K * N_OUT * 2) + (N_OUT * 4) + (b * N_OUT * 4),
    )

    return pl.pallas_call(
        _net_kernel,
        out_shape=jax.ShapeDtypeStruct((b, N_OUT), jnp.float32),
        # No grid: full-array blocks (exempt from the (8,128) rule), single
        # DMA per operand, no accumulator, no pipelining overhead.
        in_specs=[
            pl.BlockSpec((b, K), lambda: (0, 0)),
            pl.BlockSpec((K, N_OUT), lambda: (0, 0)),
            pl.BlockSpec((1, N_OUT), lambda: (0, 0)),
        ],
        out_specs=pl.BlockSpec((b, N_OUT), lambda: (0, 0)),
        cost_estimate=cost,
    )(x_flat, weight_bf16, b2d)


def _reference(x_nchw, weight_f32, bias):
    """Pure-JAX f32 reference for a correctness check."""
    x = jnp.where(x_nchw >= 0, x_nchw, NEG_SLOPE * x_nchw)
    x = x.reshape(x.shape[0], -1)
    logits = x @ weight_f32 + bias
    return jax.nn.log_softmax(logits, axis=1)


if __name__ == "__main__":
    key = jax.random.PRNGKey(0)
    kx, kw, kb = jax.random.split(key, 3)

    # Deterministic synthetic parameters (shapes from nn.Linear(20*28*28, 10)),
    # already stored as (in_features, out_features) = (K, 10).
    bound = 1.0 / (K ** 0.5)
    weight_f32 = jax.random.uniform(kw, (K, N_OUT), jnp.float32, -bound, bound)
    bias = jax.random.uniform(kb, (N_OUT,), jnp.float32, -bound, bound)

    # One-time, offline weight prep (NOT on the per-call jitted path):
    # bf16 halves the dominant HBM read of the DMA-bound kernel.
    weight_bf16 = weight_f32.astype(jnp.bfloat16)

    # Example input: output shape of Involution+Contamination, (B, 20, 28, 28).
    x = jax.random.normal(kx, (B, C, H, W), jnp.float32)

    out = jax.block_until_ready(simple_net_forward(x, weight_bf16, bias))
    ref = _reference(x, weight_f32, bias)

    assert out.shape == (B, N_OUT)
    # bf16 weights/activations in the matmul (f32 accumulation) -> slightly
    # looser tolerance against the pure-f32 reference.
    assert jnp.allclose(out, ref, atol=2e-2, rtol=2e-2), "mismatch vs reference"

    print("KERNEL_OK")
</pallas_src>

<mosaic_0001>
module attributes {stable_mosaic.version = 11 : i64} {
  func.func @_net_kernel(%arg0: memref<2x15680xf32, #tpu.memory_space<vmem>>, %arg1: memref<15680x10xbf16, #tpu.memory_space<vmem>>, %arg2: memref<1x10xf32, #tpu.memory_space<vmem>>, %arg3: memref<2x10xf32, #tpu.memory_space<vmem>>) attributes {dimension_semantics = [], scalar_prefetch = 0 : i64, scratch_operands = 0 : i64, tpu.core_type = #tpu.core_type<tc>} {
    %c0 = arith.constant 0 : index
    %c0_0 = arith.constant 0 : index
    %0 = vector.load %arg0[%c0, %c0_0] : memref<2x15680xf32, #tpu.memory_space<vmem>>, vector<2x15680xf32>
    %cst = arith.constant 0.000000e+00 : f32
    %1 = vector.broadcast %cst : f32 to vector<2x15680xf32>
    %2 = arith.cmpf oge, %0, %1 : vector<2x15680xf32>
    %cst_1 = arith.constant 0.00999999977 : f32
    %3 = vector.broadcast %cst_1 : f32 to vector<2x15680xf32>
    %4 = arith.mulf %3, %0 : vector<2x15680xf32>
    %5 = arith.select %2, %0, %4 : vector<2x15680xi1>, vector<2x15680xf32>
    %6 = arith.truncf %5 : vector<2x15680xf32> to vector<2x15680xbf16>
    %c0_2 = arith.constant 0 : index
    %c0_3 = arith.constant 0 : index
    %7 = vector.load %arg1[%c0_2, %c0_3] : memref<15680x10xbf16, #tpu.memory_space<vmem>>, vector<15680x10xbf16>
    %cst_4 = arith.constant dense<0.000000e+00> : vector<2x10xf32>
    %8 = tpu.matmul %6, %7, %cst_4 {dimension_numbers = #tpu.dot_dimension_numbers<[1], [0], [0], [1], [0, 0, 1, 1], [], []>} : vector<2x15680xbf16>, vector<15680x10xbf16>, vector<2x10xf32> -> vector<2x10xf32>
    %c0_5 = arith.constant 0 : index
    %c0_6 = arith.constant 0 : index
    %9 = vector.load %arg2[%c0_5, %c0_6] : memref<1x10xf32, #tpu.memory_space<vmem>>, vector<1x10xf32>
    %10 = vector.broadcast %9 : vector<1x10xf32> to vector<2x10xf32>
    %11 = arith.addf %8, %10 : vector<2x10xf32>
    %cst_7 = arith.constant dense<0xFF800000> : vector<2xf32>
    %12 = vector.multi_reduction <maximumf>, %11, %cst_7 [1] : vector<2x10xf32> to vector<2xf32>
    %13 = vector.shape_cast %12 : vector<2xf32> to vector<2x1xf32>
    %14 = vector.broadcast %13 : vector<2x1xf32> to vector<2x10xf32>
    %15 = arith.subf %11, %14 : vector<2x10xf32>
    %16 = math.exp %15 : vector<2x10xf32>
    %cst_8 = arith.constant dense<0.000000e+00> : vector<2xf32>
    %17 = vector.multi_reduction <add>, %16, %cst_8 [1] : vector<2x10xf32> to vector<2xf32>
    %18 = vector.shape_cast %17 : vector<2xf32> to vector<2x1xf32>
    %19 = math.log %18 : vector<2x1xf32>
    %20 = arith.addf %19, %13 : vector<2x1xf32>
    %21 = vector.broadcast %20 : vector<2x1xf32> to vector<2x10xf32>
    %22 = arith.subf %11, %21 : vector<2x10xf32>
    %c0_9 = arith.constant 0 : index
    %c0_10 = arith.constant 0 : index
    %23 = vector.load %arg3[%c0_9, %c0_10] : memref<2x10xf32, #tpu.memory_space<vmem>>, vector<2x10xf32>
    tpu.vector_store %arg3[%c0_9, %c0_10], %22 {strides = array<i32>} : memref<2x10xf32, #tpu.memory_space<vmem>>, vector<2x10xf32>,
    return
  }
}

</mosaic_0001>

<bundles_post_ra>
// kernel: simple_net_forward.1
= control target key start
LH: loop header
LB: loop body
LE: loop exit
PB: predicated region body
PF: predicated region fallthrough
CT: control target
= control target key end

     0   :  { %v175_v27 = vlaneseq  ;;  %v14654_v36 = vmov 1983009808   ;;  %s17853_s0 = inlined_call_operand.vmem [shape: f32[2,15680], index: 0, kind: input, shape index: {}]   ;;  %s17854_s1 = inlined_call_operand.vmem [shape: bf16[15680,10], index: 1, kind: input, shape index: {}]   ;;  %s17855_s2 = inlined_call_operand.vmem [shape: f32[1,10], index: 2, kind: input, shape index: {}]   ;;  %s17856_s3 = inlined_call_operand.hbm [shape: f32[2,10], index: 3, kind: output, shape index: {}]  }
   0x1   :  { %v13648_v0 = vld [vmem:[%s17854_s1 + $0x78] sm:$0xff]   ;;  %v13652_v4 = vld [vmem:[%s17854_s1 + $0x70] sm:$0xff]   ;;  %v13656_v8 = vld [vmem:[%s17854_s1 + $0x68] sm:$0xff]   ;;  %v173_v37 = vunpack.c.l.s4 %v14654_v36 }
   0x2   :  { %v13649_v1 = vld [vmem:[%s17854_s1 + $0x38] sm:$0xff]   ;;  %12285 = vmatprep.subr.bf16.mxu0 %v13648_v0  ;;  %v13653_v5 = vld [vmem:[%s17854_s1 + $0x30] sm:$0xff]   ;;  %v13657_v9 = vld [vmem:[%s17854_s1 + $0x28] sm:$0xff]   ;;  %v176_v32 = vshrl.u32 %v175_v27, 7 }
   0x3   :  { %v13650_v2 = vld [vmem:[%s17854_s1 + $0xf8] sm:$0xff]   ;;  %12286 = vmatpush3.bf16.msra.mxu0 %v13649_v1  ;;  %v13654_v6 = vld [vmem:[%s17854_s1 + $0xf0] sm:$0xff]   ;;  %v13658_v10 = vld [vmem:[%s17854_s1 + $0xe8] sm:$0xff]   ;;  %v174_v40 = vunpack.c.0.s8 %v173_v37 }
   0x4   :  { %v13651_v3 = vld [vmem:[%s17854_s1 + $0xb8] sm:$0xff]   ;;  %12307 = vmatprep.subr.bf16.mxu1 %v13650_v2  ;;  %12287 = vmatprep.subr.bf16.mxu0 %v13652_v4  ;;  %v13655_v7 = vld [vmem:[%s17854_s1 + $0xb0] sm:$0xff]   ;;  %v13659_v11 = vld [vmem:[%s17854_s1 + $0xa8] sm:$0xff]  }
   0x5   :  { %12308 = vmatpush3.bf16.msra.mxu1 %v13651_v3  ;;  %v13660_v12 = vld [vmem:[%s17854_s1 + $0x60] sm:$0xff]   ;;  %v13664_v16 = vld [vmem:[%s17854_s1 + $0x58] sm:$0xff]   ;;  %v13668_v20 = vld [vmem:[%s17854_s1 + $0x50] sm:$0xff]   ;;  %v14783_v43 = vsub.s32 %v174_v40, %v176_v32 }
   0x6   :  { %12309 = vmatprep.subr.bf16.mxu1 %v13654_v6  ;;  %v13661_v13 = vld [vmem:[%s17854_s1 + $0x20] sm:$0xff]   ;;  %v13665_v17 = vld [vmem:[%s17854_s1 + $0x18] sm:$0xff]   ;;  %v13669_v21 = vld [vmem:[%s17854_s1 + $0x10] sm:$0xff]  }
   0x7   :  { %12288 = vmatpush3.bf16.msra.mxu0 %v13653_v5  ;;  %v13662_v14 = vld [vmem:[%s17854_s1 + $0xe0] sm:$0xff]   ;;  %v13666_v18 = vld [vmem:[%s17854_s1 + $0xd8] sm:$0xff]   ;;  %v13670_v22 = vld [vmem:[%s17854_s1 + $0xd0] sm:$0xff]  }
   0x8   :  { %12289 = vmatprep.subr.bf16.mxu0 %v13656_v8  ;;  %v13663_v15 = vld [vmem:[%s17854_s1 + $0xa0] sm:$0xff]   ;;  %v13667_v19 = vld [vmem:[%s17854_s1 + $0x98] sm:$0xff]   ;;  %v13671_v23 = vld [vmem:[%s17854_s1 + $0x90] sm:$0xff]  }
   0x9   :  { %12310 = vmatpush3.bf16.msra.mxu1 %v13655_v7  ;;  %v13672_v24 = vld [vmem:[%s17854_s1 + $0x48] sm:$0xff]   ;;  %v13676_v29 = vld [vmem:[%s17854_s1 + $0x40] sm:$0xff]   ;;  %v13680_v38 = vld [vmem:[%s17854_s1 + $0x178] sm:$0xff]  }
   0xa   :  { %12311 = vmatprep.subr.bf16.mxu1 %v13658_v10  ;;  %v13673_v25 = vld [vmem:[%s17854_s1 + $0x8] sm:$0xff]   ;;  %v13677_v30 = vld [vmem:[%s17854_s1] sm:$0xff]   ;;  %v13682_v42 = vld [vmem:[%s17854_s1 + $0x1f8] sm:$0xff]  }
   0xb   :  { %12290 = vmatpush3.bf16.msra.mxu0 %v13657_v9  ;;  %v13674_v26 = vld [vmem:[%s17854_s1 + $0xc8] sm:$0xff]   ;;  %v13678_v31 = vld [vmem:[%s17854_s1 + $0xc0] sm:$0xff]   ;;  %v13681_v48 = vld [vmem:[%s17854_s1 + $0x138] sm:$0xff]  }
   0xc   :  { %12291 = vmatprep.subr.bf16.mxu0 %v13660_v12  ;;  %v13675_v28 = vld [vmem:[%s17854_s1 + $0x88] sm:$0xff]   ;;  %v16_v33 = vld [vmem:[%s17853_s0] sm:$0xff]  ;;  %v13683_v51 = vld [vmem:[%s17854_s1 + $0x1b8] sm:$0xff]  }
   0xd   :  { %12312 = vmatpush3.bf16.msra.mxu1 %v13659_v11  ;;  %v13679_v34 = vld [vmem:[%s17854_s1 + $0x80] sm:$0xff]   ;;  %vm47_vm0 = vcmp.ge.f32.partialorder %v16_v33, 0.0  ;;  %v78_v35 = vmul.f32 0.01, %v16_v33  ;;  %v13684_v54 = vld [vmem:[%s17854_s1 + $0x170] sm:$0xff]   ;;  %v13688_v58 = vld [vmem:[%s17854_s1 + $0x168] sm:$0xff]  }
   0xe   :  { %12313 = vmatprep.subr.bf16.mxu1 %v13662_v14  ;;  %v13686_v55 = vld [vmem:[%s17854_s1 + $0x1f0] sm:$0xff]   ;;  %v13690_v59 = vld [vmem:[%s17854_s1 + $0x1e8] sm:$0xff]   ;;  %v13692_v62 = vld [vmem:[%s17854_s1 + $0x160] sm:$0xff]  }
   0xf   :  { %12292 = vmatpush3.bf16.msra.mxu0 %v13661_v13  ;;  %v109_v39 = vsel %vm47_vm0, %v16_v33, %v78_v35  ;;  %v13685_v56 = vld [vmem:[%s17854_s1 + $0x130] sm:$0xff]   ;;  %v13689_v60 = vld [vmem:[%s17854_s1 + $0x128] sm:$0xff]   ;;  %v13694_v63 = vld [vmem:[%s17854_s1 + $0x1e0] sm:$0xff]  }
  0x10   :  { %12293 = vmatprep.subr.bf16.mxu0 %v13664_v16  ;;  %v171_v41 = vcombine.high %v109_v39, %v109_v39  ;;  %v178_v44 = vrot.slane %v109_v39, %v14783_v43  ;;  %v13687_v57 = vld [vmem:[%s17854_s1 + $0x1b0] sm:$0xff]   ;;  %v13691_v61 = vld [vmem:[%s17854_s1 + $0x1a8] sm:$0xff]   ;;  %v13693_v0 = vld [vmem:[%s17854_s1 + $0x120] sm:$0xff]  }
  0x11   :  { %12314 = vmatpush3.bf16.msra.mxu1 %v13663_v15  ;;  %v13695_v1 = vld [vmem:[%s17854_s1 + $0x1a0] sm:$0xff]   ;;  %v13696_v2 = vld [vmem:[%s17854_s1 + $0x158] sm:$0xff]   ;;  %v13700_v6 = vld [vmem:[%s17854_s1 + $0x150] sm:$0xff]  }
  0x12   :  { %12315 = vmatprep.subr.bf16.mxu1 %v13666_v18  ;;  %v185_v45 = vrot.slane %v171_v41, %v14783_v43  ;;  %v186_v46 = vcombine.high %v178_v44, %v178_v44  ;;  %v820_v49 = vpack.c.bf16 %v178_v44, %v178_v44  ;;  %v13698_v3 = vld [vmem:[%s17854_s1 + $0x1d8] sm:$0xff]   ;;  %v13702_v7 = vld [vmem:[%s17854_s1 + $0x1d0] sm:$0xff]   ;;  %v13704_v10 = vld [vmem:[%s17854_s1 + $0x148] sm:$0xff]  }
  0x13   :  { %12294 = vmatpush3.bf16.msra.mxu0 %v13665_v17  ;;  %v13697_v4 = vld [vmem:[%s17854_s1 + $0x118] sm:$0xff]   ;;  %v13701_v8 = vld [vmem:[%s17854_s1 + $0x110] sm:$0xff]   ;;  %v13706_v11 = vld [vmem:[%s17854_s1 + $0x1c8] sm:$0xff]  }
  0x14   :  { %12295 = vmatprep.subr.bf16.mxu0 %v13668_v20  ;;  %v187_v47 = vcombine.high %v185_v45, %v185_v45  ;;  %v822_v50 = vpack.c.bf16 %v185_v45, %v185_v45  ;;  %v821_v52 = vpack.c.bf16 %v186_v46, %v186_v46  ;;  %v13699_v5 = vld [vmem:[%s17854_s1 + $0x198] sm:$0xff]   ;;  %v13703_v9 = vld [vmem:[%s17854_s1 + $0x190] sm:$0xff]   ;;  %v17_v12 = vld [vmem:[%s17853_s0 + $0x8] sm:$0xff] }
  0x15   :  { %12316 = vmatpush3.bf16.msra.mxu1 %v13667_v19  ;;  %v13705_v13 = vld [vmem:[%s17854_s1 + $0x108] sm:$0xff]   ;;  %vm48_vm1 = vcmp.ge.f32.partialorder %v17_v12, 0.0  ;;  %v79_v15 = vmul.f32 0.01, %v17_v12  ;;  %v13708_v16 = vld [vmem:[%s17854_s1 + $0x140] sm:$0xff]   ;;  %v13715_v33 = vld [vmem:[%s17854_s1 + $0x2b8] sm:$0xff]  }
  0x16   :  { %12317 = vmatprep.subr.bf16.mxu1 %v13670_v22  ;;  %v823_v53 = vpack.c.bf16 %v187_v47, %v187_v47  ;;  %8826 = vmatprep.mubr.bf16.mxu0 %v821_v52  ;;  %v13707_v14 = vld [vmem:[%s17854_s1 + $0x188] sm:$0xff]   ;;  %v13710_v18 = vld [vmem:[%s17854_s1 + $0x1c0] sm:$0xff]   ;;  %v13718_v35 = vld [vmem:[%s17854_s1 + $0x2f0] sm:$0xff]  }
  0x17   :  { %12296 = vmatpush3.bf16.msra.mxu0 %v13669_v21  ;;  %v110_v17 = vsel %vm48_vm1, %v17_v12, %v79_v15  ;;  %v13709_v21 = vld [vmem:[%s17854_s1 + $0x100] sm:$0xff]   ;;  %v13717_v36 = vld [vmem:[%s17854_s1 + $0x230] sm:$0xff]   ;;  %v13722_v39 = vld [vmem:[%s17854_s1 + $0x2e8] sm:$0xff]  }
  0x18   :  { %12297 = vmatprep.subr.bf16.mxu0 %v13672_v24  ;;  %8866 = vmatprep.mubr.bf16.mxu1 %v823_v53  ;;  %v195_v19 = vrot.slane %v110_v17, %v14783_v43  ;;  %v188_v20 = vcombine.high %v110_v17, %v110_v17  ;;  %v13711_v24 = vld [vmem:[%s17854_s1 + $0x180] sm:$0xff]   ;;  %v13719_v37 = vld [vmem:[%s17854_s1 + $0x2b0] sm:$0xff]   ;;  %v13721_v40 = vld [vmem:[%s17854_s1 + $0x228] sm:$0xff]  }
  0x19   :  { %12318 = vmatpush3.bf16.msra.mxu1 %v13671_v23  ;;  %v13723_v41 = vld [vmem:[%s17854_s1 + $0x2a8] sm:$0xff]   ;;  %v13726_v44 = vld [vmem:[%s17854_s1 + $0x2e0] sm:$0xff]   ;;  %v13728_v47 = vld [vmem:[%s17854_s1 + $0x258] sm:$0xff]  }
  0x1a   :  { %12319 = vmatprep.subr.bf16.mxu1 %v13674_v26  ;;  %v203_v22 = vcombine.high %v195_v19, %v195_v19  ;;  %v202_v23 = vrot.slane %v188_v20, %v14783_v43  ;;  %v13712_v26 = vld [vmem:[%s17854_s1 + $0x278] sm:$0xff]   ;;  %v13725_v45 = vld [vmem:[%s17854_s1 + $0x220] sm:$0xff]   ;;  %v13734_v52 = vld [vmem:[%s17854_s1 + $0x2d0] sm:$0xff]  }
  0x1b   :  { %12298 = vmatpush3.bf16.msra.mxu0 %v13673_v25  ;;  %v13727_v46 = vld [vmem:[%s17854_s1 + $0x2a0] sm:$0xff]   ;;  %v13733_v53 = vld [vmem:[%s17854_s1 + $0x210] sm:$0xff]   ;;  %v13754_v20 = vld [vmem:[%s17854_s1 + $0x3e8] sm:$0xff]  }
  0x1c   :  { %12299 = vmatprep.subr.bf16.mxu0 %v13676_v29  ;;  %v825_v25 = vpack.c.bf16 %v203_v22, %v203_v22  ;;  %v204_v27 = vcombine.high %v202_v23, %v202_v23  ;;  %v13714_v29 = vld [vmem:[%s17854_s1 + $0x2f8] sm:$0xff]   ;;  %v826_v32 = vpack.c.bf16 %v202_v23, %v202_v23  ;;  %v13748_v15 = vld [vmem:[%s17854_s1 + $0x370] sm:$0xff]   ;;  %v13755_v22 = vld [vmem:[%s17854_s1 + $0x3a8] sm:$0xff]  }
  0x1d   :  { %12320 = vmatpush3.bf16.msra.mxu1 %v13675_v28  ;;  %v13713_v28 = vld [vmem:[%s17854_s1 + $0x238] sm:$0xff]   ;;  %v13749_v17 = vld [vmem:[%s17854_s1 + $0x330] sm:$0xff]   ;;  %v13756_v23 = vld [vmem:[%s17854_s1 + $0x360] sm:$0xff]  }
  0x1e   :  { %12321 = vmatprep.subr.bf16.mxu1 %v13678_v31  ;;  %v827_v31 = vpack.c.bf16 %v204_v27, %v204_v27  ;;  %v13760_v27 = vld [vmem:[%s17854_s1 + $0x358] sm:$0xff]  }
  0x1f   :  { %12300 = vmatpush3.bf16.msra.mxu0 %v13677_v30  ;;  %v824_v30 = vpack.c.bf16 %v195_v19, %v195_v19  ;;  %v13752_v19 = vld [vmem:[%s17854_s1 + $0x368] sm:$0xff]  }
  0x20   :  { %12329 = vmatprep.subr.bf16.mxu0 %v13680_v38  ;;  %v13720_v38 = vld [vmem:[%s17854_s1 + $0x268] sm:$0xff]  }
  0x21   :  { %12322 = vmatpush3.bf16.msra.mxu1 %v13679_v34  ;;  %v13716_v34 = vld [vmem:[%s17854_s1 + $0x270] sm:$0xff]  }
  0x22   :  { %12351 = vmatprep.subr.bf16.mxu1 %v13682_v42  ;;  %8827 = vmatmul.mubr.bf16.vlgmr.msra.gmra.mxu0 %v820_v49  ;;  %v13724_v42 = vld [vmem:[%s17854_s1 + $0x260] sm:$0xff]   ;;  %v13729_v49 = vld [vmem:[%s17854_s1 + $0x218] sm:$0xff]  }
  0x23   :  { %12330 = vmatpush3.bf16.msra.mxu0 %v13681_v48  ;;  %8906 = vmatprep.mubr.bf16.mxu0 %v825_v25  ;;  %v13730_v48 = vld [vmem:[%s17854_s1 + $0x2d8] sm:$0xff]   ;;  %v13757_v25 = vld [vmem:[%s17854_s1 + $0x320] sm:$0xff]  }
  0x24   :  { %8867 = vmatmul.mubr.bf16.vlgmr.msra.gmra.mxu1 %v822_v50  ;;  %12331 = vmatprep.subr.bf16.mxu0 %v13684_v54  ;;  %v13731_v50 = vld [vmem:[%s17854_s1 + $0x298] sm:$0xff]   ;;  %v13735_v54 = vld [vmem:[%s17854_s1 + $0x290] sm:$0xff]  }
  0x25   :  { %12352 = vmatpush3.bf16.msra.mxu1 %v13683_v51  ;;  %8946 = vmatprep.mubr.bf16.mxu1 %v827_v31  ;;  %v13732_v51 = vld [vmem:[%s17854_s1 + $0x250] sm:$0xff]  }
  0x26   :  { %12353 = vmatprep.subr.bf16.mxu1 %v13686_v55  ;;  %v13736_v55 = vld [vmem:[%s17854_s1 + $0x248] sm:$0xff]   ;;  %v13764_v31 = vld [vmem:[%s17854_s1 + $0x350] sm:$0xff]  }
  0x27   :  { %12332 = vmatpush3.bf16.msra.mxu0 %v13685_v56  ;;  %v13738_v56 = vld [vmem:[%s17854_s1 + $0x2c8] sm:$0xff]  }
  0x28   :  { %12333 = vmatprep.subr.bf16.mxu0 %v13688_v58  ;;  %v18_v58 = vld [vmem:[%s17853_s0 + $0x10] sm:$0xff] }
  0x29   :  { %12354 = vmatpush3.bf16.msra.mxu1 %v13687_v57  ;;  %v13737_v57 = vld [vmem:[%s17854_s1 + $0x208] sm:$0xff]   ;;  %vm49_vm2 = vcmp.ge.f32.partialorder %v18_v58, 0.0 }
  0x2a   :  { %12355 = vmatprep.subr.bf16.mxu1 %v13690_v59  ;;  %v13739_v59 = vld [vmem:[%s17854_s1 + $0x288] sm:$0xff]  }
  0x2b   :  { %12334 = vmatpush3.bf16.msra.mxu0 %v13689_v60  ;;  %v80_v60 = vmul.f32 0.01, %v18_v58 }
  0x2c   :  { %12335 = vmatprep.subr.bf16.mxu0 %v13692_v62  ;;  %v13742_v62 = vld [vmem:[%s17854_s1 + $0x2c0] sm:$0xff]  }
  0x2d   :  { %12356 = vmatpush3.bf16.msra.mxu1 %v13691_v61  ;;  %v13740_v61 = vld [vmem:[%s17854_s1 + $0x240] sm:$0xff]  }
  0x2e   :  { %12357 = vmatprep.subr.bf16.mxu1 %v13694_v63  ;;  %v111_v63 = vsel %vm49_vm2, %v18_v58, %v80_v60  ;;  %v13779_v58 = vld [vmem:[%s17854_s1 + $0x4b8] sm:$0xff]   ;;  %v13780_v60 = vld [vmem:[%s17854_s1 + $0x470] sm:$0xff]  }
  0x2f   :  { %12336 = vmatpush3.bf16.msra.mxu0 %v13693_v0  ;;  %v212_v0 = vrot.slane %v111_v63, %v14783_v43 }
  0x30   :  { %12337 = vmatprep.subr.bf16.mxu0 %v13696_v2  ;;  %v13741_v2 = vld [vmem:[%s17854_s1 + $0x200] sm:$0xff]  }
  0x31   :  { %12358 = vmatpush3.bf16.msra.mxu1 %v13695_v1  ;;  %v205_v1 = vcombine.high %v111_v63, %v111_v63  ;;  %v13783_v63 = vld [vmem:[%s17854_s1 + $0x4b0] sm:$0xff]  }
  0x32   :  { %12359 = vmatprep.subr.bf16.mxu1 %v13698_v3  ;;  %v220_v3 = vcombine.high %v212_v0, %v212_v0 }
  0x33   :  { %12338 = vmatpush3.bf16.msra.mxu0 %v13697_v4  ;;  %v13743_v4 = vld [vmem:[%s17854_s1 + $0x280] sm:$0xff]  }
  0x34   :  { %12339 = vmatprep.subr.bf16.mxu0 %v13700_v6  ;;  %v13744_v6 = vld [vmem:[%s17854_s1 + $0x378] sm:$0xff]  }
  0x35   :  { %12360 = vmatpush3.bf16.msra.mxu1 %v13699_v5  ;;  %v219_v5 = vrot.slane %v205_v1, %v14783_v43  ;;  %v13786_v1 = vld [vmem:[%s17854_s1 + $0x4e8] sm:$0xff]  }
  0x36   :  { %12361 = vmatprep.subr.bf16.mxu1 %v13702_v7  ;;  %v829_v7 = vpack.c.bf16 %v220_v3, %v220_v3  ;;  %v13787_v3 = vld [vmem:[%s17854_s1 + $0x4a8] sm:$0xff]  }
  0x37   :  { %12340 = vmatpush3.bf16.msra.mxu0 %v13701_v8  ;;  %v221_v8 = vcombine.high %v219_v5, %v219_v5 }
  0x38   :  { %12341 = vmatprep.subr.bf16.mxu0 %v13704_v10  ;;  %v828_v10 = vpack.c.bf16 %v212_v0, %v212_v0  ;;  %v13784_v0 = vld [vmem:[%s17854_s1 + $0x468] sm:$0xff]  }
  0x39   :  { %12362 = vmatpush3.bf16.msra.mxu1 %v13703_v9  ;;  %v13746_v9 = vld [vmem:[%s17854_s1 + $0x3f8] sm:$0xff]   ;;  %v831_v12 = vpack.c.bf16 %v221_v8, %v221_v8 }
  0x3a   :  { %12363 = vmatprep.subr.bf16.mxu1 %v13706_v11  ;;  %v13745_v11 = vld [vmem:[%s17854_s1 + $0x338] sm:$0xff]  }
  0x3b   :  { %12342 = vmatpush3.bf16.msra.mxu0 %v13705_v13  ;;  %v830_v13 = vpack.c.bf16 %v219_v5, %v219_v5  ;;  %v13790_v5 = vld [vmem:[%s17854_s1 + $0x4e0] sm:$0xff]   ;;  %v13792_v8 = vld [vmem:[%s17854_s1 + $0x458] sm:$0xff]  }
  0x3c   :  { %12343 = vmatprep.subr.bf16.mxu0 %v13708_v16  ;;  %v13750_v16 = vld [vmem:[%s17854_s1 + $0x3f0] sm:$0xff]  }
  0x3d   :  { %12364 = vmatpush3.bf16.msra.mxu1 %v13707_v14  ;;  %v13747_v14 = vld [vmem:[%s17854_s1 + $0x3b8] sm:$0xff]  }
  0x3e   :  { %12365 = vmatprep.subr.bf16.mxu1 %v13710_v18  ;;  %v13751_v18 = vld [vmem:[%s17854_s1 + $0x3b0] sm:$0xff]  }
  0x3f   :  { %12344 = vmatpush3.bf16.msra.mxu0 %v13709_v21  ;;  %v13753_v21 = vld [vmem:[%s17854_s1 + $0x328] sm:$0xff]  }
  0x40   :  { %12373 = vmatprep.subr.bf16.mxu0 %v13712_v26  ;;  %v13759_v26 = vld [vmem:[%s17854_s1 + $0x3a0] sm:$0xff]  }
  0x41   :  { %12366 = vmatpush3.bf16.msra.mxu1 %v13711_v24  ;;  %v13758_v24 = vld [vmem:[%s17854_s1 + $0x3e0] sm:$0xff]  }
  0x42   :  { %12395 = vmatprep.subr.bf16.mxu1 %v13714_v29  ;;  %8907 = vmatmul.mubr.bf16.vlgmr.msra.gmra.mxu0 %v824_v30  ;;  %v13761_v29 = vld [vmem:[%s17854_s1 + $0x318] sm:$0xff]  }
  0x43   :  { %12374 = vmatpush3.bf16.msra.mxu0 %v13713_v28  ;;  %8986 = vmatprep.mubr.bf16.mxu0 %v829_v7  ;;  %v13762_v28 = vld [vmem:[%s17854_s1 + $0x3d8] sm:$0xff]   ;;  %v13791_v7 = vld [vmem:[%s17854_s1 + $0x4a0] sm:$0xff]  }
  0x44   :  { %8947 = vmatmul.mubr.bf16.vlgmr.msra.gmra.mxu1 %v826_v32  ;;  %12375 = vmatprep.subr.bf16.mxu0 %v13716_v34  ;;  %v13763_v30 = vld [vmem:[%s17854_s1 + $0x398] sm:$0xff]   ;;  %v13766_v32 = vld [vmem:[%s17854_s1 + $0x3d0] sm:$0xff]  }
  0x45   :  { %12396 = vmatpush3.bf16.msra.mxu1 %v13715_v33  ;;  %9026 = vmatprep.mubr.bf16.mxu1 %v831_v12  ;;  %v13765_v33 = vld [vmem:[%s17854_s1 + $0x310] sm:$0xff]  }
  0x46   :  { %12397 = vmatprep.subr.bf16.mxu1 %v13718_v35  ;;  %v13767_v34 = vld [vmem:[%s17854_s1 + $0x390] sm:$0xff]   ;;  %v13768_v35 = vld [vmem:[%s17854_s1 + $0x348] sm:$0xff]  }
  0x47   :  { %12376 = vmatpush3.bf16.msra.mxu0 %v13717_v36  ;;  %v13769_v36 = vld [vmem:[%s17854_s1 + $0x308] sm:$0xff]   ;;  %v13796_v12 = vld [vmem:[%s17854_s1 + $0x450] sm:$0xff]  }
  0x48   :  { %12377 = vmatprep.subr.bf16.mxu0 %v13720_v38  ;;  %v19_v38 = vld [vmem:[%s17853_s0 + $0x18] sm:$0xff] }
  0x49   :  { %12398 = vmatpush3.bf16.msra.mxu1 %v13719_v37  ;;  %v13770_v37 = vld [vmem:[%s17854_s1 + $0x3c8] sm:$0xff]   ;;  %vm50_vm3 = vcmp.ge.f32.partialorder %v19_v38, 0.0 }
  0x4a   :  { %12399 = vmatprep.subr.bf16.mxu1 %v13722_v39  ;;  %v13771_v39 = vld [vmem:[%s17854_s1 + $0x388] sm:$0xff]  }
  0x4b   :  { %12378 = vmatpush3.bf16.msra.mxu0 %v13721_v40  ;;  %v81_v40 = vmul.f32 0.01, %v19_v38 }
  0x4c   :  { %12379 = vmatprep.subr.bf16.mxu0 %v13724_v42  ;;  %v13774_v42 = vld [vmem:[%s17854_s1 + $0x3c0] sm:$0xff]  }
  0x4d   :  { %12400 = vmatpush3.bf16.msra.mxu1 %v13723_v41  ;;  %v13772_v41 = vld [vmem:[%s17854_s1 + $0x340] sm:$0xff]  }
  0x4e   :  { %12401 = vmatprep.subr.bf16.mxu1 %v13726_v44  ;;  %v112_v44 = vsel %vm50_vm3, %v19_v38, %v81_v40  ;;  %v13811_v38 = vld [vmem:[%s17854_s1 + $0x5b8] sm:$0xff]   ;;  %v13812_v40 = vld [vmem:[%s17854_s1 + $0x570] sm:$0xff]  }
  0x4f   :  { %12380 = vmatpush3.bf16.msra.mxu0 %v13725_v45  ;;  %v13773_v45 = vld [vmem:[%s17854_s1 + $0x300] sm:$0xff]  }
  0x50   :  { %12381 = vmatprep.subr.bf16.mxu0 %v13728_v47  ;;  %v222_v47 = vcombine.high %v112_v44, %v112_v44 }
  0x51   :  { %12402 = vmatpush3.bf16.msra.mxu1 %v13727_v46  ;;  %v229_v46 = vrot.slane %v112_v44, %v14783_v43  ;;  %v13815_v44 = vld [vmem:[%s17854_s1 + $0x5b0] sm:$0xff]  }
  0x52   :  { %12403 = vmatprep.subr.bf16.mxu1 %v13730_v48  ;;  %v13775_v48 = vld [vmem:[%s17854_s1 + $0x380] sm:$0xff]  }
  0x53   :  { %12382 = vmatpush3.bf16.msra.mxu0 %v13729_v49  ;;  %v237_v49 = vcombine.high %v229_v46, %v229_v46 }
  0x54   :  { %12383 = vmatprep.subr.bf16.mxu0 %v13732_v51  ;;  %v236_v51 = vrot.slane %v222_v47, %v14783_v43  ;;  %v13817_v47 = vld [vmem:[%s17854_s1 + $0x528] sm:$0xff]  }
  0x55   :  { %12404 = vmatpush3.bf16.msra.mxu1 %v13731_v50  ;;  %v13776_v50 = vld [vmem:[%s17854_s1 + $0x478] sm:$0xff]  }
  0x56   :  { %12405 = vmatprep.subr.bf16.mxu1 %v13734_v52  ;;  %v13778_v52 = vld [vmem:[%s17854_s1 + $0x4f8] sm:$0xff]  }
  0x57   :  { %12384 = vmatpush3.bf16.msra.mxu0 %v13733_v53  ;;  %v833_v53 = vpack.c.bf16 %v237_v49, %v237_v49  ;;  %v13820_v49 = vld [vmem:[%s17854_s1 + $0x560] sm:$0xff]  }
  0x58   :  { %12385 = vmatprep.subr.bf16.mxu0 %v13736_v55  ;;  %v238_v55 = vcombine.high %v236_v51, %v236_v51 }
  0x59   :  { %12406 = vmatpush3.bf16.msra.mxu1 %v13735_v54  ;;  %v832_v54 = vpack.c.bf16 %v229_v46, %v229_v46  ;;  %v13818_v46 = vld [vmem:[%s17854_s1 + $0x5e8] sm:$0xff]  }
  0x5a   :  { %12407 = vmatprep.subr.bf16.mxu1 %v13738_v56  ;;  %v13777_v56 = vld [vmem:[%s17854_s1 + $0x438] sm:$0xff]  }
  0x5b   :  { %12386 = vmatpush3.bf16.msra.mxu0 %v13737_v57  ;;  %v834_v57 = vpack.c.bf16 %v236_v51, %v236_v51  ;;  %v13821_v51 = vld [vmem:[%s17854_s1 + $0x520] sm:$0xff]  }
  0x5c   :  { %12387 = vmatprep.subr.bf16.mxu0 %v13740_v61  ;;  %v13782_v61 = vld [vmem:[%s17854_s1 + $0x4f0] sm:$0xff]  }
  0x5d   :  { %12408 = vmatpush3.bf16.msra.mxu1 %v13739_v59  ;;  %v835_v59 = vpack.c.bf16 %v238_v55, %v238_v55  ;;  %v13825_v55 = vld [vmem:[%s17854_s1 + $0x518] sm:$0xff]  }
  0x5e   :  { %12409 = vmatprep.subr.bf16.mxu1 %v13742_v62  ;;  %v13781_v62 = vld [vmem:[%s17854_s1 + $0x430] sm:$0xff]  }
  0x5f   :  { %12388 = vmatpush3.bf16.msra.mxu0 %v13741_v2  ;;  %v13785_v2 = vld [vmem:[%s17854_s1 + $0x428] sm:$0xff]  }
  0x60   :  { %12417 = vmatprep.subr.bf16.mxu0 %v13744_v6  ;;  %v13789_v6 = vld [vmem:[%s17854_s1 + $0x420] sm:$0xff]  }
  0x61   :  { %12410 = vmatpush3.bf16.msra.mxu1 %v13743_v4  ;;  %v13788_v4 = vld [vmem:[%s17854_s1 + $0x460] sm:$0xff]  }
  0x62   :  { %12439 = vmatprep.subr.bf16.mxu1 %v13746_v9  ;;  %8987 = vmatmul.mubr.bf16.vlgmr.msra.gmra.mxu0 %v828_v10  ;;  %v13794_v9 = vld [vmem:[%s17854_s1 + $0x4d8] sm:$0xff]  }
  0x63   :  { %12418 = vmatpush3.bf16.msra.mxu0 %v13745_v11  ;;  %9066 = vmatprep.mubr.bf16.mxu0 %v833_v53  ;;  %v13793_v10 = vld [vmem:[%s17854_s1 + $0x418] sm:$0xff]  }
  0x64   :  { %9027 = vmatmul.mubr.bf16.vlgmr.msra.gmra.mxu1 %v830_v13  ;;  %12419 = vmatprep.subr.bf16.mxu0 %v13748_v15  ;;  %v13795_v11 = vld [vmem:[%s17854_s1 + $0x498] sm:$0xff]   ;;  %v13798_v13 = vld [vmem:[%s17854_s1 + $0x4d0] sm:$0xff]  }
  0x65   :  { %12440 = vmatpush3.bf16.msra.mxu1 %v13747_v14  ;;  %9106 = vmatprep.mubr.bf16.mxu1 %v835_v59  ;;  %v13797_v14 = vld [vmem:[%s17854_s1 + $0x410] sm:$0xff]   ;;  %v13824_v53 = vld [vmem:[%s17854_s1 + $0x558] sm:$0xff]  }
  0x66   :  { %12441 = vmatprep.subr.bf16.mxu1 %v13750_v16  ;;  %v13799_v15 = vld [vmem:[%s17854_s1 + $0x490] sm:$0xff]   ;;  %v13800_v16 = vld [vmem:[%s17854_s1 + $0x448] sm:$0xff]  }
  0x67   :  { %12420 = vmatpush3.bf16.msra.mxu0 %v13749_v17  ;;  %v13801_v17 = vld [vmem:[%s17854_s1 + $0x408] sm:$0xff]   ;;  %v13829_v59 = vld [vmem:[%s17854_s1 + $0x510] sm:$0xff]  }
  0x68   :  { %12421 = vmatprep.subr.bf16.mxu0 %v13752_v19  ;;  %v13803_v19 = vld [vmem:[%s17854_s1 + $0x488] sm:$0xff]  }
  0x69   :  { %12442 = vmatpush3.bf16.msra.mxu1 %v13751_v18  ;;  %v13802_v18 = vld [vmem:[%s17854_s1 + $0x4c8] sm:$0xff]  }
  0x6a   :  { %12443 = vmatprep.subr.bf16.mxu1 %v13754_v20  ;;  %v20_v20 = vld [vmem:[%s17853_s0 + $0x20] sm:$0xff] }
  0x6b   :  { %12422 = vmatpush3.bf16.msra.mxu0 %v13753_v21  ;;  %v13804_v21 = vld [vmem:[%s17854_s1 + $0x440] sm:$0xff]   ;;  %vm51_vm4 = vcmp.ge.f32.partialorder %v20_v20, 0.0 }
  0x6c   :  { %12423 = vmatprep.subr.bf16.mxu0 %v13756_v23  ;;  %v13806_v23 = vld [vmem:[%s17854_s1 + $0x4c0] sm:$0xff]  }
  0x6d   :  { %12444 = vmatpush3.bf16.msra.mxu1 %v13755_v22  ;;  %v82_v22 = vmul.f32 0.01, %v20_v20 }
  0x6e   :  { %12445 = vmatprep.subr.bf16.mxu1 %v13758_v24 }
  0x6f   :  { %12424 = vmatpush3.bf16.msra.mxu0 %v13757_v25  ;;  %v113_v24 = vsel %vm51_vm4, %v20_v20, %v82_v22  ;;  %v13805_v25 = vld [vmem:[%s17854_s1 + $0x400] sm:$0xff]   ;;  %v13844_v20 = vld [vmem:[%s17854_s1 + $0x670] sm:$0xff]  }
  0x70   :  { %12425 = vmatprep.subr.bf16.mxu0 %v13760_v27  ;;  %v239_v27 = vcombine.high %v113_v24, %v113_v24  ;;  %v13845_v22 = vld [vmem:[%s17854_s1 + $0x630] sm:$0xff]  }
  0x71   :  { %12446 = vmatpush3.bf16.msra.mxu1 %v13759_v26  ;;  %v246_v26 = vrot.slane %v113_v24, %v14783_v43  ;;  %v13847_v24 = vld [vmem:[%s17854_s1 + $0x6b0] sm:$0xff]  }
  0x72   :  { %12447 = vmatprep.subr.bf16.mxu1 %v13762_v28  ;;  %v13807_v28 = vld [vmem:[%s17854_s1 + $0x480] sm:$0xff]  }
  0x73   :  { %12426 = vmatpush3.bf16.msra.mxu0 %v13761_v29  ;;  %v254_v29 = vcombine.high %v246_v26, %v246_v26 }
  0x74   :  { %12427 = vmatprep.subr.bf16.mxu0 %v13764_v31  ;;  %v253_v31 = vrot.slane %v239_v27, %v14783_v43  ;;  %v13850_v27 = vld [vmem:[%s17854_s1 + $0x6e8] sm:$0xff]  }
  0x75   :  { %12448 = vmatpush3.bf16.msra.mxu1 %v13763_v30  ;;  %v13808_v30 = vld [vmem:[%s17854_s1 + $0x578] sm:$0xff]  }
  0x76   :  { %12449 = vmatprep.subr.bf16.mxu1 %v13766_v32  ;;  %v13810_v32 = vld [vmem:[%s17854_s1 + $0x5f8] sm:$0xff]  }
  0x77   :  { %12428 = vmatpush3.bf16.msra.mxu0 %v13765_v33  ;;  %v837_v33 = vpack.c.bf16 %v254_v29, %v254_v29  ;;  %v13852_v29 = vld [vmem:[%s17854_s1 + $0x660] sm:$0xff]  }
  0x78   :  { %12429 = vmatprep.subr.bf16.mxu0 %v13768_v35  ;;  %v255_v35 = vcombine.high %v253_v31, %v253_v31 }
  0x79   :  { %12450 = vmatpush3.bf16.msra.mxu1 %v13767_v34  ;;  %v836_v34 = vpack.c.bf16 %v246_v26, %v246_v26  ;;  %v13849_v26 = vld [vmem:[%s17854_s1 + $0x628] sm:$0xff]  }
  0x7a   :  { %12451 = vmatprep.subr.bf16.mxu1 %v13770_v37  ;;  %v838_v37 = vpack.c.bf16 %v253_v31, %v253_v31  ;;  %v13854_v31 = vld [vmem:[%s17854_s1 + $0x6e0] sm:$0xff]  }
  0x7b   :  { %12430 = vmatpush3.bf16.msra.mxu0 %v13769_v36  ;;  %v13809_v36 = vld [vmem:[%s17854_s1 + $0x538] sm:$0xff]  }
  0x7c   :  { %12431 = vmatprep.subr.bf16.mxu0 %v13772_v41  ;;  %v13814_v41 = vld [vmem:[%s17854_s1 + $0x5f0] sm:$0xff]  }
  0x7d   :  { %12452 = vmatpush3.bf16.msra.mxu1 %v13771_v39  ;;  %v839_v39 = vpack.c.bf16 %v255_v35, %v255_v35  ;;  %v13858_v35 = vld [vmem:[%s17854_s1 + $0x6d8] sm:$0xff]  }
  0x7e   :  { %12453 = vmatprep.subr.bf16.mxu1 %v13774_v42  ;;  %v13813_v42 = vld [vmem:[%s17854_s1 + $0x530] sm:$0xff]  }
  0x7f   :  { %12432 = vmatpush3.bf16.msra.mxu0 %v13773_v45  ;;  %v13816_v45 = vld [vmem:[%s17854_s1 + $0x568] sm:$0xff]  }
  0x80   :  { %12461 = vmatprep.subr.bf16.mxu0 %v13776_v50  ;;  %v13822_v50 = vld [vmem:[%s17854_s1 + $0x5e0] sm:$0xff]  }
  0x81   :  { %12454 = vmatpush3.bf16.msra.mxu1 %v13775_v48  ;;  %v13819_v48 = vld [vmem:[%s17854_s1 + $0x5a8] sm:$0xff]  }
  0x82   :  { %12483 = vmatprep.subr.bf16.mxu1 %v13778_v52  ;;  %9067 = vmatmul.mubr.bf16.vlgmr.msra.gmra.mxu0 %v832_v54  ;;  %v13823_v52 = vld [vmem:[%s17854_s1 + $0x5a0] sm:$0xff]   ;;  %v13826_v54 = vld [vmem:[%s17854_s1 + $0x5d8] sm:$0xff]  }
  0x83   :  { %12462 = vmatpush3.bf16.msra.mxu0 %v13777_v56  ;;  %9146 = vmatprep.mubr.bf16.mxu0 %v837_v33  ;;  %v13827_v56 = vld [vmem:[%s17854_s1 + $0x598] sm:$0xff]  }
  0x84   :  { %9107 = vmatmul.mubr.bf16.vlgmr.msra.gmra.mxu1 %v834_v57  ;;  %12463 = vmatprep.subr.bf16.mxu0 %v13780_v60  ;;  %v13828_v57 = vld [vmem:[%s17854_s1 + $0x550] sm:$0xff]   ;;  %v13856_v33 = vld [vmem:[%s17854_s1 + $0x658] sm:$0xff]  }
  0x85   :  { %12484 = vmatpush3.bf16.msra.mxu1 %v13779_v58  ;;  %9186 = vmatprep.mubr.bf16.mxu1 %v839_v39  ;;  %v13830_v58 = vld [vmem:[%s17854_s1 + $0x5d0] sm:$0xff]  }
  0x86   :  { %12485 = vmatprep.subr.bf16.mxu1 %v13782_v61  ;;  %v13831_v60 = vld [vmem:[%s17854_s1 + $0x590] sm:$0xff]   ;;  %v13832_v61 = vld [vmem:[%s17854_s1 + $0x548] sm:$0xff]  }
  0x87   :  { %12464 = vmatpush3.bf16.msra.mxu0 %v13781_v62  ;;  %v13834_v62 = vld [vmem:[%s17854_s1 + $0x5c8] sm:$0xff]   ;;  %v13862_v39 = vld [vmem:[%s17854_s1 + $0x6d0] sm:$0xff]  }
  0x88   :  { %12465 = vmatprep.subr.bf16.mxu0 %v13784_v0  ;;  %v13835_v0 = vld [vmem:[%s17854_s1 + $0x588] sm:$0xff]  }
  0x89   :  { %12486 = vmatpush3.bf16.msra.mxu1 %v13783_v63  ;;  %v13833_v63 = vld [vmem:[%s17854_s1 + $0x508] sm:$0xff]  }
  0x8a   :  { %12487 = vmatprep.subr.bf16.mxu1 %v13786_v1  ;;  %v21_v1 = vld [vmem:[%s17853_s0 + $0x28] sm:$0xff] }
  0x8b   :  { %12466 = vmatpush3.bf16.msra.mxu0 %v13785_v2  ;;  %v13836_v2 = vld [vmem:[%s17854_s1 + $0x540] sm:$0xff]   ;;  %vm52_vm5 = vcmp.ge.f32.partialorder %v21_v1, 0.0 }
  0x8c   :  { %12467 = vmatprep.subr.bf16.mxu0 %v13788_v4  ;;  %v13838_v4 = vld [vmem:[%s17854_s1 + $0x5c0] sm:$0xff]  }
  0x8d   :  { %12488 = vmatpush3.bf16.msra.mxu1 %v13787_v3  ;;  %v83_v3 = vmul.f32 0.01, %v21_v1 }
  0x8e   :  { %12489 = vmatprep.subr.bf16.mxu1 %v13790_v5  ;;  %v13837_v5 = vld [vmem:[%s17854_s1 + $0x500] sm:$0xff]  }
  0x8f   :  { %12468 = vmatpush3.bf16.msra.mxu0 %v13789_v6  ;;  %v114_v6 = vsel %vm52_vm5, %v21_v1, %v83_v3  ;;  %v13876_v1 = vld [vmem:[%s17854_s1 + $0x770] sm:$0xff]  }
  0x90   :  { %12469 = vmatprep.subr.bf16.mxu0 %v13792_v8  ;;  %v13839_v8 = vld [vmem:[%s17854_s1 + $0x580] sm:$0xff]  }
  0x91   :  { %12490 = vmatpush3.bf16.msra.mxu1 %v13791_v7  ;;  %v263_v7 = vrot.slane %v114_v6, %v14783_v43 }
  0x92   :  { %12491 = vmatprep.subr.bf16.mxu1 %v13794_v9  ;;  %v256_v9 = vcombine.high %v114_v6, %v114_v6  ;;  %v13877_v6 = vld [vmem:[%s17854_s1 + $0x730] sm:$0xff]  }
  0x93   :  { %12470 = vmatpush3.bf16.msra.mxu0 %v13793_v10  ;;  %v13840_v10 = vld [vmem:[%s17854_s1 + $0x678] sm:$0xff]  }
  0x94   :  { %12471 = vmatprep.subr.bf16.mxu0 %v13796_v12  ;;  %v270_v12 = vrot.slane %v256_v9, %v14783_v43 }
  0x95   :  { %12492 = vmatpush3.bf16.msra.mxu1 %v13795_v11  ;;  %v271_v11 = vcombine.high %v263_v7, %v263_v7 }
  0x96   :  { %12493 = vmatprep.subr.bf16.mxu1 %v13798_v13  ;;  %v13842_v13 = vld [vmem:[%s17854_s1 + $0x6f8] sm:$0xff]  }
  0x97   :  { %12472 = vmatpush3.bf16.msra.mxu0 %v13797_v14  ;;  %v840_v14 = vpack.c.bf16 %v263_v7, %v263_v7  ;;  %v13878_v7 = vld [vmem:[%s17854_s1 + $0x7f0] sm:$0xff]  }
  0x98   :  { %12473 = vmatprep.subr.bf16.mxu0 %v13800_v16  ;;  %v841_v16 = vpack.c.bf16 %v271_v11, %v271_v11 }
  0x99   :  { %12494 = vmatpush3.bf16.msra.mxu1 %v13799_v15  ;;  %v13841_v15 = vld [vmem:[%s17854_s1 + $0x638] sm:$0xff]  }
  0x9a   :  { %12495 = vmatprep.subr.bf16.mxu1 %v13802_v18  ;;  %v13843_v18 = vld [vmem:[%s17854_s1 + $0x6b8] sm:$0xff]  }
  0x9b   :  { %12474 = vmatpush3.bf16.msra.mxu0 %v13801_v17  ;;  %v272_v17 = vcombine.high %v270_v12, %v270_v12 }
  0x9c   :  { %12475 = vmatprep.subr.bf16.mxu0 %v13804_v21 }
  0x9d   :  { %12496 = vmatpush3.bf16.msra.mxu1 %v13803_v19  ;;  %v842_v19 = vpack.c.bf16 %v270_v12, %v270_v12  ;;  %v843_v21 = vpack.c.bf16 %v272_v17, %v272_v17 }
  0x9e   :  { %12497 = vmatprep.subr.bf16.mxu1 %v13806_v23  ;;  %v13846_v23 = vld [vmem:[%s17854_s1 + $0x6f0] sm:$0xff]  }
  0x9f   :  { %12476 = vmatpush3.bf16.msra.mxu0 %v13805_v25  ;;  %v13848_v25 = vld [vmem:[%s17854_s1 + $0x668] sm:$0xff]  }
  0xa0   :  { %12505 = vmatprep.subr.bf16.mxu0 %v13808_v30  ;;  %v13853_v30 = vld [vmem:[%s17854_s1 + $0x620] sm:$0xff]  }
  0xa1   :  { %12498 = vmatpush3.bf16.msra.mxu1 %v13807_v28  ;;  %v13851_v28 = vld [vmem:[%s17854_s1 + $0x6a8] sm:$0xff]  }
  0xa2   :  { %12527 = vmatprep.subr.bf16.mxu1 %v13810_v32  ;;  %9147 = vmatmul.mubr.bf16.vlgmr.msra.gmra.mxu0 %v836_v34  ;;  %v13855_v32 = vld [vmem:[%s17854_s1 + $0x6a0] sm:$0xff]   ;;  %v13857_v34 = vld [vmem:[%s17854_s1 + $0x618] sm:$0xff]  }
  0xa3   :  { %12506 = vmatpush3.bf16.msra.mxu0 %v13809_v36  ;;  %9226 = vmatprep.mubr.bf16.mxu0 %v841_v16  ;;  %v13859_v36 = vld [vmem:[%s17854_s1 + $0x698] sm:$0xff]  }
  0xa4   :  { %9187 = vmatmul.mubr.bf16.vlgmr.msra.gmra.mxu1 %v838_v37  ;;  %12507 = vmatprep.subr.bf16.mxu0 %v13812_v40  ;;  %v13860_v37 = vld [vmem:[%s17854_s1 + $0x650] sm:$0xff]  }
  0xa5   :  { %12528 = vmatpush3.bf16.msra.mxu1 %v13811_v38  ;;  %9266 = vmatprep.mubr.bf16.mxu1 %v843_v21  ;;  %v13861_v38 = vld [vmem:[%s17854_s1 + $0x610] sm:$0xff]  }
  0xa6   :  { %12529 = vmatprep.subr.bf16.mxu1 %v13814_v41  ;;  %v13863_v40 = vld [vmem:[%s17854_s1 + $0x690] sm:$0xff]   ;;  %v13864_v41 = vld [vmem:[%s17854_s1 + $0x648] sm:$0xff]  }
  0xa7   :  { %12508 = vmatpush3.bf16.msra.mxu0 %v13813_v42  ;;  %v13865_v42 = vld [vmem:[%s17854_s1 + $0x608] sm:$0xff]  }
  0xa8   :  { %12509 = vmatprep.subr.bf16.mxu0 %v13816_v45  ;;  %v13868_v45 = vld [vmem:[%s17854_s1 + $0x640] sm:$0xff]  }
  0xa9   :  { %12530 = vmatpush3.bf16.msra.mxu1 %v13815_v44  ;;  %v13866_v44 = vld [vmem:[%s17854_s1 + $0x6c8] sm:$0xff]  }
  0xaa   :  { %12531 = vmatprep.subr.bf16.mxu1 %v13818_v46  ;;  %v22_v46 = vld [vmem:[%s17853_s0 + $0x30] sm:$0xff] }
  0xab   :  { %12510 = vmatpush3.bf16.msra.mxu0 %v13817_v47  ;;  %v13867_v47 = vld [vmem:[%s17854_s1 + $0x688] sm:$0xff]   ;;  %vm53_vm6 = vcmp.ge.f32.partialorder %v22_v46, 0.0 }
  0xac   :  { %12511 = vmatprep.subr.bf16.mxu0 %v13820_v49  ;;  %v13870_v49 = vld [vmem:[%s17854_s1 + $0x6c0] sm:$0xff]  }
  0xad   :  { %12532 = vmatpush3.bf16.msra.mxu1 %v13819_v48  ;;  %v84_v48 = vmul.f32 0.01, %v22_v46 }
  0xae   :  { %12533 = vmatprep.subr.bf16.mxu1 %v13822_v50  ;;  %v13869_v50 = vld [vmem:[%s17854_s1 + $0x600] sm:$0xff]  }
  0xaf   :  { %12512 = vmatpush3.bf16.msra.mxu0 %v13821_v51  ;;  %v115_v51 = vsel %vm53_vm6, %v22_v46, %v84_v48 }
  0xb0   :  { %12513 = vmatprep.subr.bf16.mxu0 %v13824_v53  ;;  %v13872_v53 = vld [vmem:[%s17854_s1 + $0x778] sm:$0xff]  }
  0xb1   :  { %12534 = vmatpush3.bf16.msra.mxu1 %v13823_v52  ;;  %v280_v52 = vrot.slane %v115_v51, %v14783_v43 }
  0xb2   :  { %12535 = vmatprep.subr.bf16.mxu1 %v13826_v54  ;;  %v273_v54 = vcombine.high %v115_v51, %v115_v51 }
  0xb3   :  { %12514 = vmatpush3.bf16.msra.mxu0 %v13825_v55  ;;  %v13871_v55 = vld [vmem:[%s17854_s1 + $0x680] sm:$0xff]  }
  0xb4   :  { %12515 = vmatprep.subr.bf16.mxu0 %v13828_v57  ;;  %v287_v57 = vrot.slane %v273_v54, %v14783_v43  ;;  %v13905_v54 = vld [vmem:[%s17854_s1 + $0x838] sm:$0xff]  }
  0xb5   :  { %12536 = vmatpush3.bf16.msra.mxu1 %v13827_v56  ;;  %v288_v56 = vcombine.high %v280_v52, %v280_v52 }
  0xb6   :  { %12537 = vmatprep.subr.bf16.mxu1 %v13830_v58  ;;  %v13874_v58 = vld [vmem:[%s17854_s1 + $0x7f8] sm:$0xff]  }
  0xb7   :  { %12516 = vmatpush3.bf16.msra.mxu0 %v13829_v59  ;;  %v844_v59 = vpack.c.bf16 %v280_v52, %v280_v52  ;;  %v13906_v52 = vld [vmem:[%s17854_s1 + $0x8f8] sm:$0xff]  }
  0xb8   :  { %12517 = vmatprep.subr.bf16.mxu0 %v13832_v61  ;;  %v845_v61 = vpack.c.bf16 %v288_v56, %v288_v56 }
  0xb9   :  { %12538 = vmatpush3.bf16.msra.mxu1 %v13831_v60  ;;  %v13873_v60 = vld [vmem:[%s17854_s1 + $0x738] sm:$0xff]  }
  0xba   :  { %12539 = vmatprep.subr.bf16.mxu1 %v13834_v62  ;;  %v289_v62 = vcombine.high %v287_v57, %v287_v57 }
  0xbb   :  { %12518 = vmatpush3.bf16.msra.mxu0 %v13833_v63  ;;  %v13875_v63 = vld [vmem:[%s17854_s1 + $0x7b8] sm:$0xff]  }
  0xbc   :  { %12519 = vmatprep.subr.bf16.mxu0 %v13836_v2  ;;  %v847_v3 = vpack.c.bf16 %v289_v62, %v289_v62 }
  0xbd   :  { %12540 = vmatpush3.bf16.msra.mxu1 %v13835_v0  ;;  %v846_v0 = vpack.c.bf16 %v287_v57, %v287_v57  ;;  %v13907_v57 = vld [vmem:[%s17854_s1 + $0x8b8] sm:$0xff]  }
  0xbe   :  { %12541 = vmatprep.subr.bf16.mxu1 %v13838_v4  ;;  %v11303_v4 = vld [vmem:[%s17855_s2] ss:$0 sm:$0xff] }
  0xbf   :  { %12520 = vmatpush3.bf16.msra.mxu0 %v13837_v5 }
  0xc0   :  { %12549 = vmatprep.subr.bf16.mxu0 %v13840_v10  ;;  %v13879_v10 = vld [vmem:[%s17854_s1 + $0x7b0] sm:$0xff]  }
  0xc1   :  { %12542 = vmatpush3.bf16.msra.mxu1 %v13839_v8 }
  0xc2   :  { %12571 = vmatprep.subr.bf16.mxu1 %v13842_v13  ;;  %9227 = vmatmul.mubr.bf16.vlgmr.msra.gmra.mxu0 %v840_v14  ;;  %v13880_v13 = vld [vmem:[%s17854_s1 + $0x768] sm:$0xff]  }
  0xc3   :  { %12550 = vmatpush3.bf16.msra.mxu0 %v13841_v15  ;;  %9306 = vmatprep.mubr.bf16.mxu0 %v845_v61  ;;  %v13881_v15 = vld [vmem:[%s17854_s1 + $0x728] sm:$0xff]   ;;  %v13908_v61 = vld [vmem:[%s17854_s1 + $0x870] sm:$0xff]  }
  0xc4   :  { %9267 = vmatmul.mubr.bf16.vlgmr.msra.gmra.mxu1 %v842_v19  ;;  %12551 = vmatprep.subr.bf16.mxu0 %v13844_v20  ;;  %v13883_v20 = vld [vmem:[%s17854_s1 + $0x7a8] sm:$0xff]  }
  0xc5   :  { %12572 = vmatpush3.bf16.msra.mxu1 %v13843_v18  ;;  %9346 = vmatprep.mubr.bf16.mxu1 %v847_v3  ;;  %v13882_v18 = vld [vmem:[%s17854_s1 + $0x7e8] sm:$0xff]  }
  0xc6   :  { %12573 = vmatprep.subr.bf16.mxu1 %v13846_v23  ;;  %v13884_v23 = vld [vmem:[%s17854_s1 + $0x760] sm:$0xff]  }
  0xc7   :  { %12552 = vmatpush3.bf16.msra.mxu0 %v13845_v22 }
  0xc8   :  { %12553 = vmatprep.subr.bf16.mxu0 %v13848_v25  ;;  %v13886_v25 = vld [vmem:[%s17854_s1 + $0x7e0] sm:$0xff]  }
  0xc9   :  { %12574 = vmatpush3.bf16.msra.mxu1 %v13847_v24  ;;  %v13885_v24 = vld [vmem:[%s17854_s1 + $0x720] sm:$0xff]  }
  0xca   :  { %12575 = vmatprep.subr.bf16.mxu1 %v13850_v27  ;;  %v13888_v27 = vld [vmem:[%s17854_s1 + $0x758] sm:$0xff]  }
  0xcb   :  { %12554 = vmatpush3.bf16.msra.mxu0 %v13849_v26  ;;  %v13887_v26 = vld [vmem:[%s17854_s1 + $0x7a0] sm:$0xff]  }
  0xcc   :  { %12555 = vmatprep.subr.bf16.mxu0 %v13852_v29  ;;  %v13890_v29 = vld [vmem:[%s17854_s1 + $0x7d8] sm:$0xff]  }
  0xcd   :  { %12576 = vmatpush3.bf16.msra.mxu1 %v13851_v28  ;;  %v13889_v28 = vld [vmem:[%s17854_s1 + $0x718] sm:$0xff]  }
  0xce   :  { %12577 = vmatprep.subr.bf16.mxu1 %v13854_v31  ;;  %v13892_v31 = vld [vmem:[%s17854_s1 + $0x750] sm:$0xff]  }
  0xcf   :  { %12556 = vmatpush3.bf16.msra.mxu0 %v13853_v30  ;;  %v13891_v30 = vld [vmem:[%s17854_s1 + $0x798] sm:$0xff]  }
  0xd0   :  { %12557 = vmatprep.subr.bf16.mxu0 %v13856_v33  ;;  %v13894_v33 = vld [vmem:[%s17854_s1 + $0x7d0] sm:$0xff]  }
  0xd1   :  { %12578 = vmatpush3.bf16.msra.mxu1 %v13855_v32  ;;  %v13893_v32 = vld [vmem:[%s17854_s1 + $0x710] sm:$0xff]  }
  0xd2   :  { %12579 = vmatprep.subr.bf16.mxu1 %v13858_v35  ;;  %v13896_v35 = vld [vmem:[%s17854_s1 + $0x748] sm:$0xff]  }
  0xd3   :  { %12558 = vmatpush3.bf16.msra.mxu0 %v13857_v34  ;;  %v13895_v34 = vld [vmem:[%s17854_s1 + $0x790] sm:$0xff]  }
  0xd4   :  { %12559 = vmatprep.subr.bf16.mxu0 %v13860_v37  ;;  %v13898_v37 = vld [vmem:[%s17854_s1 + $0x7c8] sm:$0xff]  }
  0xd5   :  { %12580 = vmatpush3.bf16.msra.mxu1 %v13859_v36  ;;  %v13897_v36 = vld [vmem:[%s17854_s1 + $0x708] sm:$0xff]  }
  0xd6   :  { %12581 = vmatprep.subr.bf16.mxu1 %v13862_v39  ;;  %v23_v39 = vld [vmem:[%s17853_s0 + $0x38] sm:$0xff] }
  0xd7   :  { %12560 = vmatpush3.bf16.msra.mxu0 %v13861_v38  ;;  %v13900_v38 = vld [vmem:[%s17854_s1 + $0x740] sm:$0xff]   ;;  %vm54_vm7 = vcmp.ge.f32.partialorder %v23_v39, 0.0 }
  0xd8   :  { %12561 = vmatprep.subr.bf16.mxu0 %v13864_v41  ;;  %v85_v41 = vmul.f32 0.01, %v23_v39 }
  0xd9   :  { %12582 = vmatpush3.bf16.msra.mxu1 %v13863_v40  ;;  %v13899_v40 = vld [vmem:[%s17854_s1 + $0x788] sm:$0xff]  }
  0xda   :  { %12583 = vmatprep.subr.bf16.mxu1 %v13866_v44  ;;  %v13901_v44 = vld [vmem:[%s17854_s1 + $0x700] sm:$0xff]  }
  0xdb   :  { %12562 = vmatpush3.bf16.msra.mxu0 %v13865_v42  ;;  %v13902_v42 = vld [vmem:[%s17854_s1 + $0x7c0] sm:$0xff]  }
  0xdc   :  { %12563 = vmatprep.subr.bf16.mxu0 %v13868_v45  ;;  %v116_v45 = vsel %vm54_vm7, %v23_v39, %v85_v41 }
  0xdd   :  { %12584 = vmatpush3.bf16.msra.mxu1 %v13867_v47  ;;  %v297_v46 = vrot.slane %v116_v45, %v14783_v43  ;;  %v13904_v47 = vld [vmem:[%s17854_s1 + $0x878] sm:$0xff]   ;;  %v290_v48 = vcombine.high %v116_v45, %v116_v45 }
  0xde   :  { %12585 = vmatprep.subr.bf16.mxu1 %v13870_v49  ;;  %v13903_v49 = vld [vmem:[%s17854_s1 + $0x780] sm:$0xff]  }
  0xdf   :  { %12564 = vmatpush3.bf16.msra.mxu0 %v13869_v50  ;;  %v305_v50 = vcombine.high %v297_v46, %v297_v46  ;;  %v304_v51 = vrot.slane %v290_v48, %v14783_v43 }
  0xe0   :  { %12593 = vmatprep.subr.bf16.mxu0 %v13872_v53  ;;  %v848_v53 = vpack.c.bf16 %v297_v46, %v297_v46  ;;  %v13938_v46 = vld [vmem:[%s17854_s1 + $0x9f8] sm:$0xff]  }
  0xe1   :  { %12586 = vmatpush3.bf16.msra.mxu1 %v13871_v55  ;;  %v849_v55 = vpack.c.bf16 %v305_v50, %v305_v50  ;;  %v306_v56 = vcombine.high %v304_v51, %v304_v51 }
  0xe2   :  { %v12301_v2 = vpop.f32.mrf.mxu0  ;;  %12615 = vmatprep.subr.bf16.mxu1 %v13874_v58  ;;  %9307 = vmatmul.mubr.bf16.vlgmr.msra.gmra.mxu0 %v844_v59 }
  0xe3   :  { %12594 = vmatpush3.bf16.msra.mxu0 %v13873_v60  ;;  %v850_v60 = vpack.c.bf16 %v304_v51, %v304_v51  ;;  %9386 = vmatprep.mubr.bf16.mxu0 %v849_v55  ;;  %v851_v62 = vpack.c.bf16 %v306_v56, %v306_v56  ;;  %v13939_v55 = vld [vmem:[%s17854_s1 + $0x9b8] sm:$0xff]  }
  0xe4   :  { %v12323_v5 = vpop.f32.mrf.mxu1  ;;  %v12302_v8 = vpop.f32.mrf.mxu0  ;;  %9347 = vmatmul.mubr.bf16.vlgmr.msra.gmra.mxu1 %v846_v0  ;;  %12595 = vmatprep.subr.bf16.mxu0 %v13876_v1 }
  0xe5   :  { %v12303_v11 = vadd.f32 %v12302_v8, %v12301_v2  ;;  %12616 = vmatpush3.bf16.msra.mxu1 %v13875_v63  ;;  %v13909_v63 = vld [vmem:[%s17854_s1 + $0x830] sm:$0xff]   ;;  %9426 = vmatprep.mubr.bf16.mxu1 %v851_v62 }
  0xe6   :  { %v12324_v9 = vpop.f32.mrf.mxu1  ;;  %v12304_v14 = vpop.f32.mrf.mxu0  ;;  %12617 = vmatprep.subr.bf16.mxu1 %v13878_v7  ;;  %v13910_v2 = vld [vmem:[%s17854_s1 + $0x8f0] sm:$0xff]   ;;  %v13912_v7 = vld [vmem:[%s17854_s1 + $0x868] sm:$0xff]  }
  0xe7   :  { %v12325_v12 = vadd.f32 %v12324_v9, %v12323_v5  ;;  %v8829_v17 = vadd.f32 %v12303_v11, %v11303_v4  ;;  %12596 = vmatpush3.bf16.msra.mxu0 %v13877_v6  ;;  %v13911_v5 = vld [vmem:[%s17854_s1 + $0x8b0] sm:$0xff]  }
  0xe8   :  { %v12326_v16 = vpop.f32.mrf.mxu1  ;;  %v12305_v19 = vpop.f32.mrf.mxu0  ;;  %12597 = vmatprep.subr.bf16.mxu0 %v13880_v13 }
  0xe9   :  { %v15426_v22 = vadd.f32 %v12325_v12, %v8829_v17  ;;  %12618 = vmatpush3.bf16.msra.mxu1 %v13879_v10  ;;  %v13913_v10 = vld [vmem:[%s17854_s1 + $0x828] sm:$0xff]   ;;  %v13916_v16 = vld [vmem:[%s17854_s1 + $0x860] sm:$0xff]  }
  0xea   :  { %v12327_v21 = vpop.f32.mrf.mxu1  ;;  %12619 = vmatprep.subr.bf16.mxu1 %v13882_v18  ;;  %v13914_v12 = vld [vmem:[%s17854_s1 + $0x8e8] sm:$0xff]   ;;  %v13917_v17 = vld [vmem:[%s17854_s1 + $0x820] sm:$0xff]  }
  0xeb   :  { %12598 = vmatpush3.bf16.msra.mxu0 %v13881_v15  ;;  %v13915_v15 = vld [vmem:[%s17854_s1 + $0x8a8] sm:$0xff]   ;;  %v13918_v18 = vld [vmem:[%s17854_s1 + $0x8e0] sm:$0xff]   ;;  %v13921_v21 = vld [vmem:[%s17854_s1 + $0x818] sm:$0xff]  }
  0xec   :  { %12599 = vmatprep.subr.bf16.mxu0 %v13884_v23  ;;  %v13919_v19 = vld [vmem:[%s17854_s1 + $0x8a0] sm:$0xff]   ;;  %v13923_v23 = vld [vmem:[%s17854_s1 + $0x898] sm:$0xff]  }
  0xed   :  { %12620 = vmatpush3.bf16.msra.mxu1 %v13883_v20  ;;  %v13920_v20 = vld [vmem:[%s17854_s1 + $0x858] sm:$0xff]  }
  0xee   :  { %12621 = vmatprep.subr.bf16.mxu1 %v13886_v25  ;;  %v13925_v25 = vld [vmem:[%s17854_s1 + $0x810] sm:$0xff]  }
  0xef   :  { %12600 = vmatpush3.bf16.msra.mxu0 %v13885_v24  ;;  %v13924_v24 = vld [vmem:[%s17854_s1 + $0x850] sm:$0xff]  }
  0xf0   :  { %12601 = vmatprep.subr.bf16.mxu0 %v13888_v27  ;;  %v13927_v27 = vld [vmem:[%s17854_s1 + $0x890] sm:$0xff]  }
  0xf1   :  { %12622 = vmatpush3.bf16.msra.mxu1 %v13887_v26  ;;  %v13926_v26 = vld [vmem:[%s17854_s1 + $0x8d0] sm:$0xff]  }
  0xf2   :  { %12623 = vmatprep.subr.bf16.mxu1 %v13890_v29  ;;  %v13929_v29 = vld [vmem:[%s17854_s1 + $0x808] sm:$0xff]  }
  0xf3   :  { %12602 = vmatpush3.bf16.msra.mxu0 %v13889_v28  ;;  %v13928_v28 = vld [vmem:[%s17854_s1 + $0x848] sm:$0xff]  }
  0xf4   :  { %12603 = vmatprep.subr.bf16.mxu0 %v13892_v31  ;;  %v13931_v31 = vld [vmem:[%s17854_s1 + $0x888] sm:$0xff]  }
  0xf5   :  { %12624 = vmatpush3.bf16.msra.mxu1 %v13891_v30  ;;  %v13930_v30 = vld [vmem:[%s17854_s1 + $0x8c8] sm:$0xff]  }
  0xf6   :  { %12625 = vmatprep.subr.bf16.mxu1 %v13894_v33  ;;  %v13932_v33 = vld [vmem:[%s17854_s1 + $0x840] sm:$0xff]  }
  0xf7   :  { %12604 = vmatpush3.bf16.msra.mxu0 %v13893_v32  ;;  %v24_v32 = vld [vmem:[%s17853_s0 + $0x40] sm:$0xff] }
  0xf8   :  { %12605 = vmatprep.subr.bf16.mxu0 %v13896_v35  ;;  %vm55_vm8 = vcmp.ge.f32.partialorder %v24_v32, 0.0  ;;  %v13934_v35 = vld [vmem:[%s17854_s1 + $0x8c0] sm:$0xff]  }
  0xf9   :  { %12626 = vmatpush3.bf16.msra.mxu1 %v13895_v34  ;;  %v86_v34 = vmul.f32 0.01, %v24_v32 }
  0xfa   :  { %12627 = vmatprep.subr.bf16.mxu1 %v13898_v37  ;;  %v13933_v37 = vld [vmem:[%s17854_s1 + $0x800] sm:$0xff]  }
  0xfb   :  { %12606 = vmatpush3.bf16.msra.mxu0 %v13897_v36  ;;  %v117_v36 = vsel %vm55_vm8, %v24_v32, %v86_v34  ;;  %v13968_v32 = vld [vmem:[%s17854_s1 + $0xa78] sm:$0xff]   ;;  %v13967_v34 = vld [vmem:[%s17854_s1 + $0x980] sm:$0xff]  }
  0xfc   :  { %12607 = vmatprep.subr.bf16.mxu0 %v13900_v38  ;;  %v314_v38 = vrot.slane %v117_v36, %v14783_v43  ;;  %v307_v39 = vcombine.high %v117_v36, %v117_v36 }
  0xfd   :  { %12628 = vmatpush3.bf16.msra.mxu1 %v13899_v40  ;;  %v13936_v40 = vld [vmem:[%s17854_s1 + $0x978] sm:$0xff]  }
  0xfe   :  { %12629 = vmatprep.subr.bf16.mxu1 %v13902_v42  ;;  %v322_v41 = vcombine.high %v314_v38, %v314_v38  ;;  %v13935_v42 = vld [vmem:[%s17854_s1 + $0x880] sm:$0xff]   ;;  %v852_v45 = vpack.c.bf16 %v314_v38, %v314_v38 }
  0xff   :  { %12608 = vmatpush3.bf16.msra.mxu0 %v13901_v44  ;;  %v321_v44 = vrot.slane %v307_v39, %v14783_v43  ;;  %v13969_v39 = vld [vmem:[%s17854_s1 + $0xa38] sm:$0xff]  }
 0x100   :  { %12637 = vmatprep.subr.bf16.mxu0 %v13904_v47  ;;  %v853_v47 = vpack.c.bf16 %v322_v41, %v322_v41 }
 0x101   :  { %12630 = vmatpush3.bf16.msra.mxu1 %v13903_v49  ;;  %v323_v48 = vcombine.high %v321_v44, %v321_v44  ;;  %v13937_v49 = vld [vmem:[%s17854_s1 + $0x938] sm:$0xff]   ;;  %v854_v51 = vpack.c.bf16 %v321_v44, %v321_v44 }
 0x102   :  { %v12345_v58 = vpop.f32.mrf.mxu0  ;;  %12659 = vmatprep.subr.bf16.mxu1 %v13906_v52  ;;  %9387 = vmatmul.mubr.bf16.vlgmr.msra.gmra.mxu0 %v848_v53  ;;  %v13940_v52 = vld [vmem:[%s17854_s1 + $0x970] sm:$0xff]   ;;  %v13971_v44 = vld [vmem:[%s17854_s1 + $0xab8] sm:$0xff]  }
 0x103   :  { %12638 = vmatpush3.bf16.msra.mxu0 %v13905_v54  ;;  %9466 = vmatprep.mubr.bf16.mxu0 %v853_v47  ;;  %v855_v53 = vpack.c.bf16 %v323_v48, %v323_v48  ;;  %v13972_v47 = vld [vmem:[%s17854_s1 + $0xa70] sm:$0xff]  }
 0x104   :  { %v12367_v59 = vpop.f32.mrf.mxu1  ;;  %v12346_v0 = vpop.f32.mrf.mxu0  ;;  %9427 = vmatmul.mubr.bf16.vlgmr.msra.gmra.mxu1 %v850_v60  ;;  %12639 = vmatprep.subr.bf16.mxu0 %v13908_v61  ;;  %v13941_v60 = vld [vmem:[%s17854_s1 + $0x930] sm:$0xff]  }
 0x105   :  { %v12347_v3 = vadd.f32 %v12346_v0, %v12345_v58  ;;  %12660 = vmatpush3.bf16.msra.mxu1 %v13907_v57  ;;  %v13942_v57 = vld [vmem:[%s17854_s1 + $0x9f0] sm:$0xff]   ;;  %9506 = vmatprep.mubr.bf16.mxu1 %v855_v53 }
 0x106   :  { %v12368_v1 = vpop.f32.mrf.mxu1  ;;  %v12348_v6 = vpop.f32.mrf.mxu0  ;;  %12661 = vmatprep.subr.bf16.mxu1 %v13910_v2  ;;  %v13974_v53 = vld [vmem:[%s17854_s1 + $0xaf0] sm:$0xff]  }
 0x107   :  { %v12369_v4 = vadd.f32 %v12368_v1, %v12367_v59  ;;  %v8909_v9 = vadd.f32 %v12347_v3, %v15426_v22  ;;  %12640 = vmatpush3.bf16.msra.mxu0 %v13909_v63  ;;  %v13922_v22 = vld [vmem:[%s17854_s1 + $0x8d8] sm:$0xff]   ;;  %v13944_v63 = vld [vmem:[%s17854_s1 + $0x968] sm:$0xff]   ;;  %v13943_v1 = vld [vmem:[%s17854_s1 + $0x9b0] sm:$0xff]  }
 0x108   :  { %v12370_v8 = vpop.f32.mrf.mxu1  ;;  %v12349_v11 = vpop.f32.mrf.mxu0  ;;  %12641 = vmatprep.subr.bf16.mxu0 %v13912_v7  ;;  %v13945_v6 = vld [vmem:[%s17854_s1 + $0x928] sm:$0xff]  }
 0x109   :  { %v15527_v14 = vadd.f32 %v12369_v4, %v8909_v9  ;;  %12662 = vmatpush3.bf16.msra.mxu1 %v13911_v5  ;;  %v13946_v4 = vld [vmem:[%s17854_s1 + $0x9e8] sm:$0xff]   ;;  %v13948_v8 = vld [vmem:[%s17854_s1 + $0x960] sm:$0xff]  }
 0x10a   :  { %v12371_v13 = vpop.f32.mrf.mxu1  ;;  %12663 = vmatprep.subr.bf16.mxu1 %v13914_v12  ;;  %v13947_v9 = vld [vmem:[%s17854_s1 + $0x9a8] sm:$0xff]   ;;  %v13949_v11 = vld [vmem:[%s17854_s1 + $0x920] sm:$0xff]   ;;  %v13952_v12 = vld [vmem:[%s17854_s1 + $0x958] sm:$0xff]  }
 0x10b   :  { %12642 = vmatpush3.bf16.msra.mxu0 %v13913_v10  ;;  %v13950_v10 = vld [vmem:[%s17854_s1 + $0x9e0] sm:$0xff]  }
 0x10c   :  { %12643 = vmatprep.subr.bf16.mxu0 %v13916_v16  ;;  %v13951_v13 = vld [vmem:[%s17854_s1 + $0x9a0] sm:$0xff]   ;;  %v13956_v16 = vld [vmem:[%s17854_s1 + $0x950] sm:$0xff]  }
 0x10d   :  { %12664 = vmatpush3.bf16.msra.mxu1 %v13915_v15  ;;  %v13953_v15 = vld [vmem:[%s17854_s1 + $0x918] sm:$0xff]  }
 0x10e   :  { %12665 = vmatprep.subr.bf16.mxu1 %v13918_v18  ;;  %v13958_v18 = vld [vmem:[%s17854_s1 + $0x9d0] sm:$0xff]  }
 0x10f   :  { %12644 = vmatpush3.bf16.msra.mxu0 %v13917_v17  ;;  %v13955_v17 = vld [vmem:[%s17854_s1 + $0x998] sm:$0xff]  }
 0x110   :  { %12645 = vmatprep.subr.bf16.mxu0 %v13920_v20  ;;  %v13960_v20 = vld [vmem:[%s17854_s1 + $0x948] sm:$0xff]  }
 0x111   :  { %12666 = vmatpush3.bf16.msra.mxu1 %v13919_v19  ;;  %v13957_v19 = vld [vmem:[%s17854_s1 + $0x910] sm:$0xff]  }
 0x112   :  { %12667 = vmatprep.subr.bf16.mxu1 %v13922_v22  ;;  %v13962_v22 = vld [vmem:[%s17854_s1 + $0x9c8] sm:$0xff]  }
 0x113   :  { %12646 = vmatpush3.bf16.msra.mxu0 %v13921_v21  ;;  %v13959_v21 = vld [vmem:[%s17854_s1 + $0x990] sm:$0xff]  }
 0x114   :  { %12647 = vmatprep.subr.bf16.mxu0 %v13924_v24  ;;  %v13964_v24 = vld [vmem:[%s17854_s1 + $0x940] sm:$0xff]  }
 0x115   :  { %12668 = vmatpush3.bf16.msra.mxu1 %v13923_v23  ;;  %v13961_v23 = vld [vmem:[%s17854_s1 + $0x908] sm:$0xff]  }
 0x116   :  { %12669 = vmatprep.subr.bf16.mxu1 %v13926_v26  ;;  %v13963_v26 = vld [vmem:[%s17854_s1 + $0x988] sm:$0xff]  }
 0x117   :  { %12648 = vmatpush3.bf16.msra.mxu0 %v13925_v25  ;;  %v25_v25 = vld [vmem:[%s17853_s0 + $0x48] sm:$0xff] }
 0x118   :  { %12649 = vmatprep.subr.bf16.mxu0 %v13928_v28  ;;  %vm56_vm9 = vcmp.ge.f32.partialorder %v25_v25, 0.0  ;;  %v13966_v28 = vld [vmem:[%s17854_s1 + $0x9c0] sm:$0xff]  }
 0x119   :  { %12670 = vmatpush3.bf16.msra.mxu1 %v13927_v27  ;;  %v87_v27 = vmul.f32 0.01, %v25_v25 }
 0x11a   :  { %12671 = vmatprep.subr.bf16.mxu1 %v13930_v30 }
 0x11b   :  { %12650 = vmatpush3.bf16.msra.mxu0 %v13929_v29  ;;  %v13965_v29 = vld [vmem:[%s17854_s1 + $0x900] sm:$0xff]   ;;  %v118_v30 = vsel %vm56_vm9, %v25_v25, %v87_v27  ;;  %v14000_v25 = vld [vmem:[%s17854_s1 + $0xb78] sm:$0xff]  }
 0x11c   :  { %12651 = vmatprep.subr.bf16.mxu0 %v13932_v33  ;;  %v324_v33 = vcombine.high %v118_v30, %v118_v30  ;;  %v13999_v27 = vld [vmem:[%s17854_s1 + $0xa80] sm:$0xff]  }
 0x11d   :  { %12672 = vmatpush3.bf16.msra.mxu1 %v13931_v31  ;;  %v331_v31 = vrot.slane %v118_v30, %v14783_v43  ;;  %v14002_v30 = vld [vmem:[%s17854_s1 + $0xbf8] sm:$0xff]  }
 0x11e   :  { %12673 = vmatprep.subr.bf16.mxu1 %v13934_v35  ;;  %v338_v36 = vrot.slane %v324_v33, %v14783_v43  ;;  %v14001_v33 = vld [vmem:[%s17854_s1 + $0xb38] sm:$0xff]  }
 0x11f   :  { %12652 = vmatpush3.bf16.msra.mxu0 %v13933_v37  ;;  %v339_v35 = vcombine.high %v331_v31, %v331_v31  ;;  %v13970_v37 = vld [vmem:[%s17854_s1 + $0xaf8] sm:$0xff]   ;;  %v856_v38 = vpack.c.bf16 %v331_v31, %v331_v31 }
 0x120   :  { %12681 = vmatprep.subr.bf16.mxu0 %v13936_v40 }
 0x121   :  { %12674 = vmatpush3.bf16.msra.mxu1 %v13935_v42  ;;  %v857_v40 = vpack.c.bf16 %v339_v35, %v339_v35  ;;  %v340_v42 = vcombine.high %v338_v36, %v338_v36 }
 0x122   :  { %v12389_v50 = vpop.f32.mrf.mxu0  ;;  %9467 = vmatmul.mubr.bf16.vlgmr.msra.gmra.mxu0 %v852_v45  ;;  %12703 = vmatprep.subr.bf16.mxu1 %v13938_v46  ;;  %v858_v46 = vpack.c.bf16 %v338_v36, %v338_v36 }
 0x123   :  { %12682 = vmatpush3.bf16.msra.mxu0 %v13937_v49  ;;  %9546 = vmatprep.mubr.bf16.mxu0 %v857_v40  ;;  %v859_v48 = vpack.c.bf16 %v340_v42, %v340_v42  ;;  %v14004_v40 = vld [vmem:[%s17854_s1 + $0xb70] sm:$0xff]  }
 0x124   :  { %v12411_v54 = vpop.f32.mrf.mxu1  ;;  %v12390_v56 = vpop.f32.mrf.mxu0  ;;  %9507 = vmatmul.mubr.bf16.vlgmr.msra.gmra.mxu1 %v854_v51  ;;  %12683 = vmatprep.subr.bf16.mxu0 %v13940_v52 }
 0x125   :  { %v12391_v58 = vadd.f32 %v12390_v56, %v12389_v50  ;;  %12704 = vmatpush3.bf16.msra.mxu1 %v13939_v55  ;;  %v13973_v50 = vld [vmem:[%s17854_s1 + $0xa30] sm:$0xff]   ;;  %9586 = vmatprep.mubr.bf16.mxu1 %v859_v48 }
 0x126   :  { %v12412_v59 = vpop.f32.mrf.mxu1  ;;  %v12392_v61 = vpop.f32.mrf.mxu0  ;;  %12705 = vmatprep.subr.bf16.mxu1 %v13942_v57  ;;  %v13975_v56 = vld [vmem:[%s17854_s1 + $0xab0] sm:$0xff]  }
 0x127   :  { %v12413_v62 = vadd.f32 %v12412_v59, %v12411_v54  ;;  %v8989_v0 = vadd.f32 %v12391_v58, %v15527_v14  ;;  %12684 = vmatpush3.bf16.msra.mxu0 %v13941_v60  ;;  %v13954_v14 = vld [vmem:[%s17854_s1 + $0x9d8] sm:$0xff]   ;;  %v13976_v58 = vld [vmem:[%s17854_s1 + $0xa68] sm:$0xff]   ;;  %v14006_v48 = vld [vmem:[%s17854_s1 + $0xbf0] sm:$0xff]  }
 0x128   :  { %v12414_v2 = vpop.f32.mrf.mxu1  ;;  %v12393_v3 = vpop.f32.mrf.mxu0  ;;  %12685 = vmatprep.subr.bf16.mxu0 %v13944_v63  ;;  %v13977_v61 = vld [vmem:[%s17854_s1 + $0xa28] sm:$0xff]  }
 0x129   :  { %v15628_v5 = vadd.f32 %v12413_v62, %v8989_v0  ;;  %12706 = vmatpush3.bf16.msra.mxu1 %v13943_v1  ;;  %v13978_v63 = vld [vmem:[%s17854_s1 + $0xae8] sm:$0xff]   ;;  %v13980_v2 = vld [vmem:[%s17854_s1 + $0xa60] sm:$0xff]  }
 0x12a   :  { %v12415_v7 = vpop.f32.mrf.mxu1  ;;  %12707 = vmatprep.subr.bf16.mxu1 %v13946_v4  ;;  %v13979_v1 = vld [vmem:[%s17854_s1 + $0xaa8] sm:$0xff]   ;;  %v13981_v3 = vld [vmem:[%s17854_s1 + $0xa20] sm:$0xff]  }
 0x12b   :  { %12686 = vmatpush3.bf16.msra.mxu0 %v13945_v6  ;;  %v13982_v4 = vld [vmem:[%s17854_s1 + $0xae0] sm:$0xff]   ;;  %v13984_v6 = vld [vmem:[%s17854_s1 + $0xa58] sm:$0xff]  }
 0x12c   :  { %12687 = vmatprep.subr.bf16.mxu0 %v13948_v8  ;;  %v13985_v7 = vld [vmem:[%s17854_s1 + $0xa18] sm:$0xff]  }
 0x12d   :  { %12708 = vmatpush3.bf16.msra.mxu1 %v13947_v9  ;;  %v13986_v8 = vld [vmem:[%s17854_s1 + $0xad8] sm:$0xff]  }
 0x12e   :  { %12709 = vmatprep.subr.bf16.mxu1 %v13950_v10  ;;  %v13987_v9 = vld [vmem:[%s17854_s1 + $0xa98] sm:$0xff]   ;;  %v13988_v10 = vld [vmem:[%s17854_s1 + $0xa50] sm:$0xff]  }
 0x12f   :  { %12688 = vmatpush3.bf16.msra.mxu0 %v13949_v11  ;;  %v13989_v11 = vld [vmem:[%s17854_s1 + $0xa10] sm:$0xff]  }
 0x130   :  { %12689 = vmatprep.subr.bf16.mxu0 %v13952_v12  ;;  %v13990_v12 = vld [vmem:[%s17854_s1 + $0xad0] sm:$0xff]  }
 0x131   :  { %12710 = vmatpush3.bf16.msra.mxu1 %v13951_v13  ;;  %v13991_v13 = vld [vmem:[%s17854_s1 + $0xa90] sm:$0xff]  }
 0x132   :  { %12711 = vmatprep.subr.bf16.mxu1 %v13954_v14  ;;  %v13992_v14 = vld [vmem:[%s17854_s1 + $0xa48] sm:$0xff]  }
 0x133   :  { %12690 = vmatpush3.bf16.msra.mxu0 %v13953_v15  ;;  %v13993_v15 = vld [vmem:[%s17854_s1 + $0xa08] sm:$0xff]  }
 0x134   :  { %12691 = vmatprep.subr.bf16.mxu0 %v13956_v16  ;;  %v13994_v16 = vld [vmem:[%s17854_s1 + $0xac8] sm:$0xff]  }
 0x135   :  { %12712 = vmatpush3.bf16.msra.mxu1 %v13955_v17  ;;  %v13996_v17 = vld [vmem:[%s17854_s1 + $0xa40] sm:$0xff]  }
 0x136   :  { %12713 = vmatprep.subr.bf16.mxu1 %v13958_v18  ;;  %v26_v18 = vld [vmem:[%s17853_s0 + $0x50] sm:$0xff] }
 0x137   :  { %12692 = vmatpush3.bf16.msra.mxu0 %v13957_v19  ;;  %v13995_v19 = vld [vmem:[%s17854_s1 + $0xa88] sm:$0xff]   ;;  %vm57_vm10 = vcmp.ge.f32.partialorder %v26_v18, 0.0 }
 0x138   :  { %12693 = vmatprep.subr.bf16.mxu0 %v13960_v20  ;;  %v88_v20 = vmul.f32 0.01, %v26_v18 }
 0x139   :  { %12714 = vmatpush3.bf16.msra.mxu1 %v13959_v21  ;;  %v13998_v21 = vld [vmem:[%s17854_s1 + $0xac0] sm:$0xff]  }
 0x13a   :  { %12715 = vmatprep.subr.bf16.mxu1 %v13962_v22  ;;  %v13997_v22 = vld [vmem:[%s17854_s1 + $0xa00] sm:$0xff]  }
 0x13b   :  { %12694 = vmatpush3.bf16.msra.mxu0 %v13961_v23  ;;  %v119_v23 = vsel %vm57_vm10, %v26_v18, %v88_v20 }
 0x13c   :  { %12695 = vmatprep.subr.bf16.mxu0 %v13964_v24  ;;  %v348_v24 = vrot.slane %v119_v23, %v14783_v43 }
 0x13d   :  { %12716 = vmatpush3.bf16.msra.mxu1 %v13963_v26  ;;  %v341_v26 = vcombine.high %v119_v23, %v119_v23 }
 0x13e   :  { %12717 = vmatprep.subr.bf16.mxu1 %v13966_v28  ;;  %v356_v28 = vcombine.high %v348_v24, %v348_v24 }
 0x13f   :  { %12696 = vmatpush3.bf16.msra.mxu0 %v13965_v29  ;;  %v355_v29 = vrot.slane %v341_v26, %v14783_v43 }
 0x140   :  { %12725 = vmatprep.subr.bf16.mxu0 %v13968_v32  ;;  %v860_v32 = vpack.c.bf16 %v348_v24, %v348_v24 }
 0x141   :  { %12718 = vmatpush3.bf16.msra.mxu1 %v13967_v34  ;;  %v861_v34 = vpack.c.bf16 %v356_v28, %v356_v28  ;;  %v357_v35 = vcombine.high %v355_v29, %v355_v29  ;;  %v14033_v28 = vld [vmem:[%s17854_s1 + $0xc38] sm:$0xff]  }
 0x142   :  { %v12433_v41 = vpop.f32.mrf.mxu0  ;;  %12747 = vmatprep.subr.bf16.mxu1 %v13970_v37  ;;  %9547 = vmatmul.mubr.bf16.vlgmr.msra.gmra.mxu0 %v856_v38  ;;  %v14003_v37 = vld [vmem:[%s17854_s1 + $0xbb8] sm:$0xff]  }
 0x143   :  { %12726 = vmatpush3.bf16.msra.mxu0 %v13969_v39  ;;  %v862_v39 = vpack.c.bf16 %v355_v29, %v355_v29  ;;  %9626 = vmatprep.mubr.bf16.mxu0 %v861_v34 }
 0x144   :  { %v12455_v45 = vpop.f32.mrf.mxu1  ;;  %v12434_v49 = vpop.f32.mrf.mxu0  ;;  %9587 = vmatmul.mubr.bf16.vlgmr.msra.gmra.mxu1 %v858_v46  ;;  %12727 = vmatprep.subr.bf16.mxu0 %v13972_v47 }
 0x145   :  { %v12435_v51 = vadd.f32 %v12434_v49, %v12433_v41  ;;  %12748 = vmatpush3.bf16.msra.mxu1 %v13971_v44  ;;  %v863_v41 = vpack.c.bf16 %v357_v35, %v357_v35  ;;  %v14035_v35 = vld [vmem:[%s17854_s1 + $0xcb8] sm:$0xff]  }
 0x146   :  { %v12456_v52 = vpop.f32.mrf.mxu1  ;;  %v12436_v54 = vpop.f32.mrf.mxu0  ;;  %12749 = vmatprep.subr.bf16.mxu1 %v13974_v53  ;;  %v14008_v53 = vld [vmem:[%s17854_s1 + $0xb68] sm:$0xff]  }
 0x147   :  { %v12457_v55 = vadd.f32 %v12456_v52, %v12455_v45  ;;  %v9069_v57 = vadd.f32 %v12435_v51, %v15628_v5  ;;  %12728 = vmatpush3.bf16.msra.mxu0 %v13973_v50  ;;  %v13983_v5 = vld [vmem:[%s17854_s1 + $0xaa0] sm:$0xff]   ;;  %v14005_v45 = vld [vmem:[%s17854_s1 + $0xb30] sm:$0xff]   ;;  %9666 = vmatprep.mubr.bf16.mxu1 %v863_v41 }
 0x148   :  { %v12458_v59 = vpop.f32.mrf.mxu1  ;;  %v12437_v60 = vpop.f32.mrf.mxu0  ;;  %12729 = vmatprep.subr.bf16.mxu0 %v13976_v58  ;;  %v14007_v50 = vld [vmem:[%s17854_s1 + $0xbb0] sm:$0xff]   ;;  %v14011_v58 = vld [vmem:[%s17854_s1 + $0xba8] sm:$0xff]  }
 0x149   :  { %v15732_v62 = vadd.f32 %v12457_v55, %v9069_v57  ;;  %12750 = vmatpush3.bf16.msra.mxu1 %v13975_v56  ;;  %v14009_v55 = vld [vmem:[%s17854_s1 + $0xb28] sm:$0xff]   ;;  %v14012_v59 = vld [vmem:[%s17854_s1 + $0xb60] sm:$0xff]   ;;  %v14037_v41 = vld [vmem:[%s17854_s1 + $0xc30] sm:$0xff]  }
 0x14a   :  { %v12459_v0 = vpop.f32.mrf.mxu1  ;;  %12751 = vmatprep.subr.bf16.mxu1 %v13978_v63  ;;  %v14010_v57 = vld [vmem:[%s17854_s1 + $0xbe8] sm:$0xff]   ;;  %v14013_v60 = vld [vmem:[%s17854_s1 + $0xb20] sm:$0xff]   ;;  %v14016_v63 = vld [vmem:[%s17854_s1 + $0xb58] sm:$0xff]  }
 0x14b   :  { %12730 = vmatpush3.bf16.msra.mxu0 %v13977_v61  ;;  %v14014_v61 = vld [vmem:[%s17854_s1 + $0xbe0] sm:$0xff]   ;;  %v14017_v0 = vld [vmem:[%s17854_s1 + $0xb18] sm:$0xff]  }
 0x14c   :  { %12731 = vmatprep.subr.bf16.mxu0 %v13980_v2  ;;  %v14019_v2 = vld [vmem:[%s17854_s1 + $0xb98] sm:$0xff]  }
 0x14d   :  { %12752 = vmatpush3.bf16.msra.mxu1 %v13979_v1  ;;  %v14018_v1 = vld [vmem:[%s17854_s1 + $0xbd8] sm:$0xff]  }
 0x14e   :  { %12753 = vmatprep.subr.bf16.mxu1 %v13982_v4  ;;  %v14021_v4 = vld [vmem:[%s17854_s1 + $0xb10] sm:$0xff]  }
 0x14f   :  { %12732 = vmatpush3.bf16.msra.mxu0 %v13981_v3  ;;  %v14020_v3 = vld [vmem:[%s17854_s1 + $0xb50] sm:$0xff]  }
 0x150   :  { %12733 = vmatprep.subr.bf16.mxu0 %v13984_v6  ;;  %v14023_v6 = vld [vmem:[%s17854_s1 + $0xb90] sm:$0xff]  }
 0x151   :  { %12754 = vmatpush3.bf16.msra.mxu1 %v13983_v5  ;;  %v14022_v5 = vld [vmem:[%s17854_s1 + $0xbd0] sm:$0xff]  }
 0x152   :  { %12755 = vmatprep.subr.bf16.mxu1 %v13986_v8  ;;  %v14025_v8 = vld [vmem:[%s17854_s1 + $0xb08] sm:$0xff]  }
 0x153   :  { %12734 = vmatpush3.bf16.msra.mxu0 %v13985_v7  ;;  %v14024_v7 = vld [vmem:[%s17854_s1 + $0xb48] sm:$0xff]  }
 0x154   :  { %12735 = vmatprep.subr.bf16.mxu0 %v13988_v10  ;;  %v14027_v10 = vld [vmem:[%s17854_s1 + $0xb88] sm:$0xff]  }
 0x155   :  { %12756 = vmatpush3.bf16.msra.mxu1 %v13987_v9  ;;  %v14026_v9 = vld [vmem:[%s17854_s1 + $0xbc8] sm:$0xff]  }
 0x156   :  { %12757 = vmatprep.subr.bf16.mxu1 %v13990_v12  ;;  %v14028_v12 = vld [vmem:[%s17854_s1 + $0xb40] sm:$0xff]  }
 0x157   :  { %12736 = vmatpush3.bf16.msra.mxu0 %v13989_v11  ;;  %v27_v11 = vld [vmem:[%s17853_s0 + $0x58] sm:$0xff] }
 0x158   :  { %12737 = vmatprep.subr.bf16.mxu0 %v13992_v14  ;;  %vm58_vm11 = vcmp.ge.f32.partialorder %v27_v11, 0.0  ;;  %v14030_v14 = vld [vmem:[%s17854_s1 + $0xbc0] sm:$0xff]  }
 0x159   :  { %12758 = vmatpush3.bf16.msra.mxu1 %v13991_v13  ;;  %v89_v13 = vmul.f32 0.01, %v27_v11 }
 0x15a   :  { %12759 = vmatprep.subr.bf16.mxu1 %v13994_v16  ;;  %v14029_v16 = vld [vmem:[%s17854_s1 + $0xb00] sm:$0xff]  }
 0x15b   :  { %12738 = vmatpush3.bf16.msra.mxu0 %v13993_v15  ;;  %v120_v15 = vsel %vm58_vm11, %v27_v11, %v89_v13  ;;  %v14064_v11 = vld [vmem:[%s17854_s1 + $0xd78] sm:$0xff]   ;;  %v14063_v13 = vld [vmem:[%s17854_s1 + $0xc80] sm:$0xff]  }
 0x15c   :  { %12739 = vmatprep.subr.bf16.mxu0 %v13996_v17  ;;  %v365_v17 = vrot.slane %v120_v15, %v14783_v43  ;;  %v358_v18 = vcombine.high %v120_v15, %v120_v15 }
 0x15d   :  { %12760 = vmatpush3.bf16.msra.mxu1 %v13995_v19  ;;  %v14032_v19 = vld [vmem:[%s17854_s1 + $0xc78] sm:$0xff]  }
 0x15e   :  { %12761 = vmatprep.subr.bf16.mxu1 %v13998_v21  ;;  %v373_v20 = vcombine.high %v365_v17, %v365_v17  ;;  %v14031_v21 = vld [vmem:[%s17854_s1 + $0xb80] sm:$0xff]   ;;  %v864_v24 = vpack.c.bf16 %v365_v17, %v365_v17 }
 0x15f   :  { %12740 = vmatpush3.bf16.msra.mxu0 %v13997_v22  ;;  %v372_v22 = vrot.slane %v358_v18, %v14783_v43 }
 0x160   :  { %12769 = vmatprep.subr.bf16.mxu0 %v14000_v25  ;;  %v14034_v25 = vld [vmem:[%s17854_s1 + $0xcf8] sm:$0xff]   ;;  %v865_v26 = vpack.c.bf16 %v373_v20, %v373_v20 }
 0x161   :  { %12762 = vmatpush3.bf16.msra.mxu1 %v13999_v27  ;;  %v374_v27 = vcombine.high %v372_v22, %v372_v22 }
 0x162   :  { %v12477_v31 = vpop.f32.mrf.mxu0  ;;  %12791 = vmatprep.subr.bf16.mxu1 %v14002_v30  ;;  %9627 = vmatmul.mubr.bf16.vlgmr.msra.gmra.mxu0 %v860_v32  ;;  %v14036_v32 = vld [vmem:[%s17854_s1 + $0xc70] sm:$0xff]  }
 0x163   :  { %12770 = vmatpush3.bf16.msra.mxu0 %v14001_v33  ;;  %9706 = vmatprep.mubr.bf16.mxu0 %v865_v26  ;;  %v867_v33 = vpack.c.bf16 %v374_v27, %v374_v27  ;;  %v14068_v26 = vld [vmem:[%s17854_s1 + $0xd70] sm:$0xff]  }
 0x164   :  { %v12499_v36 = vpop.f32.mrf.mxu1  ;;  %v12478_v38 = vpop.f32.mrf.mxu0  ;;  %9667 = vmatmul.mubr.bf16.vlgmr.msra.gmra.mxu1 %v862_v39  ;;  %12771 = vmatprep.subr.bf16.mxu0 %v14004_v40 }
 0x165   :  { %v12479_v42 = vadd.f32 %v12478_v38, %v12477_v31  ;;  %12792 = vmatpush3.bf16.msra.mxu1 %v14003_v37  ;;  %v866_v31 = vpack.c.bf16 %v372_v22, %v372_v22  ;;  %v14038_v38 = vld [vmem:[%s17854_s1 + $0xcf0] sm:$0xff]   ;;  %9746 = vmatprep.mubr.bf16.mxu1 %v867_v33  ;;  %v14067_v22 = vld [vmem:[%s17854_s1 + $0xdb8] sm:$0xff]  }
 0x166   :  { %v12500_v44 = vpop.f32.mrf.mxu1  ;;  %v12480_v46 = vpop.f32.mrf.mxu0  ;;  %12793 = vmatprep.subr.bf16.mxu1 %v14006_v48  ;;  %v14042_v48 = vld [vmem:[%s17854_s1 + $0xce8] sm:$0xff]  }
 0x167   :  { %v12501_v47 = vadd.f32 %v12500_v44, %v12499_v36  ;;  %v9149_v49 = vadd.f32 %v12479_v42, %v15732_v62  ;;  %12772 = vmatpush3.bf16.msra.mxu0 %v14005_v45  ;;  %v14015_v62 = vld [vmem:[%s17854_s1 + $0xba0] sm:$0xff]   ;;  %v14040_v44 = vld [vmem:[%s17854_s1 + $0xc68] sm:$0xff]  }
 0x168   :  { %v12502_v51 = vpop.f32.mrf.mxu1  ;;  %v12481_v52 = vpop.f32.mrf.mxu0  ;;  %12773 = vmatprep.subr.bf16.mxu0 %v14008_v53  ;;  %v14046_v53 = vld [vmem:[%s17854_s1 + $0xce0] sm:$0xff]  }
 0x169   :  { %v15833_v54 = vadd.f32 %v12501_v47, %v9149_v49  ;;  %12794 = vmatpush3.bf16.msra.mxu1 %v14007_v50  ;;  %v14039_v47 = vld [vmem:[%s17854_s1 + $0xcb0] sm:$0xff]   ;;  %v14041_v50 = vld [vmem:[%s17854_s1 + $0xc28] sm:$0xff]   ;;  %v14044_v51 = vld [vmem:[%s17854_s1 + $0xc60] sm:$0xff]  }
 0x16a   :  { %v12503_v56 = vpop.f32.mrf.mxu1  ;;  %12795 = vmatprep.subr.bf16.mxu1 %v14010_v57  ;;  %v14043_v52 = vld [vmem:[%s17854_s1 + $0xca8] sm:$0xff]   ;;  %v14050_v57 = vld [vmem:[%s17854_s1 + $0xcd8] sm:$0xff]  }
 0x16b   :  { %12774 = vmatpush3.bf16.msra.mxu0 %v14009_v55  ;;  %v14048_v55 = vld [vmem:[%s17854_s1 + $0xc58] sm:$0xff]   ;;  %v14047_v56 = vld [vmem:[%s17854_s1 + $0xca0] sm:$0xff]  }
 0x16c   :  { %12775 = vmatprep.subr.bf16.mxu0 %v14012_v59  ;;  %v14052_v59 = vld [vmem:[%s17854_s1 + $0xc50] sm:$0xff]  }
 0x16d   :  { %12796 = vmatpush3.bf16.msra.mxu1 %v14011_v58  ;;  %v14049_v58 = vld [vmem:[%s17854_s1 + $0xc18] sm:$0xff]  }
 0x16e   :  { %12797 = vmatprep.subr.bf16.mxu1 %v14014_v61  ;;  %v14054_v61 = vld [vmem:[%s17854_s1 + $0xcd0] sm:$0xff]  }
 0x16f   :  { %12776 = vmatpush3.bf16.msra.mxu0 %v14013_v60  ;;  %v14051_v60 = vld [vmem:[%s17854_s1 + $0xc98] sm:$0xff]  }
 0x170   :  { %12777 = vmatprep.subr.bf16.mxu0 %v14016_v63  ;;  %v14056_v63 = vld [vmem:[%s17854_s1 + $0xc48] sm:$0xff]  }
 0x171   :  { %12798 = vmatpush3.bf16.msra.mxu1 %v14015_v62  ;;  %v14053_v62 = vld [vmem:[%s17854_s1 + $0xc10] sm:$0xff]  }
 0x172   :  { %12799 = vmatprep.subr.bf16.mxu1 %v14018_v1  ;;  %v14058_v1 = vld [vmem:[%s17854_s1 + $0xcc8] sm:$0xff]  }
 0x173   :  { %12778 = vmatpush3.bf16.msra.mxu0 %v14017_v0  ;;  %v14055_v0 = vld [vmem:[%s17854_s1 + $0xc90] sm:$0xff]  }
 0x174   :  { %12779 = vmatprep.subr.bf16.mxu0 %v14020_v3  ;;  %v14060_v3 = vld [vmem:[%s17854_s1 + $0xc40] sm:$0xff]  }
 0x175   :  { %12800 = vmatpush3.bf16.msra.mxu1 %v14019_v2  ;;  %v14057_v2 = vld [vmem:[%s17854_s1 + $0xc08] sm:$0xff]  }
 0x176   :  { %12801 = vmatprep.subr.bf16.mxu1 %v14022_v5  ;;  %v14059_v5 = vld [vmem:[%s17854_s1 + $0xc88] sm:$0xff]  }
 0x177   :  { %12780 = vmatpush3.bf16.msra.mxu0 %v14021_v4  ;;  %v28_v4 = vld [vmem:[%s17853_s0 + $0x60] sm:$0xff] }
 0x178   :  { %12781 = vmatprep.subr.bf16.mxu0 %v14024_v7  ;;  %vm59_vm12 = vcmp.ge.f32.partialorder %v28_v4, 0.0  ;;  %v14062_v7 = vld [vmem:[%s17854_s1 + $0xcc0] sm:$0xff]  }
 0x179   :  { %12802 = vmatpush3.bf16.msra.mxu1 %v14023_v6  ;;  %v90_v6 = vmul.f32 0.01, %v28_v4 }
 0x17a   :  { %12803 = vmatprep.subr.bf16.mxu1 %v14026_v9 }
 0x17b   :  { %12782 = vmatpush3.bf16.msra.mxu0 %v14025_v8  ;;  %v14061_v8 = vld [vmem:[%s17854_s1 + $0xc00] sm:$0xff]   ;;  %v121_v9 = vsel %vm59_vm12, %v28_v4, %v90_v6  ;;  %v14096_v4 = vld [vmem:[%s17854_s1 + $0xe78] sm:$0xff]  }
 0x17c   :  { %12783 = vmatprep.subr.bf16.mxu0 %v14028_v12  ;;  %v375_v12 = vcombine.high %v121_v9, %v121_v9  ;;  %v14095_v6 = vld [vmem:[%s17854_s1 + $0xd80] sm:$0xff]  }
 0x17d   :  { %12804 = vmatpush3.bf16.msra.mxu1 %v14027_v10  ;;  %v382_v10 = vrot.slane %v121_v9, %v14783_v43  ;;  %v14098_v9 = vld [vmem:[%s17854_s1 + $0xef8] sm:$0xff]  }
 0x17e   :  { %12805 = vmatprep.subr.bf16.mxu1 %v14030_v14  ;;  %v389_v15 = vrot.slane %v375_v12, %v14783_v43  ;;  %v14097_v12 = vld [vmem:[%s17854_s1 + $0xe38] sm:$0xff]  }
 0x17f   :  { %12784 = vmatpush3.bf16.msra.mxu0 %v14029_v16  ;;  %v390_v14 = vcombine.high %v382_v10, %v382_v10  ;;  %v14066_v16 = vld [vmem:[%s17854_s1 + $0xdf8] sm:$0xff]   ;;  %v868_v18 = vpack.c.bf16 %v382_v10, %v382_v10 }
 0x180   :  { %12813 = vmatprep.subr.bf16.mxu0 %v14032_v19  ;;  %v14065_v19 = vld [vmem:[%s17854_s1 + $0xd38] sm:$0xff]  }
 0x181   :  { %12806 = vmatpush3.bf16.msra.mxu1 %v14031_v21  ;;  %v869_v20 = vpack.c.bf16 %v390_v14, %v390_v14  ;;  %v391_v21 = vcombine.high %v389_v15, %v389_v15 }
 0x182   :  { %v12521_v23 = vpop.f32.mrf.mxu0  ;;  %9707 = vmatmul.mubr.bf16.vlgmr.msra.gmra.mxu0 %v864_v24  ;;  %12835 = vmatprep.subr.bf16.mxu1 %v14034_v25  ;;  %v870_v25 = vpack.c.bf16 %v389_v15, %v389_v15  ;;  %v14099_v15 = vld [vmem:[%s17854_s1 + $0xeb8] sm:$0xff]  }
 0x183   :  { %12814 = vmatpush3.bf16.msra.mxu0 %v14033_v28  ;;  %9786 = vmatprep.mubr.bf16.mxu0 %v869_v20  ;;  %v871_v27 = vpack.c.bf16 %v391_v21, %v391_v21 }
 0x184   :  { %v12522_v29 = vpop.f32.mrf.mxu0  ;;  %v12543_v30 = vpop.f32.mrf.mxu1  ;;  %9747 = vmatmul.mubr.bf16.vlgmr.msra.gmra.mxu1 %v866_v31  ;;  %12815 = vmatprep.subr.bf16.mxu0 %v14036_v32  ;;  %v14070_v32 = vld [vmem:[%s17854_s1 + $0xdf0] sm:$0xff]  }
 0x185   :  { %v12523_v34 = vadd.f32 %v12522_v29, %v12521_v23  ;;  %12836 = vmatpush3.bf16.msra.mxu1 %v14035_v35  ;;  %v14069_v29 = vld [vmem:[%s17854_s1 + $0xd30] sm:$0xff]   ;;  %9826 = vmatprep.mubr.bf16.mxu1 %v871_v27 }
 0x186   :  { %v12524_v36 = vpop.f32.mrf.mxu0  ;;  %v12544_v37 = vpop.f32.mrf.mxu1  ;;  %12837 = vmatprep.subr.bf16.mxu1 %v14038_v38  ;;  %v14071_v35 = vld [vmem:[%s17854_s1 + $0xdb0] sm:$0xff]  }
 0x187   :  { %v9229_v39 = vadd.f32 %v12523_v34, %v15833_v54  ;;  %v12545_v40 = vadd.f32 %v12544_v37, %v12543_v30  ;;  %12816 = vmatpush3.bf16.msra.mxu0 %v14037_v41  ;;  %v14045_v54 = vld [vmem:[%s17854_s1 + $0xc20] sm:$0xff]   ;;  %v14072_v37 = vld [vmem:[%s17854_s1 + $0xd68] sm:$0xff]  }
 0x188   :  { %v12525_v42 = vpop.f32.mrf.mxu0  ;;  %v12546_v45 = vpop.f32.mrf.mxu1  ;;  %12817 = vmatprep.subr.bf16.mxu0 %v14040_v44  ;;  %v14074_v41 = vld [vmem:[%s17854_s1 + $0xde8] sm:$0xff]  }
 0x189   :  { %v15934_v46 = vadd.f32 %v12545_v40, %v9229_v39  ;;  %12838 = vmatpush3.bf16.msra.mxu1 %v14039_v47  ;;  %v14073_v40 = vld [vmem:[%s17854_s1 + $0xd28] sm:$0xff]   ;;  %v14076_v45 = vld [vmem:[%s17854_s1 + $0xd60] sm:$0xff]  }
 0x18a   :  { %v12547_v49 = vpop.f32.mrf.mxu1  ;;  %12839 = vmatprep.subr.bf16.mxu1 %v14042_v48  ;;  %v14075_v44 = vld [vmem:[%s17854_s1 + $0xda8] sm:$0xff]   ;;  %v14078_v47 = vld [vmem:[%s17854_s1 + $0xde0] sm:$0xff]  }
 0x18b   :  { %12818 = vmatpush3.bf16.msra.mxu0 %v14041_v50  ;;  %v14079_v48 = vld [vmem:[%s17854_s1 + $0xda0] sm:$0xff]   ;;  %v14080_v49 = vld [vmem:[%s17854_s1 + $0xd58] sm:$0xff]  }
 0x18c   :  { %12819 = vmatprep.subr.bf16.mxu0 %v14044_v51  ;;  %v14081_v50 = vld [vmem:[%s17854_s1 + $0xd18] sm:$0xff]  }
 0x18d   :  { %12840 = vmatpush3.bf16.msra.mxu1 %v14043_v52  ;;  %v14082_v51 = vld [vmem:[%s17854_s1 + $0xdd8] sm:$0xff]  }
 0x18e   :  { %12841 = vmatprep.subr.bf16.mxu1 %v14046_v53  ;;  %v14083_v52 = vld [vmem:[%s17854_s1 + $0xd98] sm:$0xff]   ;;  %v14084_v53 = vld [vmem:[%s17854_s1 + $0xd50] sm:$0xff]  }
 0x18f   :  { %12820 = vmatpush3.bf16.msra.mxu0 %v14045_v54  ;;  %v14085_v54 = vld [vmem:[%s17854_s1 + $0xd10] sm:$0xff]  }
 0x190   :  { %12821 = vmatprep.subr.bf16.mxu0 %v14048_v55  ;;  %v14086_v55 = vld [vmem:[%s17854_s1 + $0xdd0] sm:$0xff]  }
 0x191   :  { %12842 = vmatpush3.bf16.msra.mxu1 %v14047_v56  ;;  %v14087_v56 = vld [vmem:[%s17854_s1 + $0xd90] sm:$0xff]  }
 0x192   :  { %12843 = vmatprep.subr.bf16.mxu1 %v14050_v57  ;;  %v14088_v57 = vld [vmem:[%s17854_s1 + $0xd48] sm:$0xff]  }
 0x193   :  { %12822 = vmatpush3.bf16.msra.mxu0 %v14049_v58  ;;  %v14089_v58 = vld [vmem:[%s17854_s1 + $0xd08] sm:$0xff]  }
 0x194   :  { %12823 = vmatprep.subr.bf16.mxu0 %v14052_v59  ;;  %v14090_v59 = vld [vmem:[%s17854_s1 + $0xdc8] sm:$0xff]  }
 0x195   :  { %12844 = vmatpush3.bf16.msra.mxu1 %v14051_v60  ;;  %v14092_v60 = vld [vmem:[%s17854_s1 + $0xd40] sm:$0xff]  }
 0x196   :  { %12845 = vmatprep.subr.bf16.mxu1 %v14054_v61  ;;  %v29_v61 = vld [vmem:[%s17853_s0 + $0x68] sm:$0xff] }
 0x197   :  { %12824 = vmatpush3.bf16.msra.mxu0 %v14053_v62  ;;  %v14091_v62 = vld [vmem:[%s17854_s1 + $0xd88] sm:$0xff]   ;;  %vm60_vm13 = vcmp.ge.f32.partialorder %v29_v61, 0.0 }
 0x198   :  { %12825 = vmatprep.subr.bf16.mxu0 %v14056_v63  ;;  %v91_v63 = vmul.f32 0.01, %v29_v61 }
 0x199   :  { %12846 = vmatpush3.bf16.msra.mxu1 %v14055_v0  ;;  %v14094_v0 = vld [vmem:[%s17854_s1 + $0xdc0] sm:$0xff]  }
 0x19a   :  { %12847 = vmatprep.subr.bf16.mxu1 %v14058_v1  ;;  %v14093_v1 = vld [vmem:[%s17854_s1 + $0xd00] sm:$0xff]  }
 0x19b   :  { %12826 = vmatpush3.bf16.msra.mxu0 %v14057_v2  ;;  %v122_v2 = vsel %vm60_vm13, %v29_v61, %v91_v63 }
 0x19c   :  { %12827 = vmatprep.subr.bf16.mxu0 %v14060_v3  ;;  %v399_v3 = vrot.slane %v122_v2, %v14783_v43 }
 0x19d   :  { %12848 = vmatpush3.bf16.msra.mxu1 %v14059_v5  ;;  %v392_v5 = vcombine.high %v122_v2, %v122_v2 }
 0x19e   :  { %12849 = vmatprep.subr.bf16.mxu1 %v14062_v7  ;;  %v407_v7 = vcombine.high %v399_v3, %v399_v3 }
 0x19f   :  { %12828 = vmatpush3.bf16.msra.mxu0 %v14061_v8  ;;  %v406_v8 = vrot.slane %v392_v5, %v14783_v43 }
 0x1a0   :  { %12857 = vmatprep.subr.bf16.mxu0 %v14064_v11  ;;  %v872_v11 = vpack.c.bf16 %v399_v3, %v399_v3 }
 0x1a1   :  { %12850 = vmatpush3.bf16.msra.mxu1 %v14063_v13  ;;  %v873_v13 = vpack.c.bf16 %v407_v7, %v407_v7  ;;  %v408_v14 = vcombine.high %v406_v8, %v406_v8  ;;  %v14129_v7 = vld [vmem:[%s17854_s1 + $0xf38] sm:$0xff]  }
 0x1a2   :  { %v12565_v17 = vpop.f32.mrf.mxu0  ;;  %12879 = vmatprep.subr.bf16.mxu1 %v14066_v16  ;;  %9787 = vmatmul.mubr.bf16.vlgmr.msra.gmra.mxu0 %v868_v18  ;;  %v874_v18 = vpack.c.bf16 %v406_v8, %v406_v8 }
 0x1a3   :  { %12858 = vmatpush3.bf16.msra.mxu0 %v14065_v19  ;;  %v14100_v19 = vld [vmem:[%s17854_s1 + $0xe70] sm:$0xff]   ;;  %9866 = vmatprep.mubr.bf16.mxu0 %v873_v13  ;;  %v875_v20 = vpack.c.bf16 %v408_v14, %v408_v14  ;;  %v14131_v14 = vld [vmem:[%s17854_s1 + $0xfb8] sm:$0xff]  }
 0x1a4   :  { %v12566_v23 = vpop.f32.mrf.mxu0  ;;  %v12587_v24 = vpop.f32.mrf.mxu1  ;;  %9827 = vmatmul.mubr.bf16.vlgmr.msra.gmra.mxu1 %v870_v25  ;;  %12859 = vmatprep.subr.bf16.mxu0 %v14068_v26  ;;  %v14102_v25 = vld [vmem:[%s17854_s1 + $0xef0] sm:$0xff]  }
 0x1a5   :  { %v12567_v28 = vadd.f32 %v12566_v23, %v12565_v17  ;;  %12880 = vmatpush3.bf16.msra.mxu1 %v14067_v22  ;;  %v14101_v22 = vld [vmem:[%s17854_s1 + $0xe30] sm:$0xff]   ;;  %9906 = vmatprep.mubr.bf16.mxu1 %v875_v20 }
 0x1a6   :  { %v12568_v30 = vpop.f32.mrf.mxu0  ;;  %v12588_v31 = vpop.f32.mrf.mxu1  ;;  %12881 = vmatprep.subr.bf16.mxu1 %v14070_v32  ;;  %v14133_v20 = vld [vmem:[%s17854_s1 + $0xf30] sm:$0xff]  }
 0x1a7   :  { %v9309_v33 = vadd.f32 %v12567_v28, %v15934_v46  ;;  %v12589_v34 = vadd.f32 %v12588_v31, %v12587_v24  ;;  %12860 = vmatpush3.bf16.msra.mxu0 %v14069_v29  ;;  %v14077_v46 = vld [vmem:[%s17854_s1 + $0xd20] sm:$0xff]   ;;  %v14103_v28 = vld [vmem:[%s17854_s1 + $0xeb0] sm:$0xff]   ;;  %v14104_v30 = vld [vmem:[%s17854_s1 + $0xe68] sm:$0xff]  }
 0x1a8   :  { %v12569_v36 = vpop.f32.mrf.mxu0  ;;  %v12590_v38 = vpop.f32.mrf.mxu1  ;;  %12861 = vmatprep.subr.bf16.mxu0 %v14072_v37  ;;  %v14108_v37 = vld [vmem:[%s17854_s1 + $0xe60] sm:$0xff]  }
 0x1a9   :  { %v16041_v39 = vadd.f32 %v12589_v34, %v9309_v33  ;;  %12882 = vmatpush3.bf16.msra.mxu1 %v14071_v35  ;;  %v14105_v33 = vld [vmem:[%s17854_s1 + $0xe28] sm:$0xff]   ;;  %v14109_v38 = vld [vmem:[%s17854_s1 + $0xe20] sm:$0xff]  }
 0x1aa   :  { %v12591_v42 = vpop.f32.mrf.mxu1  ;;  %12883 = vmatprep.subr.bf16.mxu1 %v14074_v41  ;;  %v14106_v34 = vld [vmem:[%s17854_s1 + $0xee8] sm:$0xff]   ;;  %v14112_v41 = vld [vmem:[%s17854_s1 + $0xe58] sm:$0xff]  }
 0x1ab   :  { %12862 = vmatpush3.bf16.msra.mxu0 %v14073_v40  ;;  %v14107_v36 = vld [vmem:[%s17854_s1 + $0xea8] sm:$0xff]   ;;  %v14111_v40 = vld [vmem:[%s17854_s1 + $0xea0] sm:$0xff]   ;;  %v14113_v42 = vld [vmem:[%s17854_s1 + $0xe18] sm:$0xff]  }
 0x1ac   :  { %12863 = vmatprep.subr.bf16.mxu0 %v14076_v45  ;;  %v14115_v45 = vld [vmem:[%s17854_s1 + $0xe98] sm:$0xff]  }
 0x1ad   :  { %12884 = vmatpush3.bf16.msra.mxu1 %v14075_v44  ;;  %v14114_v44 = vld [vmem:[%s17854_s1 + $0xed8] sm:$0xff]  }
 0x1ae   :  { %12885 = vmatprep.subr.bf16.mxu1 %v14078_v47  ;;  %v14117_v47 = vld [vmem:[%s17854_s1 + $0xe10] sm:$0xff]  }
 0x1af   :  { %12864 = vmatpush3.bf16.msra.mxu0 %v14077_v46  ;;  %v14116_v46 = vld [vmem:[%s17854_s1 + $0xe50] sm:$0xff]  }
 0x1b0   :  { %12865 = vmatprep.subr.bf16.mxu0 %v14080_v49  ;;  %v14119_v49 = vld [vmem:[%s17854_s1 + $0xe90] sm:$0xff]  }
 0x1b1   :  { %12886 = vmatpush3.bf16.msra.mxu1 %v14079_v48  ;;  %v14118_v48 = vld [vmem:[%s17854_s1 + $0xed0] sm:$0xff]  }
 0x1b2   :  { %12887 = vmatprep.subr.bf16.mxu1 %v14082_v51  ;;  %v14121_v51 = vld [vmem:[%s17854_s1 + $0xe08] sm:$0xff]  }
 0x1b3   :  { %12866 = vmatpush3.bf16.msra.mxu0 %v14081_v50  ;;  %v14120_v50 = vld [vmem:[%s17854_s1 + $0xe48] sm:$0xff]  }
 0x1b4   :  { %12867 = vmatprep.subr.bf16.mxu0 %v14084_v53  ;;  %v14123_v53 = vld [vmem:[%s17854_s1 + $0xe88] sm:$0xff]  }
 0x1b5   :  { %12888 = vmatpush3.bf16.msra.mxu1 %v14083_v52  ;;  %v14122_v52 = vld [vmem:[%s17854_s1 + $0xec8] sm:$0xff]  }
 0x1b6   :  { %12889 = vmatprep.subr.bf16.mxu1 %v14086_v55  ;;  %v14124_v55 = vld [vmem:[%s17854_s1 + $0xe40] sm:$0xff]  }
 0x1b7   :  { %12868 = vmatpush3.bf16.msra.mxu0 %v14085_v54  ;;  %v30_v54 = vld [vmem:[%s17853_s0 + $0x70] sm:$0xff] }
 0x1b8   :  { %12869 = vmatprep.subr.bf16.mxu0 %v14088_v57  ;;  %vm61_vm14 = vcmp.ge.f32.partialorder %v30_v54, 0.0  ;;  %v14126_v57 = vld [vmem:[%s17854_s1 + $0xec0] sm:$0xff]  }
 0x1b9   :  { %12890 = vmatpush3.bf16.msra.mxu1 %v14087_v56  ;;  %v92_v56 = vmul.f32 0.01, %v30_v54 }
 0x1ba   :  { %12891 = vmatprep.subr.bf16.mxu1 %v14090_v59  ;;  %v14125_v59 = vld [vmem:[%s17854_s1 + $0xe00] sm:$0xff]  }
 0x1bb   :  { %12870 = vmatpush3.bf16.msra.mxu0 %v14089_v58  ;;  %v123_v58 = vsel %vm61_vm14, %v30_v54, %v92_v56  ;;  %v14160_v54 = vld [vmem:[%s17854_s1 + $0x1078] sm:$0xff]   ;;  %v14159_v56 = vld [vmem:[%s17854_s1 + $0xf80] sm:$0xff]   ;;  %vm14656_vm14 = vmmov 0  }
 0x1bc   :  { %12871 = vmatprep.subr.bf16.mxu0 %v14092_v60  ;;  %v416_v60 = vrot.slane %v123_v58, %v14783_v43  ;;  %v409_v61 = vcombine.high %v123_v58, %v123_v58 }
 0x1bd   :  { %12892 = vmatpush3.bf16.msra.mxu1 %v14091_v62  ;;  %v14128_v62 = vld [vmem:[%s17854_s1 + $0xf78] sm:$0xff]  }
 0x1be   :  { %12893 = vmatprep.subr.bf16.mxu1 %v14094_v0  ;;  %v424_v63 = vcombine.high %v416_v60, %v416_v60  ;;  %v14127_v0 = vld [vmem:[%s17854_s1 + $0xe80] sm:$0xff]   ;;  %v876_v3 = vpack.c.bf16 %v416_v60, %v416_v60 }
 0x1bf   :  { %12872 = vmatpush3.bf16.msra.mxu0 %v14093_v1  ;;  %v423_v1 = vrot.slane %v409_v61, %v14783_v43 }
 0x1c0   :  { %12901 = vmatprep.subr.bf16.mxu0 %v14096_v4  ;;  %v14130_v4 = vld [vmem:[%s17854_s1 + $0xff8] sm:$0xff]   ;;  %v877_v5 = vpack.c.bf16 %v424_v63, %v424_v63 }
 0x1c1   :  { %12894 = vmatpush3.bf16.msra.mxu1 %v14095_v6  ;;  %v425_v6 = vcombine.high %v423_v1, %v423_v1 }
 0x1c2   :  { %v12609_v10 = vpop.f32.mrf.mxu0  ;;  %12923 = vmatprep.subr.bf16.mxu1 %v14098_v9  ;;  %9867 = vmatmul.mubr.bf16.vlgmr.msra.gmra.mxu0 %v872_v11  ;;  %v14132_v11 = vld [vmem:[%s17854_s1 + $0xf70] sm:$0xff]  }
 0x1c3   :  { %12902 = vmatpush3.bf16.msra.mxu0 %v14097_v12  ;;  %9946 = vmatprep.mubr.bf16.mxu0 %v877_v5  ;;  %v879_v12 = vpack.c.bf16 %v425_v6, %v425_v6  ;;  %v14164_v5 = vld [vmem:[%s17854_s1 + $0x1070] sm:$0xff]  }
 0x1c4   :  { %v12610_v16 = vpop.f32.mrf.mxu0  ;;  %v12631_v17 = vpop.f32.mrf.mxu1  ;;  %9907 = vmatmul.mubr.bf16.vlgmr.msra.gmra.mxu1 %v874_v18  ;;  %12903 = vmatprep.subr.bf16.mxu0 %v14100_v19 }
 0x1c5   :  { %v12611_v21 = vadd.f32 %v12610_v16, %v12609_v10  ;;  %12924 = vmatpush3.bf16.msra.mxu1 %v14099_v15  ;;  %v878_v10 = vpack.c.bf16 %v423_v1, %v423_v1  ;;  %9986 = vmatprep.mubr.bf16.mxu1 %v879_v12  ;;  %v14163_v1 = vld [vmem:[%s17854_s1 + $0x10b8] sm:$0xff]  }
 0x1c6   :  { %v12612_v23 = vpop.f32.mrf.mxu0  ;;  %v12632_v24 = vpop.f32.mrf.mxu1  ;;  %12925 = vmatprep.subr.bf16.mxu1 %v14102_v25  ;;  %v14135_v25 = vld [vmem:[%s17854_s1 + $0xfb0] sm:$0xff]  }
 0x1c7   :  { %v9389_v26 = vadd.f32 %v12611_v21, %v16041_v39  ;;  %v12633_v27 = vadd.f32 %v12632_v24, %v12631_v17  ;;  %12904 = vmatpush3.bf16.msra.mxu0 %v14101_v22  ;;  %v14110_v39 = vld [vmem:[%s17854_s1 + $0xee0] sm:$0xff]   ;;  %v14134_v17 = vld [vmem:[%s17854_s1 + $0xff0] sm:$0xff]   ;;  %v14136_v22 = vld [vmem:[%s17854_s1 + $0xf68] sm:$0xff]  }
 0x1c8   :  { %v12613_v29 = vpop.f32.mrf.mxu0  ;;  %v12634_v31 = vpop.f32.mrf.mxu1  ;;  %12905 = vmatprep.subr.bf16.mxu0 %v14104_v30  ;;  %v14139_v30 = vld [vmem:[%s17854_s1 + $0xfa8] sm:$0xff]  }
 0x1c9   :  { %v16145_v32 = vadd.f32 %v12633_v27, %v9389_v26  ;;  %12926 = vmatpush3.bf16.msra.mxu1 %v14103_v28  ;;  %v14138_v26 = vld [vmem:[%s17854_s1 + $0xfe8] sm:$0xff]   ;;  %v14140_v29 = vld [vmem:[%s17854_s1 + $0xf60] sm:$0xff]  }
 0x1ca   :  { %v12635_v35 = vpop.f32.mrf.mxu1  ;;  %12927 = vmatprep.subr.bf16.mxu1 %v14106_v34  ;;  %v14137_v28 = vld [vmem:[%s17854_s1 + $0xf28] sm:$0xff]   ;;  %v14142_v31 = vld [vmem:[%s17854_s1 + $0xfe0] sm:$0xff]  }
 0x1cb   :  { %12906 = vmatpush3.bf16.msra.mxu0 %v14105_v33  ;;  %v14144_v33 = vld [vmem:[%s17854_s1 + $0xf58] sm:$0xff]   ;;  %v14143_v34 = vld [vmem:[%s17854_s1 + $0xfa0] sm:$0xff]  }
 0x1cc   :  { %12907 = vmatprep.subr.bf16.mxu0 %v14108_v37  ;;  %v14146_v35 = vld [vmem:[%s17854_s1 + $0xfd8] sm:$0xff]   ;;  %v14148_v37 = vld [vmem:[%s17854_s1 + $0xf50] sm:$0xff]  }
 0x1cd   :  { %12928 = vmatpush3.bf16.msra.mxu1 %v14107_v36  ;;  %v14145_v36 = vld [vmem:[%s17854_s1 + $0xf18] sm:$0xff]  }
 0x1ce   :  { %12929 = vmatprep.subr.bf16.mxu1 %v14110_v39  ;;  %v14150_v39 = vld [vmem:[%s17854_s1 + $0xfd0] sm:$0xff]  }
 0x1cf   :  { %12908 = vmatpush3.bf16.msra.mxu0 %v14109_v38  ;;  %v14147_v38 = vld [vmem:[%s17854_s1 + $0xf98] sm:$0xff]  }
 0x1d0   :  { %12909 = vmatprep.subr.bf16.mxu0 %v14112_v41  ;;  %v14152_v41 = vld [vmem:[%s17854_s1 + $0xf48] sm:$0xff]  }
 0x1d1   :  { %12930 = vmatpush3.bf16.msra.mxu1 %v14111_v40  ;;  %v14149_v40 = vld [vmem:[%s17854_s1 + $0xf10] sm:$0xff]  }
 0x1d2   :  { %12931 = vmatprep.subr.bf16.mxu1 %v14114_v44  ;;  %v14154_v44 = vld [vmem:[%s17854_s1 + $0xfc8] sm:$0xff]  }
 0x1d3   :  { %12910 = vmatpush3.bf16.msra.mxu0 %v14113_v42  ;;  %v14151_v42 = vld [vmem:[%s17854_s1 + $0xf90] sm:$0xff]  }
 0x1d4   :  { %12911 = vmatprep.subr.bf16.mxu0 %v14116_v46  ;;  %v14156_v46 = vld [vmem:[%s17854_s1 + $0xf40] sm:$0xff]  }
 0x1d5   :  { %12932 = vmatpush3.bf16.msra.mxu1 %v14115_v45  ;;  %v14153_v45 = vld [vmem:[%s17854_s1 + $0xf08] sm:$0xff]  }
 0x1d6   :  { %12933 = vmatprep.subr.bf16.mxu1 %v14118_v48  ;;  %v14155_v48 = vld [vmem:[%s17854_s1 + $0xf88] sm:$0xff]  }
 0x1d7   :  { %12912 = vmatpush3.bf16.msra.mxu0 %v14117_v47  ;;  %v31_v47 = vld [vmem:[%s17853_s0 + $0x78] sm:$0xff] }
 0x1d8   :  { %12913 = vmatprep.subr.bf16.mxu0 %v14120_v50  ;;  %vm62_vm15 = vcmp.ge.f32.partialorder %v31_v47, 0.0  ;;  %v14158_v50 = vld [vmem:[%s17854_s1 + $0xfc0] sm:$0xff]  }
 0x1d9   :  { %12934 = vmatpush3.bf16.msra.mxu1 %v14119_v49  ;;  %v93_v49 = vmul.f32 0.01, %v31_v47 }
 0x1da   :  { %12935 = vmatprep.subr.bf16.mxu1 %v14122_v52 }
 0x1db   :  { %12914 = vmatpush3.bf16.msra.mxu0 %v14121_v51  ;;  %v14157_v51 = vld [vmem:[%s17854_s1 + $0xf00] sm:$0xff]   ;;  %v124_v52 = vsel %vm62_vm15, %v31_v47, %v93_v49  ;;  %v14192_v47 = vld [vmem:[%s17854_s1 + $0x1178] sm:$0xff]  }
 0x1dc   :  { %12915 = vmatprep.subr.bf16.mxu0 %v14124_v55  ;;  %v426_v55 = vcombine.high %v124_v52, %v124_v52  ;;  %v14191_v49 = vld [vmem:[%s17854_s1 + $0x1080] sm:$0xff]  }
 0x1dd   :  { %12936 = vmatpush3.bf16.msra.mxu1 %v14123_v53  ;;  %v433_v53 = vrot.slane %v124_v52, %v14783_v43  ;;  %v14194_v52 = vld [vmem:[%s17854_s1 + $0x11f8] sm:$0xff]  }
 0x1de   :  { %12937 = vmatprep.subr.bf16.mxu1 %v14126_v57  ;;  %v440_v58 = vrot.slane %v426_v55, %v14783_v43  ;;  %v14193_v55 = vld [vmem:[%s17854_s1 + $0x1138] sm:$0xff]  }
 0x1df   :  { %12916 = vmatpush3.bf16.msra.mxu0 %v14125_v59  ;;  %v441_v57 = vcombine.high %v433_v53, %v433_v53  ;;  %v14162_v59 = vld [vmem:[%s17854_s1 + $0x10f8] sm:$0xff]   ;;  %v880_v61 = vpack.c.bf16 %v433_v53, %v433_v53 }
 0x1e0   :  { %12945 = vmatprep.subr.bf16.mxu0 %v14128_v62  ;;  %v14161_v62 = vld [vmem:[%s17854_s1 + $0x1038] sm:$0xff]  }
 0x1e1   :  { %12938 = vmatpush3.bf16.msra.mxu1 %v14127_v0  ;;  %v881_v63 = vpack.c.bf16 %v441_v57, %v441_v57  ;;  %v442_v0 = vcombine.high %v440_v58, %v440_v58 }
 0x1e2   :  { %v12653_v2 = vpop.f32.mrf.mxu0  ;;  %9947 = vmatmul.mubr.bf16.vlgmr.msra.gmra.mxu0 %v876_v3  ;;  %12967 = vmatprep.subr.bf16.mxu1 %v14130_v4  ;;  %v882_v4 = vpack.c.bf16 %v440_v58, %v440_v58  ;;  %v14195_v58 = vld [vmem:[%s17854_s1 + $0x11b8] sm:$0xff]  }
 0x1e3   :  { %12946 = vmatpush3.bf16.msra.mxu0 %v14129_v7  ;;  %10026 = vmatprep.mubr.bf16.mxu0 %v881_v63  ;;  %v883_v6 = vpack.c.bf16 %v442_v0, %v442_v0 }
 0x1e4   :  { %v12654_v8 = vpop.f32.mrf.mxu0  ;;  %v12675_v9 = vpop.f32.mrf.mxu1  ;;  %9987 = vmatmul.mubr.bf16.vlgmr.msra.gmra.mxu1 %v878_v10  ;;  %12947 = vmatprep.subr.bf16.mxu0 %v14132_v11  ;;  %v14166_v11 = vld [vmem:[%s17854_s1 + $0x10f0] sm:$0xff]  }
 0x1e5   :  { %v12655_v13 = vadd.f32 %v12654_v8, %v12653_v2  ;;  %12968 = vmatpush3.bf16.msra.mxu1 %v14131_v14  ;;  %v14165_v8 = vld [vmem:[%s17854_s1 + $0x1030] sm:$0xff]   ;;  %10066 = vmatprep.mubr.bf16.mxu1 %v883_v6 }
 0x1e6   :  { %v12656_v15 = vpop.f32.mrf.mxu0  ;;  %v12676_v16 = vpop.f32.mrf.mxu1  ;;  %12969 = vmatprep.subr.bf16.mxu1 %v14134_v17  ;;  %v14167_v14 = vld [vmem:[%s17854_s1 + $0x10b0] sm:$0xff]  }
 0x1e7   :  { %v9469_v18 = vadd.f32 %v12655_v13, %v16145_v32  ;;  %v12677_v19 = vadd.f32 %v12676_v16, %v12675_v9  ;;  %12948 = vmatpush3.bf16.msra.mxu0 %v14133_v20  ;;  %v14141_v32 = vld [vmem:[%s17854_s1 + $0xf20] sm:$0xff]   ;;  %v14168_v16 = vld [vmem:[%s17854_s1 + $0x1068] sm:$0xff]  }
 0x1e8   :  { %v12657_v21 = vpop.f32.mrf.mxu0  ;;  %v12678_v23 = vpop.f32.mrf.mxu1  ;;  %12949 = vmatprep.subr.bf16.mxu0 %v14136_v22  ;;  %v14170_v20 = vld [vmem:[%s17854_s1 + $0x10e8] sm:$0xff]  }
 0x1e9   :  { %v16246_v24 = vadd.f32 %v12677_v19, %v9469_v18  ;;  %12970 = vmatpush3.bf16.msra.mxu1 %v14135_v25  ;;  %v14169_v19 = vld [vmem:[%s17854_s1 + $0x1028] sm:$0xff]   ;;  %v14172_v23 = vld [vmem:[%s17854_s1 + $0x1060] sm:$0xff]  }
 0x1ea   :  { %v12679_v27 = vpop.f32.mrf.mxu1  ;;  %12971 = vmatprep.subr.bf16.mxu1 %v14138_v26  ;;  %v14171_v22 = vld [vmem:[%s17854_s1 + $0x10a8] sm:$0xff]   ;;  %v14174_v25 = vld [vmem:[%s17854_s1 + $0x10e0] sm:$0xff]  }
 0x1eb   :  { %12950 = vmatpush3.bf16.msra.mxu0 %v14137_v28  ;;  %v14175_v26 = vld [vmem:[%s17854_s1 + $0x10a0] sm:$0xff]   ;;  %v14176_v27 = vld [vmem:[%s17854_s1 + $0x1058] sm:$0xff]  }
 0x1ec   :  { %12951 = vmatprep.subr.bf16.mxu0 %v14140_v29  ;;  %v14177_v28 = vld [vmem:[%s17854_s1 + $0x1018] sm:$0xff]  }
 0x1ed   :  { %12972 = vmatpush3.bf16.msra.mxu1 %v14139_v30  ;;  %v14178_v29 = vld [vmem:[%s17854_s1 + $0x10d8] sm:$0xff]  }
 0x1ee   :  { %12973 = vmatprep.subr.bf16.mxu1 %v14142_v31  ;;  %v14179_v30 = vld [vmem:[%s17854_s1 + $0x1098] sm:$0xff]   ;;  %v14180_v31 = vld [vmem:[%s17854_s1 + $0x1050] sm:$0xff]  }
 0x1ef   :  { %12952 = vmatpush3.bf16.msra.mxu0 %v14141_v32  ;;  %v14181_v32 = vld [vmem:[%s17854_s1 + $0x1010] sm:$0xff]  }
 0x1f0   :  { %12953 = vmatprep.subr.bf16.mxu0 %v14144_v33  ;;  %v14182_v33 = vld [vmem:[%s17854_s1 + $0x10d0] sm:$0xff]  }
 0x1f1   :  { %12974 = vmatpush3.bf16.msra.mxu1 %v14143_v34  ;;  %v14183_v34 = vld [vmem:[%s17854_s1 + $0x1090] sm:$0xff]  }
 0x1f2   :  { %12975 = vmatprep.subr.bf16.mxu1 %v14146_v35  ;;  %v14184_v35 = vld [vmem:[%s17854_s1 + $0x1048] sm:$0xff]  }
 0x1f3   :  { %12954 = vmatpush3.bf16.msra.mxu0 %v14145_v36  ;;  %v14185_v36 = vld [vmem:[%s17854_s1 + $0x1008] sm:$0xff]  }
 0x1f4   :  { %12955 = vmatprep.subr.bf16.mxu0 %v14148_v37  ;;  %v14186_v37 = vld [vmem:[%s17854_s1 + $0x10c8] sm:$0xff]  }
 0x1f5   :  { %12976 = vmatpush3.bf16.msra.mxu1 %v14147_v38  ;;  %v14188_v38 = vld [vmem:[%s17854_s1 + $0x1040] sm:$0xff]  }
 0x1f6   :  { %12977 = vmatprep.subr.bf16.mxu1 %v14150_v39  ;;  %v32_v39 = vld [vmem:[%s17853_s0 + $0x80] sm:$0xff] }
 0x1f7   :  { %12956 = vmatpush3.bf16.msra.mxu0 %v14149_v40  ;;  %v14187_v40 = vld [vmem:[%s17854_s1 + $0x1088] sm:$0xff]   ;;  %vm63_vm0 = vcmp.ge.f32.partialorder %v32_v39, 0.0 }
 0x1f8   :  { %12957 = vmatprep.subr.bf16.mxu0 %v14152_v41  ;;  %v94_v41 = vmul.f32 0.01, %v32_v39 }
 0x1f9   :  { %12978 = vmatpush3.bf16.msra.mxu1 %v14151_v42  ;;  %v14190_v42 = vld [vmem:[%s17854_s1 + $0x10c0] sm:$0xff]  }
 0x1fa   :  { %12979 = vmatprep.subr.bf16.mxu1 %v14154_v44  ;;  %v14189_v44 = vld [vmem:[%s17854_s1 + $0x1000] sm:$0xff]  }
 0x1fb   :  { %12958 = vmatpush3.bf16.msra.mxu0 %v14153_v45  ;;  %v125_v45 = vsel %vm63_vm0, %v32_v39, %v94_v41 }
 0x1fc   :  { %12959 = vmatprep.subr.bf16.mxu0 %v14156_v46  ;;  %v450_v46 = vrot.slane %v125_v45, %v14783_v43 }
 0x1fd   :  { %12980 = vmatpush3.bf16.msra.mxu1 %v14155_v48  ;;  %v443_v48 = vcombine.high %v125_v45, %v125_v45 }
 0x1fe   :  { %12981 = vmatprep.subr.bf16.mxu1 %v14158_v50  ;;  %v458_v50 = vcombine.high %v450_v46, %v450_v46 }
 0x1ff   :  { %12960 = vmatpush3.bf16.msra.mxu0 %v14157_v51  ;;  %v457_v51 = vrot.slane %v443_v48, %v14783_v43 }
 0x200   :  { %12989 = vmatprep.subr.bf16.mxu0 %v14160_v54  ;;  %v884_v54 = vpack.c.bf16 %v450_v46, %v450_v46 }
 0x201   :  { %12982 = vmatpush3.bf16.msra.mxu1 %v14159_v56  ;;  %v885_v56 = vpack.c.bf16 %v458_v50, %v458_v50  ;;  %v459_v57 = vcombine.high %v457_v51, %v457_v51  ;;  %v14225_v50 = vld [vmem:[%s17854_s1 + $0x1238] sm:$0xff]  }
 0x202   :  { %v12697_v60 = vpop.f32.mrf.mxu0  ;;  %13011 = vmatprep.subr.bf16.mxu1 %v14162_v59  ;;  %10027 = vmatmul.mubr.bf16.vlgmr.msra.gmra.mxu0 %v880_v61  ;;  %v886_v61 = vpack.c.bf16 %v457_v51, %v457_v51 }
 0x203   :  { %12990 = vmatpush3.bf16.msra.mxu0 %v14161_v62  ;;  %v14196_v62 = vld [vmem:[%s17854_s1 + $0x1170] sm:$0xff]   ;;  %10106 = vmatprep.mubr.bf16.mxu0 %v885_v56  ;;  %v887_v63 = vpack.c.bf16 %v459_v57, %v459_v57  ;;  %v14227_v57 = vld [vmem:[%s17854_s1 + $0x12b8] sm:$0xff]  }
 0x204   :  { %v12698_v2 = vpop.f32.mrf.mxu0  ;;  %v12719_v3 = vpop.f32.mrf.mxu1  ;;  %10067 = vmatmul.mubr.bf16.vlgmr.msra.gmra.mxu1 %v882_v4  ;;  %12991 = vmatprep.subr.bf16.mxu0 %v14164_v5  ;;  %v14198_v4 = vld [vmem:[%s17854_s1 + $0x11f0] sm:$0xff]  }
 0x205   :  { %v12699_v7 = vadd.f32 %v12698_v2, %v12697_v60  ;;  %13012 = vmatpush3.bf16.msra.mxu1 %v14163_v1  ;;  %v14197_v1 = vld [vmem:[%s17854_s1 + $0x1130] sm:$0xff]   ;;  %10146 = vmatprep.mubr.bf16.mxu1 %v887_v63 }
 0x206   :  { %v12700_v9 = vpop.f32.mrf.mxu0  ;;  %v12720_v10 = vpop.f32.mrf.mxu1  ;;  %13013 = vmatprep.subr.bf16.mxu1 %v14166_v11  ;;  %v14229_v63 = vld [vmem:[%s17854_s1 + $0x1230] sm:$0xff]  }
 0x207   :  { %v9549_v12 = vadd.f32 %v12699_v7, %v16246_v24  ;;  %v12721_v13 = vadd.f32 %v12720_v10, %v12719_v3  ;;  %12992 = vmatpush3.bf16.msra.mxu0 %v14165_v8  ;;  %v14173_v24 = vld [vmem:[%s17854_s1 + $0x1020] sm:$0xff]   ;;  %v14199_v7 = vld [vmem:[%s17854_s1 + $0x11b0] sm:$0xff]   ;;  %v14200_v9 = vld [vmem:[%s17854_s1 + $0x1168] sm:$0xff]  }
 0x208   :  { %v12701_v15 = vpop.f32.mrf.mxu0  ;;  %v12722_v17 = vpop.f32.mrf.mxu1  ;;  %12993 = vmatprep.subr.bf16.mxu0 %v14168_v16  ;;  %v14204_v16 = vld [vmem:[%s17854_s1 + $0x1160] sm:$0xff]  }
 0x209   :  { %v16353_v18 = vadd.f32 %v12721_v13, %v9549_v12  ;;  %13014 = vmatpush3.bf16.msra.mxu1 %v14167_v14  ;;  %v14201_v12 = vld [vmem:[%s17854_s1 + $0x1128] sm:$0xff]   ;;  %v14205_v17 = vld [vmem:[%s17854_s1 + $0x1120] sm:$0xff]  }
 0x20a   :  { %v12723_v21 = vpop.f32.mrf.mxu1  ;;  %13015 = vmatprep.subr.bf16.mxu1 %v14170_v20  ;;  %v14202_v13 = vld [vmem:[%s17854_s1 + $0x11e8] sm:$0xff]   ;;  %v14208_v20 = vld [vmem:[%s17854_s1 + $0x1158] sm:$0xff]  }
 0x20b   :  { %12994 = vmatpush3.bf16.msra.mxu0 %v14169_v19  ;;  %v14203_v15 = vld [vmem:[%s17854_s1 + $0x11a8] sm:$0xff]   ;;  %v14207_v19 = vld [vmem:[%s17854_s1 + $0x11a0] sm:$0xff]   ;;  %v14209_v21 = vld [vmem:[%s17854_s1 + $0x1118] sm:$0xff]  }
 0x20c   :  { %12995 = vmatprep.subr.bf16.mxu0 %v14172_v23  ;;  %v14211_v23 = vld [vmem:[%s17854_s1 + $0x1198] sm:$0xff]  }
 0x20d   :  { %13016 = vmatpush3.bf16.msra.mxu1 %v14171_v22  ;;  %v14210_v22 = vld [vmem:[%s17854_s1 + $0x11d8] sm:$0xff]  }
 0x20e   :  { %13017 = vmatprep.subr.bf16.mxu1 %v14174_v25  ;;  %v14213_v25 = vld [vmem:[%s17854_s1 + $0x1110] sm:$0xff]  }
 0x20f   :  { %12996 = vmatpush3.bf16.msra.mxu0 %v14173_v24  ;;  %v14212_v24 = vld [vmem:[%s17854_s1 + $0x1150] sm:$0xff]  }
 0x210   :  { %12997 = vmatprep.subr.bf16.mxu0 %v14176_v27  ;;  %v14215_v27 = vld [vmem:[%s17854_s1 + $0x1190] sm:$0xff]  }
 0x211   :  { %13018 = vmatpush3.bf16.msra.mxu1 %v14175_v26  ;;  %v14214_v26 = vld [vmem:[%s17854_s1 + $0x11d0] sm:$0xff]  }
 0x212   :  { %13019 = vmatprep.subr.bf16.mxu1 %v14178_v29  ;;  %v14217_v29 = vld [vmem:[%s17854_s1 + $0x1108] sm:$0xff]  }
 0x213   :  { %12998 = vmatpush3.bf16.msra.mxu0 %v14177_v28  ;;  %v14216_v28 = vld [vmem:[%s17854_s1 + $0x1148] sm:$0xff]  }
 0x214   :  { %12999 = vmatprep.subr.bf16.mxu0 %v14180_v31  ;;  %v14219_v31 = vld [vmem:[%s17854_s1 + $0x1188] sm:$0xff]  }
 0x215   :  { %13020 = vmatpush3.bf16.msra.mxu1 %v14179_v30  ;;  %v14218_v30 = vld [vmem:[%s17854_s1 + $0x11c8] sm:$0xff]  }
 0x216   :  { %13021 = vmatprep.subr.bf16.mxu1 %v14182_v33  ;;  %v14220_v33 = vld [vmem:[%s17854_s1 + $0x1140] sm:$0xff]  }
 0x217   :  { %13000 = vmatpush3.bf16.msra.mxu0 %v14181_v32  ;;  %v33_v32 = vld [vmem:[%s17853_s0 + $0x88] sm:$0xff] }
 0x218   :  { %13001 = vmatprep.subr.bf16.mxu0 %v14184_v35  ;;  %vm64_vm1 = vcmp.ge.f32.partialorder %v33_v32, 0.0  ;;  %v14222_v35 = vld [vmem:[%s17854_s1 + $0x11c0] sm:$0xff]  }
 0x219   :  { %13022 = vmatpush3.bf16.msra.mxu1 %v14183_v34  ;;  %v95_v34 = vmul.f32 0.01, %v33_v32 }
 0x21a   :  { %13023 = vmatprep.subr.bf16.mxu1 %v14186_v37  ;;  %v14221_v37 = vld [vmem:[%s17854_s1 + $0x1100] sm:$0xff]  }
 0x21b   :  { %13002 = vmatpush3.bf16.msra.mxu0 %v14185_v36  ;;  %v126_v36 = vsel %vm64_vm1, %v33_v32, %v95_v34  ;;  %v14256_v32 = vld [vmem:[%s17854_s1 + $0x1378] sm:$0xff]   ;;  %v14255_v34 = vld [vmem:[%s17854_s1 + $0x1280] sm:$0xff]  }
 0x21c   :  { %13003 = vmatprep.subr.bf16.mxu0 %v14188_v38  ;;  %v467_v38 = vrot.slane %v126_v36, %v14783_v43  ;;  %v460_v39 = vcombine.high %v126_v36, %v126_v36 }
 0x21d   :  { %13024 = vmatpush3.bf16.msra.mxu1 %v14187_v40  ;;  %v14224_v40 = vld [vmem:[%s17854_s1 + $0x1278] sm:$0xff]  }
 0x21e   :  { %13025 = vmatprep.subr.bf16.mxu1 %v14190_v42  ;;  %v475_v41 = vcombine.high %v467_v38, %v467_v38  ;;  %v14223_v42 = vld [vmem:[%s17854_s1 + $0x1180] sm:$0xff]   ;;  %v888_v46 = vpack.c.bf16 %v467_v38, %v467_v38 }
 0x21f   :  { %13004 = vmatpush3.bf16.msra.mxu0 %v14189_v44  ;;  %v474_v44 = vrot.slane %v460_v39, %v14783_v43 }
 0x220   :  { %13033 = vmatprep.subr.bf16.mxu0 %v14192_v47  ;;  %v14226_v47 = vld [vmem:[%s17854_s1 + $0x12f8] sm:$0xff]   ;;  %v889_v48 = vpack.c.bf16 %v475_v41, %v475_v41 }
 0x221   :  { %13026 = vmatpush3.bf16.msra.mxu1 %v14191_v49  ;;  %v476_v49 = vcombine.high %v474_v44, %v474_v44 }
 0x222   :  { %v12741_v53 = vpop.f32.mrf.mxu0  ;;  %13055 = vmatprep.subr.bf16.mxu1 %v14194_v52  ;;  %10107 = vmatmul.mubr.bf16.vlgmr.msra.gmra.mxu0 %v884_v54  ;;  %v14228_v54 = vld [vmem:[%s17854_s1 + $0x1270] sm:$0xff]  }
 0x223   :  { %13034 = vmatpush3.bf16.msra.mxu0 %v14193_v55  ;;  %10186 = vmatprep.mubr.bf16.mxu0 %v889_v48  ;;  %v891_v55 = vpack.c.bf16 %v476_v49, %v476_v49  ;;  %v14260_v48 = vld [vmem:[%s17854_s1 + $0x1370] sm:$0xff]  }
 0x224   :  { %v12742_v59 = vpop.f32.mrf.mxu0  ;;  %v12763_v60 = vpop.f32.mrf.mxu1  ;;  %10147 = vmatmul.mubr.bf16.vlgmr.msra.gmra.mxu1 %v886_v61  ;;  %13035 = vmatprep.subr.bf16.mxu0 %v14196_v62 }
 0x225   :  { %v12743_v0 = vadd.f32 %v12742_v59, %v12741_v53  ;;  %13056 = vmatpush3.bf16.msra.mxu1 %v14195_v58  ;;  %v890_v53 = vpack.c.bf16 %v474_v44, %v474_v44  ;;  %10226 = vmatprep.mubr.bf16.mxu1 %v891_v55  ;;  %v14259_v44 = vld [vmem:[%s17854_s1 + $0x13b8] sm:$0xff]  }
 0x226   :  { %v12744_v2 = vpop.f32.mrf.mxu0  ;;  %v12764_v3 = vpop.f32.mrf.mxu1  ;;  %13057 = vmatprep.subr.bf16.mxu1 %v14198_v4  ;;  %v14231_v4 = vld [vmem:[%s17854_s1 + $0x12b0] sm:$0xff]  }
 0x227   :  { %v9629_v5 = vadd.f32 %v12743_v0, %v16353_v18  ;;  %v12765_v6 = vadd.f32 %v12764_v3, %v12763_v60  ;;  %13036 = vmatpush3.bf16.msra.mxu0 %v14197_v1  ;;  %v14206_v18 = vld [vmem:[%s17854_s1 + $0x11e0] sm:$0xff]   ;;  %v14230_v60 = vld [vmem:[%s17854_s1 + $0x12f0] sm:$0xff]   ;;  %v14232_v1 = vld [vmem:[%s17854_s1 + $0x1268] sm:$0xff]  }
 0x228   :  { %v12745_v8 = vpop.f32.mrf.mxu0  ;;  %v12766_v10 = vpop.f32.mrf.mxu1  ;;  %13037 = vmatprep.subr.bf16.mxu0 %v14200_v9  ;;  %v14235_v9 = vld [vmem:[%s17854_s1 + $0x12a8] sm:$0xff]  }
 0x229   :  { %v16457_v11 = vadd.f32 %v12765_v6, %v9629_v5  ;;  %13058 = vmatpush3.bf16.msra.mxu1 %v14199_v7  ;;  %v14234_v5 = vld [vmem:[%s17854_s1 + $0x12e8] sm:$0xff]   ;;  %v14236_v8 = vld [vmem:[%s17854_s1 + $0x1260] sm:$0xff]  }
 0x22a   :  { %v12767_v14 = vpop.f32.mrf.mxu1  ;;  %13059 = vmatprep.subr.bf16.mxu1 %v14202_v13  ;;  %v14233_v7 = vld [vmem:[%s17854_s1 + $0x1228] sm:$0xff]   ;;  %v14238_v10 = vld [vmem:[%s17854_s1 + $0x12e0] sm:$0xff]  }
 0x22b   :  { %13038 = vmatpush3.bf16.msra.mxu0 %v14201_v12  ;;  %v14240_v12 = vld [vmem:[%s17854_s1 + $0x1258] sm:$0xff]   ;;  %v14239_v13 = vld [vmem:[%s17854_s1 + $0x12a0] sm:$0xff]  }
 0x22c   :  { %13039 = vmatprep.subr.bf16.mxu0 %v14204_v16  ;;  %v14242_v14 = vld [vmem:[%s17854_s1 + $0x12d8] sm:$0xff]   ;;  %v14244_v16 = vld [vmem:[%s17854_s1 + $0x1250] sm:$0xff]  }
 0x22d   :  { %13060 = vmatpush3.bf16.msra.mxu1 %v14203_v15  ;;  %v14241_v15 = vld [vmem:[%s17854_s1 + $0x1218] sm:$0xff]  }
 0x22e   :  { %13061 = vmatprep.subr.bf16.mxu1 %v14206_v18  ;;  %v14246_v18 = vld [vmem:[%s17854_s1 + $0x12d0] sm:$0xff]  }
 0x22f   :  { %13040 = vmatpush3.bf16.msra.mxu0 %v14205_v17  ;;  %v14243_v17 = vld [vmem:[%s17854_s1 + $0x1298] sm:$0xff]  }
 0x230   :  { %13041 = vmatprep.subr.bf16.mxu0 %v14208_v20  ;;  %v14248_v20 = vld [vmem:[%s17854_s1 + $0x1248] sm:$0xff]  }
 0x231   :  { %13062 = vmatpush3.bf16.msra.mxu1 %v14207_v19  ;;  %v14245_v19 = vld [vmem:[%s17854_s1 + $0x1210] sm:$0xff]  }
 0x232   :  { %13063 = vmatprep.subr.bf16.mxu1 %v14210_v22  ;;  %v14250_v22 = vld [vmem:[%s17854_s1 + $0x12c8] sm:$0xff]  }
 0x233   :  { %13042 = vmatpush3.bf16.msra.mxu0 %v14209_v21  ;;  %v14247_v21 = vld [vmem:[%s17854_s1 + $0x1290] sm:$0xff]  }
 0x234   :  { %13043 = vmatprep.subr.bf16.mxu0 %v14212_v24  ;;  %v14252_v24 = vld [vmem:[%s17854_s1 + $0x1240] sm:$0xff]  }
 0x235   :  { %13064 = vmatpush3.bf16.msra.mxu1 %v14211_v23  ;;  %v14249_v23 = vld [vmem:[%s17854_s1 + $0x1208] sm:$0xff]  }
 0x236   :  { %13065 = vmatprep.subr.bf16.mxu1 %v14214_v26  ;;  %v14251_v26 = vld [vmem:[%s17854_s1 + $0x1288] sm:$0xff]  }
 0x237   :  { %13044 = vmatpush3.bf16.msra.mxu0 %v14213_v25  ;;  %v34_v25 = vld [vmem:[%s17853_s0 + $0x90] sm:$0xff] }
 0x238   :  { %13045 = vmatprep.subr.bf16.mxu0 %v14216_v28  ;;  %vm65_vm2 = vcmp.ge.f32.partialorder %v34_v25, 0.0  ;;  %v14254_v28 = vld [vmem:[%s17854_s1 + $0x12c0] sm:$0xff]  }
 0x239   :  { %13066 = vmatpush3.bf16.msra.mxu1 %v14215_v27  ;;  %v96_v27 = vmul.f32 0.01, %v34_v25 }
 0x23a   :  { %13067 = vmatprep.subr.bf16.mxu1 %v14218_v30 }
 0x23b   :  { %13046 = vmatpush3.bf16.msra.mxu0 %v14217_v29  ;;  %v14253_v29 = vld [vmem:[%s17854_s1 + $0x1200] sm:$0xff]   ;;  %v127_v30 = vsel %vm65_vm2, %v34_v25, %v96_v27  ;;  %v14288_v25 = vld [vmem:[%s17854_s1 + $0x1478] sm:$0xff]  }
 0x23c   :  { %13047 = vmatprep.subr.bf16.mxu0 %v14220_v33  ;;  %v477_v33 = vcombine.high %v127_v30, %v127_v30  ;;  %v14287_v27 = vld [vmem:[%s17854_s1 + $0x1380] sm:$0xff]  }
 0x23d   :  { %13068 = vmatpush3.bf16.msra.mxu1 %v14219_v31  ;;  %v484_v31 = vrot.slane %v127_v30, %v14783_v43  ;;  %v14290_v30 = vld [vmem:[%s17854_s1 + $0x14f8] sm:$0xff]  }
 0x23e   :  { %13069 = vmatprep.subr.bf16.mxu1 %v14222_v35  ;;  %v491_v36 = vrot.slane %v477_v33, %v14783_v43  ;;  %v14289_v33 = vld [vmem:[%s17854_s1 + $0x1438] sm:$0xff]  }
 0x23f   :  { %13048 = vmatpush3.bf16.msra.mxu0 %v14221_v37  ;;  %v492_v35 = vcombine.high %v484_v31, %v484_v31  ;;  %v14258_v37 = vld [vmem:[%s17854_s1 + $0x13f8] sm:$0xff]   ;;  %v892_v39 = vpack.c.bf16 %v484_v31, %v484_v31 }
 0x240   :  { %13077 = vmatprep.subr.bf16.mxu0 %v14224_v40  ;;  %v14257_v40 = vld [vmem:[%s17854_s1 + $0x1338] sm:$0xff]  }
 0x241   :  { %13070 = vmatpush3.bf16.msra.mxu1 %v14223_v42  ;;  %v893_v41 = vpack.c.bf16 %v492_v35, %v492_v35  ;;  %v493_v42 = vcombine.high %v491_v36, %v491_v36 }
 0x242   :  { %v12785_v45 = vpop.f32.mrf.mxu0  ;;  %10187 = vmatmul.mubr.bf16.vlgmr.msra.gmra.mxu0 %v888_v46  ;;  %13099 = vmatprep.subr.bf16.mxu1 %v14226_v47  ;;  %v894_v47 = vpack.c.bf16 %v491_v36, %v491_v36  ;;  %v14291_v36 = vld [vmem:[%s17854_s1 + $0x14b8] sm:$0xff]  }
 0x243   :  { %13078 = vmatpush3.bf16.msra.mxu0 %v14225_v50  ;;  %10266 = vmatprep.mubr.bf16.mxu0 %v893_v41  ;;  %v895_v49 = vpack.c.bf16 %v493_v42, %v493_v42 }
 0x244   :  { %v12786_v51 = vpop.f32.mrf.mxu0  ;;  %v12807_v52 = vpop.f32.mrf.mxu1  ;;  %10227 = vmatmul.mubr.bf16.vlgmr.msra.gmra.mxu1 %v890_v53  ;;  %13079 = vmatprep.subr.bf16.mxu0 %v14228_v54  ;;  %v14262_v54 = vld [vmem:[%s17854_s1 + $0x13f0] sm:$0xff]  }
 0x245   :  { %v12787_v56 = vadd.f32 %v12786_v51, %v12785_v45  ;;  %13100 = vmatpush3.bf16.msra.mxu1 %v14227_v57  ;;  %v14261_v51 = vld [vmem:[%s17854_s1 + $0x1330] sm:$0xff]   ;;  %10306 = vmatprep.mubr.bf16.mxu1 %v895_v49 }
 0x246   :  { %v12788_v58 = vpop.f32.mrf.mxu0  ;;  %v12808_v59 = vpop.f32.mrf.mxu1  ;;  %13101 = vmatprep.subr.bf16.mxu1 %v14230_v60  ;;  %v14263_v57 = vld [vmem:[%s17854_s1 + $0x13b0] sm:$0xff]  }
 0x247   :  { %v9709_v61 = vadd.f32 %v12787_v56, %v16457_v11  ;;  %v12809_v62 = vadd.f32 %v12808_v59, %v12807_v52  ;;  %13080 = vmatpush3.bf16.msra.mxu0 %v14229_v63  ;;  %v14237_v11 = vld [vmem:[%s17854_s1 + $0x1220] sm:$0xff]   ;;  %v14264_v59 = vld [vmem:[%s17854_s1 + $0x1368] sm:$0xff]  }
 0x248   :  { %v12789_v0 = vpop.f32.mrf.mxu0  ;;  %v12810_v2 = vpop.f32.mrf.mxu1  ;;  %13081 = vmatprep.subr.bf16.mxu0 %v14232_v1  ;;  %v14266_v63 = vld [vmem:[%s17854_s1 + $0x13e8] sm:$0xff]  }
 0x249   :  { %v16558_v3 = vadd.f32 %v12809_v62, %v9709_v61  ;;  %13102 = vmatpush3.bf16.msra.mxu1 %v14231_v4  ;;  %v14265_v62 = vld [vmem:[%s17854_s1 + $0x1328] sm:$0xff]   ;;  %v14268_v2 = vld [vmem:[%s17854_s1 + $0x1360] sm:$0xff]  }
 0x24a   :  { %v12811_v6 = vpop.f32.mrf.mxu1  ;;  %13103 = vmatprep.subr.bf16.mxu1 %v14234_v5  ;;  %v14267_v1 = vld [vmem:[%s17854_s1 + $0x13a8] sm:$0xff]   ;;  %v14270_v4 = vld [vmem:[%s17854_s1 + $0x13e0] sm:$0xff]  }
 0x24b   :  { %13082 = vmatpush3.bf16.msra.mxu0 %v14233_v7  ;;  %v14271_v5 = vld [vmem:[%s17854_s1 + $0x13a0] sm:$0xff]   ;;  %v14272_v6 = vld [vmem:[%s17854_s1 + $0x1358] sm:$0xff]  }
 0x24c   :  { %13083 = vmatprep.subr.bf16.mxu0 %v14236_v8  ;;  %v14273_v7 = vld [vmem:[%s17854_s1 + $0x1318] sm:$0xff]  }
 0x24d   :  { %13104 = vmatpush3.bf16.msra.mxu1 %v14235_v9  ;;  %v14274_v8 = vld [vmem:[%s17854_s1 + $0x13d8] sm:$0xff]  }
 0x24e   :  { %13105 = vmatprep.subr.bf16.mxu1 %v14238_v10  ;;  %v14275_v9 = vld [vmem:[%s17854_s1 + $0x1398] sm:$0xff]   ;;  %v14276_v10 = vld [vmem:[%s17854_s1 + $0x1350] sm:$0xff]  }
 0x24f   :  { %13084 = vmatpush3.bf16.msra.mxu0 %v14237_v11  ;;  %v14277_v11 = vld [vmem:[%s17854_s1 + $0x1310] sm:$0xff]  }
 0x250   :  { %13085 = vmatprep.subr.bf16.mxu0 %v14240_v12  ;;  %v14278_v12 = vld [vmem:[%s17854_s1 + $0x13d0] sm:$0xff]  }
 0x251   :  { %13106 = vmatpush3.bf16.msra.mxu1 %v14239_v13  ;;  %v14279_v13 = vld [vmem:[%s17854_s1 + $0x1390] sm:$0xff]  }
 0x252   :  { %13107 = vmatprep.subr.bf16.mxu1 %v14242_v14  ;;  %v14280_v14 = vld [vmem:[%s17854_s1 + $0x1348] sm:$0xff]  }
 0x253   :  { %13086 = vmatpush3.bf16.msra.mxu0 %v14241_v15  ;;  %v14281_v15 = vld [vmem:[%s17854_s1 + $0x1308] sm:$0xff]  }
 0x254   :  { %13087 = vmatprep.subr.bf16.mxu0 %v14244_v16  ;;  %v14282_v16 = vld [vmem:[%s17854_s1 + $0x13c8] sm:$0xff]  }
 0x255   :  { %13108 = vmatpush3.bf16.msra.mxu1 %v14243_v17  ;;  %v14284_v17 = vld [vmem:[%s17854_s1 + $0x1340] sm:$0xff]  }
 0x256   :  { %13109 = vmatprep.subr.bf16.mxu1 %v14246_v18  ;;  %v35_v18 = vld [vmem:[%s17853_s0 + $0x98] sm:$0xff] }
 0x257   :  { %13088 = vmatpush3.bf16.msra.mxu0 %v14245_v19  ;;  %v14283_v19 = vld [vmem:[%s17854_s1 + $0x1388] sm:$0xff]   ;;  %vm66_vm3 = vcmp.ge.f32.partialorder %v35_v18, 0.0 }
 0x258   :  { %13089 = vmatprep.subr.bf16.mxu0 %v14248_v20  ;;  %v97_v20 = vmul.f32 0.01, %v35_v18 }
 0x259   :  { %13110 = vmatpush3.bf16.msra.mxu1 %v14247_v21  ;;  %v14286_v21 = vld [vmem:[%s17854_s1 + $0x13c0] sm:$0xff]  }
 0x25a   :  { %13111 = vmatprep.subr.bf16.mxu1 %v14250_v22  ;;  %v14285_v22 = vld [vmem:[%s17854_s1 + $0x1300] sm:$0xff]  }
 0x25b   :  { %13090 = vmatpush3.bf16.msra.mxu0 %v14249_v23  ;;  %v128_v23 = vsel %vm66_vm3, %v35_v18, %v97_v20 }
 0x25c   :  { %13091 = vmatprep.subr.bf16.mxu0 %v14252_v24  ;;  %v501_v24 = vrot.slane %v128_v23, %v14783_v43 }
 0x25d   :  { %13112 = vmatpush3.bf16.msra.mxu1 %v14251_v26  ;;  %v494_v26 = vcombine.high %v128_v23, %v128_v23 }
 0x25e   :  { %13113 = vmatprep.subr.bf16.mxu1 %v14254_v28  ;;  %v509_v28 = vcombine.high %v501_v24, %v501_v24 }
 0x25f   :  { %13092 = vmatpush3.bf16.msra.mxu0 %v14253_v29  ;;  %v508_v29 = vrot.slane %v494_v26, %v14783_v43 }
 0x260   :  { %13121 = vmatprep.subr.bf16.mxu0 %v14256_v32  ;;  %v896_v32 = vpack.c.bf16 %v501_v24, %v501_v24 }
 0x261   :  { %13114 = vmatpush3.bf16.msra.mxu1 %v14255_v34  ;;  %v897_v34 = vpack.c.bf16 %v509_v28, %v509_v28  ;;  %v510_v35 = vcombine.high %v508_v29, %v508_v29  ;;  %v14321_v28 = vld [vmem:[%s17854_s1 + $0x1538] sm:$0xff]  }
 0x262   :  { %v12829_v38 = vpop.f32.mrf.mxu0  ;;  %13143 = vmatprep.subr.bf16.mxu1 %v14258_v37  ;;  %10267 = vmatmul.mubr.bf16.vlgmr.msra.gmra.mxu0 %v892_v39  ;;  %v898_v39 = vpack.c.bf16 %v508_v29, %v508_v29 }
 0x263   :  { %13122 = vmatpush3.bf16.msra.mxu0 %v14257_v40  ;;  %v14292_v40 = vld [vmem:[%s17854_s1 + $0x1470] sm:$0xff]   ;;  %10346 = vmatprep.mubr.bf16.mxu0 %v897_v34  ;;  %v899_v41 = vpack.c.bf16 %v510_v35, %v510_v35  ;;  %v14323_v35 = vld [vmem:[%s17854_s1 + $0x15b8] sm:$0xff]  }
 0x264   :  { %v12830_v45 = vpop.f32.mrf.mxu0  ;;  %v12851_v46 = vpop.f32.mrf.mxu1  ;;  %10307 = vmatmul.mubr.bf16.vlgmr.msra.gmra.mxu1 %v894_v47  ;;  %13123 = vmatprep.subr.bf16.mxu0 %v14260_v48  ;;  %v14294_v47 = vld [vmem:[%s17854_s1 + $0x14f0] sm:$0xff]  }
 0x265   :  { %v12831_v50 = vadd.f32 %v12830_v45, %v12829_v38  ;;  %13144 = vmatpush3.bf16.msra.mxu1 %v14259_v44  ;;  %v14293_v44 = vld [vmem:[%s17854_s1 + $0x1430] sm:$0xff]   ;;  %10386 = vmatprep.mubr.bf16.mxu1 %v899_v41 }
 0x266   :  { %v12832_v52 = vpop.f32.mrf.mxu0  ;;  %v12852_v53 = vpop.f32.mrf.mxu1  ;;  %13145 = vmatprep.subr.bf16.mxu1 %v14262_v54  ;;  %v14325_v41 = vld [vmem:[%s17854_s1 + $0x1530] sm:$0xff]  }
 0x267   :  { %v9789_v55 = vadd.f32 %v12831_v50, %v16558_v3  ;;  %v12853_v56 = vadd.f32 %v12852_v53, %v12851_v46  ;;  %13124 = vmatpush3.bf16.msra.mxu0 %v14261_v51  ;;  %v14269_v3 = vld [vmem:[%s17854_s1 + $0x1320] sm:$0xff]   ;;  %v14295_v50 = vld [vmem:[%s17854_s1 + $0x14b0] sm:$0xff]   ;;  %v14296_v52 = vld [vmem:[%s17854_s1 + $0x1468] sm:$0xff]  }
 0x268   :  { %v12833_v58 = vpop.f32.mrf.mxu0  ;;  %v12854_v60 = vpop.f32.mrf.mxu1  ;;  %13125 = vmatprep.subr.bf16.mxu0 %v14264_v59  ;;  %v14300_v59 = vld [vmem:[%s17854_s1 + $0x1460] sm:$0xff]  }
 0x269   :  { %v16665_v61 = vadd.f32 %v12853_v56, %v9789_v55  ;;  %13146 = vmatpush3.bf16.msra.mxu1 %v14263_v57  ;;  %v14297_v55 = vld [vmem:[%s17854_s1 + $0x1428] sm:$0xff]   ;;  %v14301_v60 = vld [vmem:[%s17854_s1 + $0x1420] sm:$0xff]  }
 0x26a   :  { %v12855_v0 = vpop.f32.mrf.mxu1  ;;  %13147 = vmatprep.subr.bf16.mxu1 %v14266_v63  ;;  %v14298_v56 = vld [vmem:[%s17854_s1 + $0x14e8] sm:$0xff]   ;;  %v14304_v63 = vld [vmem:[%s17854_s1 + $0x1458] sm:$0xff]  }
 0x26b   :  { %13126 = vmatpush3.bf16.msra.mxu0 %v14265_v62  ;;  %v14299_v58 = vld [vmem:[%s17854_s1 + $0x14a8] sm:$0xff]   ;;  %v14303_v62 = vld [vmem:[%s17854_s1 + $0x14a0] sm:$0xff]   ;;  %v14305_v0 = vld [vmem:[%s17854_s1 + $0x1418] sm:$0xff]  }
 0x26c   :  { %13127 = vmatprep.subr.bf16.mxu0 %v14268_v2  ;;  %v14307_v2 = vld [vmem:[%s17854_s1 + $0x1498] sm:$0xff]  }
 0x26d   :  { %13148 = vmatpush3.bf16.msra.mxu1 %v14267_v1  ;;  %v14306_v1 = vld [vmem:[%s17854_s1 + $0x14d8] sm:$0xff]  }
 0x26e   :  { %13149 = vmatprep.subr.bf16.mxu1 %v14270_v4  ;;  %v14309_v4 = vld [vmem:[%s17854_s1 + $0x1410] sm:$0xff]  }
 0x26f   :  { %13128 = vmatpush3.bf16.msra.mxu0 %v14269_v3  ;;  %v14308_v3 = vld [vmem:[%s17854_s1 + $0x1450] sm:$0xff]  }
 0x270   :  { %13129 = vmatprep.subr.bf16.mxu0 %v14272_v6  ;;  %v14311_v6 = vld [vmem:[%s17854_s1 + $0x1490] sm:$0xff]  }
 0x271   :  { %13150 = vmatpush3.bf16.msra.mxu1 %v14271_v5  ;;  %v14310_v5 = vld [vmem:[%s17854_s1 + $0x14d0] sm:$0xff]  }
 0x272   :  { %13151 = vmatprep.subr.bf16.mxu1 %v14274_v8  ;;  %v14313_v8 = vld [vmem:[%s17854_s1 + $0x1408] sm:$0xff]  }
 0x273   :  { %13130 = vmatpush3.bf16.msra.mxu0 %v14273_v7  ;;  %v14312_v7 = vld [vmem:[%s17854_s1 + $0x1448] sm:$0xff]  }
 0x274   :  { %13131 = vmatprep.subr.bf16.mxu0 %v14276_v10  ;;  %v14315_v10 = vld [vmem:[%s17854_s1 + $0x1488] sm:$0xff]  }
 0x275   :  { %13152 = vmatpush3.bf16.msra.mxu1 %v14275_v9  ;;  %v14314_v9 = vld [vmem:[%s17854_s1 + $0x14c8] sm:$0xff]  }
 0x276   :  { %13153 = vmatprep.subr.bf16.mxu1 %v14278_v12  ;;  %v14316_v12 = vld [vmem:[%s17854_s1 + $0x1440] sm:$0xff]  }
 0x277   :  { %13132 = vmatpush3.bf16.msra.mxu0 %v14277_v11  ;;  %v36_v11 = vld [vmem:[%s17853_s0 + $0xa0] sm:$0xff] }
 0x278   :  { %13133 = vmatprep.subr.bf16.mxu0 %v14280_v14  ;;  %vm67_vm4 = vcmp.ge.f32.partialorder %v36_v11, 0.0  ;;  %v14318_v14 = vld [vmem:[%s17854_s1 + $0x14c0] sm:$0xff]  }
 0x279   :  { %13154 = vmatpush3.bf16.msra.mxu1 %v14279_v13  ;;  %v98_v13 = vmul.f32 0.01, %v36_v11 }
 0x27a   :  { %13155 = vmatprep.subr.bf16.mxu1 %v14282_v16  ;;  %v14317_v16 = vld [vmem:[%s17854_s1 + $0x1400] sm:$0xff]  }
 0x27b   :  { %13134 = vmatpush3.bf16.msra.mxu0 %v14281_v15  ;;  %v129_v15 = vsel %vm67_vm4, %v36_v11, %v98_v13  ;;  %v14352_v11 = vld [vmem:[%s17854_s1 + $0x1678] sm:$0xff]   ;;  %v14351_v13 = vld [vmem:[%s17854_s1 + $0x1580] sm:$0xff]  }
 0x27c   :  { %13135 = vmatprep.subr.bf16.mxu0 %v14284_v17  ;;  %v518_v17 = vrot.slane %v129_v15, %v14783_v43  ;;  %v511_v18 = vcombine.high %v129_v15, %v129_v15 }
 0x27d   :  { %13156 = vmatpush3.bf16.msra.mxu1 %v14283_v19  ;;  %v14320_v19 = vld [vmem:[%s17854_s1 + $0x1578] sm:$0xff]  }
 0x27e   :  { %13157 = vmatprep.subr.bf16.mxu1 %v14286_v21  ;;  %v526_v20 = vcombine.high %v518_v17, %v518_v17  ;;  %v14319_v21 = vld [vmem:[%s17854_s1 + $0x1480] sm:$0xff]   ;;  %v900_v24 = vpack.c.bf16 %v518_v17, %v518_v17 }
 0x27f   :  { %13136 = vmatpush3.bf16.msra.mxu0 %v14285_v22  ;;  %v525_v22 = vrot.slane %v511_v18, %v14783_v43 }
 0x280   :  { %13165 = vmatprep.subr.bf16.mxu0 %v14288_v25  ;;  %v14322_v25 = vld [vmem:[%s17854_s1 + $0x15f8] sm:$0xff]   ;;  %v901_v26 = vpack.c.bf16 %v526_v20, %v526_v20 }
 0x281   :  { %13158 = vmatpush3.bf16.msra.mxu1 %v14287_v27  ;;  %v527_v27 = vcombine.high %v525_v22, %v525_v22 }
 0x282   :  { %v12873_v31 = vpop.f32.mrf.mxu0  ;;  %13187 = vmatprep.subr.bf16.mxu1 %v14290_v30  ;;  %10347 = vmatmul.mubr.bf16.vlgmr.msra.gmra.mxu0 %v896_v32  ;;  %v14324_v32 = vld [vmem:[%s17854_s1 + $0x1570] sm:$0xff]  }
 0x283   :  { %13166 = vmatpush3.bf16.msra.mxu0 %v14289_v33  ;;  %10426 = vmatprep.mubr.bf16.mxu0 %v901_v26  ;;  %v903_v33 = vpack.c.bf16 %v527_v27, %v527_v27  ;;  %v14356_v26 = vld [vmem:[%s17854_s1 + $0x1670] sm:$0xff]  }
 0x284   :  { %v12874_v37 = vpop.f32.mrf.mxu0  ;;  %v12895_v38 = vpop.f32.mrf.mxu1  ;;  %10387 = vmatmul.mubr.bf16.vlgmr.msra.gmra.mxu1 %v898_v39  ;;  %13167 = vmatprep.subr.bf16.mxu0 %v14292_v40 }
 0x285   :  { %v12875_v42 = vadd.f32 %v12874_v37, %v12873_v31  ;;  %13188 = vmatpush3.bf16.msra.mxu1 %v14291_v36  ;;  %v902_v31 = vpack.c.bf16 %v525_v22, %v525_v22  ;;  %10466 = vmatprep.mubr.bf16.mxu1 %v903_v33  ;;  %v14355_v22 = vld [vmem:[%s17854_s1 + $0x16b8] sm:$0xff]  }
 0x286   :  { %v12876_v45 = vpop.f32.mrf.mxu0  ;;  %v12896_v46 = vpop.f32.mrf.mxu1  ;;  %13189 = vmatprep.subr.bf16.mxu1 %v14294_v47  ;;  %v14327_v47 = vld [vmem:[%s17854_s1 + $0x15b0] sm:$0xff]  }
 0x287   :  { %v9869_v48 = vadd.f32 %v12875_v42, %v16665_v61  ;;  %v12897_v49 = vadd.f32 %v12896_v46, %v12895_v38  ;;  %13168 = vmatpush3.bf16.msra.mxu0 %v14293_v44  ;;  %v14302_v61 = vld [vmem:[%s17854_s1 + $0x14e0] sm:$0xff]   ;;  %v14326_v38 = vld [vmem:[%s17854_s1 + $0x15f0] sm:$0xff]   ;;  %v14328_v44 = vld [vmem:[%s17854_s1 + $0x1568] sm:$0xff]  }
 0x288   :  { %v12877_v51 = vpop.f32.mrf.mxu0  ;;  %v12898_v53 = vpop.f32.mrf.mxu1  ;;  %13169 = vmatprep.subr.bf16.mxu0 %v14296_v52  ;;  %v14331_v52 = vld [vmem:[%s17854_s1 + $0x15a8] sm:$0xff]  }
 0x289   :  { %v16769_v54 = vadd.f32 %v12897_v49, %v9869_v48  ;;  %13190 = vmatpush3.bf16.msra.mxu1 %v14295_v50  ;;  %v14330_v48 = vld [vmem:[%s17854_s1 + $0x15e8] sm:$0xff]   ;;  %v14332_v51 = vld [vmem:[%s17854_s1 + $0x1560] sm:$0xff]  }
 0x28a   :  { %v12899_v57 = vpop.f32.mrf.mxu1  ;;  %13191 = vmatprep.subr.bf16.mxu1 %v14298_v56  ;;  %v14329_v50 = vld [vmem:[%s17854_s1 + $0x1528] sm:$0xff]   ;;  %v14334_v53 = vld [vmem:[%s17854_s1 + $0x15e0] sm:$0xff]  }
 0x28b   :  { %13170 = vmatpush3.bf16.msra.mxu0 %v14297_v55  ;;  %v14336_v55 = vld [vmem:[%s17854_s1 + $0x1558] sm:$0xff]   ;;  %v14335_v56 = vld [vmem:[%s17854_s1 + $0x15a0] sm:$0xff]  }
 0x28c   :  { %13171 = vmatprep.subr.bf16.mxu0 %v14300_v59  ;;  %v14338_v57 = vld [vmem:[%s17854_s1 + $0x15d8] sm:$0xff]   ;;  %v14340_v59 = vld [vmem:[%s17854_s1 + $0x1550] sm:$0xff]  }
 0x28d   :  { %13192 = vmatpush3.bf16.msra.mxu1 %v14299_v58  ;;  %v14337_v58 = vld [vmem:[%s17854_s1 + $0x1518] sm:$0xff]  }
 0x28e   :  { %13193 = vmatprep.subr.bf16.mxu1 %v14302_v61  ;;  %v14342_v61 = vld [vmem:[%s17854_s1 + $0x15d0] sm:$0xff]  }
 0x28f   :  { %13172 = vmatpush3.bf16.msra.mxu0 %v14301_v60  ;;  %v14339_v60 = vld [vmem:[%s17854_s1 + $0x1598] sm:$0xff]  }
 0x290   :  { %13173 = vmatprep.subr.bf16.mxu0 %v14304_v63  ;;  %v14344_v63 = vld [vmem:[%s17854_s1 + $0x1548] sm:$0xff]  }
 0x291   :  { %13194 = vmatpush3.bf16.msra.mxu1 %v14303_v62  ;;  %v14341_v62 = vld [vmem:[%s17854_s1 + $0x1510] sm:$0xff]  }
 0x292   :  { %13195 = vmatprep.subr.bf16.mxu1 %v14306_v1  ;;  %v14346_v1 = vld [vmem:[%s17854_s1 + $0x15c8] sm:$0xff]  }
 0x293   :  { %13174 = vmatpush3.bf16.msra.mxu0 %v14305_v0  ;;  %v14343_v0 = vld [vmem:[%s17854_s1 + $0x1590] sm:$0xff]  }
 0x294   :  { %13175 = vmatprep.subr.bf16.mxu0 %v14308_v3  ;;  %v14348_v3 = vld [vmem:[%s17854_s1 + $0x1540] sm:$0xff]  }
 0x295   :  { %13196 = vmatpush3.bf16.msra.mxu1 %v14307_v2  ;;  %v14345_v2 = vld [vmem:[%s17854_s1 + $0x1508] sm:$0xff]  }
 0x296   :  { %13197 = vmatprep.subr.bf16.mxu1 %v14310_v5  ;;  %v14347_v5 = vld [vmem:[%s17854_s1 + $0x1588] sm:$0xff]  }
 0x297   :  { %13176 = vmatpush3.bf16.msra.mxu0 %v14309_v4  ;;  %v37_v4 = vld [vmem:[%s17853_s0 + $0xa8] sm:$0xff] }
 0x298   :  { %13177 = vmatprep.subr.bf16.mxu0 %v14312_v7  ;;  %vm68_vm5 = vcmp.ge.f32.partialorder %v37_v4, 0.0  ;;  %v14350_v7 = vld [vmem:[%s17854_s1 + $0x15c0] sm:$0xff]  }
 0x299   :  { %13198 = vmatpush3.bf16.msra.mxu1 %v14311_v6  ;;  %v99_v6 = vmul.f32 0.01, %v37_v4 }
 0x29a   :  { %13199 = vmatprep.subr.bf16.mxu1 %v14314_v9 }
 0x29b   :  { %13178 = vmatpush3.bf16.msra.mxu0 %v14313_v8  ;;  %v14349_v8 = vld [vmem:[%s17854_s1 + $0x1500] sm:$0xff]   ;;  %v130_v9 = vsel %vm68_vm5, %v37_v4, %v99_v6  ;;  %v14384_v4 = vld [vmem:[%s17854_s1 + $0x1778] sm:$0xff]  }
 0x29c   :  { %13179 = vmatprep.subr.bf16.mxu0 %v14316_v12  ;;  %v528_v12 = vcombine.high %v130_v9, %v130_v9  ;;  %v14383_v6 = vld [vmem:[%s17854_s1 + $0x1680] sm:$0xff]  }
 0x29d   :  { %13200 = vmatpush3.bf16.msra.mxu1 %v14315_v10  ;;  %v535_v10 = vrot.slane %v130_v9, %v14783_v43  ;;  %v14386_v9 = vld [vmem:[%s17854_s1 + $0x17f8] sm:$0xff]  }
 0x29e   :  { %13201 = vmatprep.subr.bf16.mxu1 %v14318_v14  ;;  %v542_v15 = vrot.slane %v528_v12, %v14783_v43  ;;  %v14385_v12 = vld [vmem:[%s17854_s1 + $0x1738] sm:$0xff]  }
 0x29f   :  { %13180 = vmatpush3.bf16.msra.mxu0 %v14317_v16  ;;  %v543_v14 = vcombine.high %v535_v10, %v535_v10  ;;  %v14354_v16 = vld [vmem:[%s17854_s1 + $0x16f8] sm:$0xff]   ;;  %v904_v18 = vpack.c.bf16 %v535_v10, %v535_v10 }
 0x2a0   :  { %13209 = vmatprep.subr.bf16.mxu0 %v14320_v19  ;;  %v14353_v19 = vld [vmem:[%s17854_s1 + $0x1638] sm:$0xff]  }
 0x2a1   :  { %13202 = vmatpush3.bf16.msra.mxu1 %v14319_v21  ;;  %v905_v20 = vpack.c.bf16 %v543_v14, %v543_v14  ;;  %v544_v21 = vcombine.high %v542_v15, %v542_v15 }
 0x2a2   :  { %v12917_v23 = vpop.f32.mrf.mxu0  ;;  %10427 = vmatmul.mubr.bf16.vlgmr.msra.gmra.mxu0 %v900_v24  ;;  %13231 = vmatprep.subr.bf16.mxu1 %v14322_v25  ;;  %v906_v25 = vpack.c.bf16 %v542_v15, %v542_v15  ;;  %v14387_v15 = vld [vmem:[%s17854_s1 + $0x17b8] sm:$0xff]  }
 0x2a3   :  { %13210 = vmatpush3.bf16.msra.mxu0 %v14321_v28  ;;  %10506 = vmatprep.mubr.bf16.mxu0 %v905_v20  ;;  %v907_v27 = vpack.c.bf16 %v544_v21, %v544_v21 }
 0x2a4   :  { %v12918_v29 = vpop.f32.mrf.mxu0  ;;  %v12939_v30 = vpop.f32.mrf.mxu1  ;;  %10467 = vmatmul.mubr.bf16.vlgmr.msra.gmra.mxu1 %v902_v31  ;;  %13211 = vmatprep.subr.bf16.mxu0 %v14324_v32  ;;  %v14358_v32 = vld [vmem:[%s17854_s1 + $0x16f0] sm:$0xff]  }
 0x2a5   :  { %v12919_v34 = vadd.f32 %v12918_v29, %v12917_v23  ;;  %13232 = vmatpush3.bf16.msra.mxu1 %v14323_v35  ;;  %v14357_v29 = vld [vmem:[%s17854_s1 + $0x1630] sm:$0xff]   ;;  %10546 = vmatprep.mubr.bf16.mxu1 %v907_v27 }
 0x2a6   :  { %v12920_v36 = vpop.f32.mrf.mxu0  ;;  %v12940_v37 = vpop.f32.mrf.mxu1  ;;  %13233 = vmatprep.subr.bf16.mxu1 %v14326_v38  ;;  %v14359_v35 = vld [vmem:[%s17854_s1 + $0x16b0] sm:$0xff]  }
 0x2a7   :  { %v9949_v39 = vadd.f32 %v12919_v34, %v16769_v54  ;;  %v12941_v40 = vadd.f32 %v12940_v37, %v12939_v30  ;;  %13212 = vmatpush3.bf16.msra.mxu0 %v14325_v41  ;;  %v14333_v54 = vld [vmem:[%s17854_s1 + $0x1520] sm:$0xff]   ;;  %v14360_v37 = vld [vmem:[%s17854_s1 + $0x1668] sm:$0xff]  }
 0x2a8   :  { %v12921_v42 = vpop.f32.mrf.mxu0  ;;  %v12942_v45 = vpop.f32.mrf.mxu1  ;;  %13213 = vmatprep.subr.bf16.mxu0 %v14328_v44  ;;  %v14362_v41 = vld [vmem:[%s17854_s1 + $0x16e8] sm:$0xff]  }
 0x2a9   :  { %v16870_v46 = vadd.f32 %v12941_v40, %v9949_v39  ;;  %13234 = vmatpush3.bf16.msra.mxu1 %v14327_v47  ;;  %v14361_v40 = vld [vmem:[%s17854_s1 + $0x1628] sm:$0xff]   ;;  %v14364_v45 = vld [vmem:[%s17854_s1 + $0x1660] sm:$0xff]  }
 0x2aa   :  { %v12943_v49 = vpop.f32.mrf.mxu1  ;;  %13235 = vmatprep.subr.bf16.mxu1 %v14330_v48  ;;  %v14363_v44 = vld [vmem:[%s17854_s1 + $0x16a8] sm:$0xff]   ;;  %v14366_v47 = vld [vmem:[%s17854_s1 + $0x16e0] sm:$0xff]  }
 0x2ab   :  { %13214 = vmatpush3.bf16.msra.mxu0 %v14329_v50  ;;  %v14367_v48 = vld [vmem:[%s17854_s1 + $0x16a0] sm:$0xff]   ;;  %v14368_v49 = vld [vmem:[%s17854_s1 + $0x1658] sm:$0xff]  }
 0x2ac   :  { %13215 = vmatprep.subr.bf16.mxu0 %v14332_v51  ;;  %v14369_v50 = vld [vmem:[%s17854_s1 + $0x1618] sm:$0xff]  }
 0x2ad   :  { %13236 = vmatpush3.bf16.msra.mxu1 %v14331_v52  ;;  %v14370_v51 = vld [vmem:[%s17854_s1 + $0x16d8] sm:$0xff]  }
 0x2ae   :  { %13237 = vmatprep.subr.bf16.mxu1 %v14334_v53  ;;  %v14371_v52 = vld [vmem:[%s17854_s1 + $0x1698] sm:$0xff]   ;;  %v14372_v53 = vld [vmem:[%s17854_s1 + $0x1650] sm:$0xff]  }
 0x2af   :  { %13216 = vmatpush3.bf16.msra.mxu0 %v14333_v54  ;;  %v14373_v54 = vld [vmem:[%s17854_s1 + $0x1610] sm:$0xff]  }
 0x2b0   :  { %13217 = vmatprep.subr.bf16.mxu0 %v14336_v55  ;;  %v14374_v55 = vld [vmem:[%s17854_s1 + $0x16d0] sm:$0xff]  }
 0x2b1   :  { %13238 = vmatpush3.bf16.msra.mxu1 %v14335_v56  ;;  %v14375_v56 = vld [vmem:[%s17854_s1 + $0x1690] sm:$0xff]  }
 0x2b2   :  { %13239 = vmatprep.subr.bf16.mxu1 %v14338_v57  ;;  %v14376_v57 = vld [vmem:[%s17854_s1 + $0x1648] sm:$0xff]  }
 0x2b3   :  { %13218 = vmatpush3.bf16.msra.mxu0 %v14337_v58  ;;  %v14377_v58 = vld [vmem:[%s17854_s1 + $0x1608] sm:$0xff]  }
 0x2b4   :  { %13219 = vmatprep.subr.bf16.mxu0 %v14340_v59  ;;  %v14378_v59 = vld [vmem:[%s17854_s1 + $0x16c8] sm:$0xff]  }
 0x2b5   :  { %13240 = vmatpush3.bf16.msra.mxu1 %v14339_v60  ;;  %v14380_v60 = vld [vmem:[%s17854_s1 + $0x1640] sm:$0xff]  }
 0x2b6   :  { %13241 = vmatprep.subr.bf16.mxu1 %v14342_v61  ;;  %v38_v61 = vld [vmem:[%s17853_s0 + $0xb0] sm:$0xff] }
 0x2b7   :  { %13220 = vmatpush3.bf16.msra.mxu0 %v14341_v62  ;;  %v14379_v62 = vld [vmem:[%s17854_s1 + $0x1688] sm:$0xff]   ;;  %vm69_vm6 = vcmp.ge.f32.partialorder %v38_v61, 0.0 }
 0x2b8   :  { %13221 = vmatprep.subr.bf16.mxu0 %v14344_v63  ;;  %v100_v63 = vmul.f32 0.01, %v38_v61 }
 0x2b9   :  { %13242 = vmatpush3.bf16.msra.mxu1 %v14343_v0  ;;  %v14382_v0 = vld [vmem:[%s17854_s1 + $0x16c0] sm:$0xff]  }
 0x2ba   :  { %13243 = vmatprep.subr.bf16.mxu1 %v14346_v1  ;;  %v14381_v1 = vld [vmem:[%s17854_s1 + $0x1600] sm:$0xff]  }
 0x2bb   :  { %13222 = vmatpush3.bf16.msra.mxu0 %v14345_v2  ;;  %v131_v2 = vsel %vm69_vm6, %v38_v61, %v100_v63 }
 0x2bc   :  { %13223 = vmatprep.subr.bf16.mxu0 %v14348_v3  ;;  %v552_v3 = vrot.slane %v131_v2, %v14783_v43 }
 0x2bd   :  { %13244 = vmatpush3.bf16.msra.mxu1 %v14347_v5  ;;  %v545_v5 = vcombine.high %v131_v2, %v131_v2 }
 0x2be   :  { %13245 = vmatprep.subr.bf16.mxu1 %v14350_v7  ;;  %v560_v7 = vcombine.high %v552_v3, %v552_v3 }
 0x2bf   :  { %13224 = vmatpush3.bf16.msra.mxu0 %v14349_v8  ;;  %v559_v8 = vrot.slane %v545_v5, %v14783_v43 }
 0x2c0   :  { %13253 = vmatprep.subr.bf16.mxu0 %v14352_v11  ;;  %v908_v11 = vpack.c.bf16 %v552_v3, %v552_v3 }
 0x2c1   :  { %13246 = vmatpush3.bf16.msra.mxu1 %v14351_v13  ;;  %v909_v13 = vpack.c.bf16 %v560_v7, %v560_v7  ;;  %v561_v14 = vcombine.high %v559_v8, %v559_v8  ;;  %v14417_v7 = vld [vmem:[%s17854_s1 + $0x1838] sm:$0xff]  }
 0x2c2   :  { %v12961_v17 = vpop.f32.mrf.mxu0  ;;  %13275 = vmatprep.subr.bf16.mxu1 %v14354_v16  ;;  %10507 = vmatmul.mubr.bf16.vlgmr.msra.gmra.mxu0 %v904_v18  ;;  %v910_v18 = vpack.c.bf16 %v559_v8, %v559_v8 }
 0x2c3   :  { %13254 = vmatpush3.bf16.msra.mxu0 %v14353_v19  ;;  %v14388_v19 = vld [vmem:[%s17854_s1 + $0x1770] sm:$0xff]   ;;  %10586 = vmatprep.mubr.bf16.mxu0 %v909_v13  ;;  %v911_v20 = vpack.c.bf16 %v561_v14, %v561_v14  ;;  %v14419_v14 = vld [vmem:[%s17854_s1 + $0x18b8] sm:$0xff]  }
 0x2c4   :  { %v12962_v23 = vpop.f32.mrf.mxu0  ;;  %v12983_v24 = vpop.f32.mrf.mxu1  ;;  %10547 = vmatmul.mubr.bf16.vlgmr.msra.gmra.mxu1 %v906_v25  ;;  %13255 = vmatprep.subr.bf16.mxu0 %v14356_v26  ;;  %v14390_v25 = vld [vmem:[%s17854_s1 + $0x17f0] sm:$0xff]  }
 0x2c5   :  { %v12963_v28 = vadd.f32 %v12962_v23, %v12961_v17  ;;  %13276 = vmatpush3.bf16.msra.mxu1 %v14355_v22  ;;  %v14389_v22 = vld [vmem:[%s17854_s1 + $0x1730] sm:$0xff]   ;;  %10626 = vmatprep.mubr.bf16.mxu1 %v911_v20 }
 0x2c6   :  { %v12964_v30 = vpop.f32.mrf.mxu0  ;;  %v12984_v31 = vpop.f32.mrf.mxu1  ;;  %13277 = vmatprep.subr.bf16.mxu1 %v14358_v32  ;;  %v14421_v20 = vld [vmem:[%s17854_s1 + $0x1830] sm:$0xff]  }
 0x2c7   :  { %v10029_v33 = vadd.f32 %v12963_v28, %v16870_v46  ;;  %v12985_v34 = vadd.f32 %v12984_v31, %v12983_v24  ;;  %13256 = vmatpush3.bf16.msra.mxu0 %v14357_v29  ;;  %v14365_v46 = vld [vmem:[%s17854_s1 + $0x1620] sm:$0xff]   ;;  %v14391_v28 = vld [vmem:[%s17854_s1 + $0x17b0] sm:$0xff]   ;;  %v14392_v30 = vld [vmem:[%s17854_s1 + $0x1768] sm:$0xff]  }
 0x2c8   :  { %v12965_v36 = vpop.f32.mrf.mxu0  ;;  %v12986_v38 = vpop.f32.mrf.mxu1  ;;  %13257 = vmatprep.subr.bf16.mxu0 %v14360_v37  ;;  %v14396_v37 = vld [vmem:[%s17854_s1 + $0x1760] sm:$0xff]  }
 0x2c9   :  { %v16977_v39 = vadd.f32 %v12985_v34, %v10029_v33  ;;  %13278 = vmatpush3.bf16.msra.mxu1 %v14359_v35  ;;  %v14393_v33 = vld [vmem:[%s17854_s1 + $0x1728] sm:$0xff]   ;;  %v14397_v38 = vld [vmem:[%s17854_s1 + $0x1720] sm:$0xff]  }
 0x2ca   :  { %v12987_v42 = vpop.f32.mrf.mxu1  ;;  %13279 = vmatprep.subr.bf16.mxu1 %v14362_v41  ;;  %v14394_v34 = vld [vmem:[%s17854_s1 + $0x17e8] sm:$0xff]   ;;  %v14400_v41 = vld [vmem:[%s17854_s1 + $0x1758] sm:$0xff]  }
 0x2cb   :  { %13258 = vmatpush3.bf16.msra.mxu0 %v14361_v40  ;;  %v14395_v36 = vld [vmem:[%s17854_s1 + $0x17a8] sm:$0xff]   ;;  %v14399_v40 = vld [vmem:[%s17854_s1 + $0x17a0] sm:$0xff]   ;;  %v14401_v42 = vld [vmem:[%s17854_s1 + $0x1718] sm:$0xff]  }
 0x2cc   :  { %13259 = vmatprep.subr.bf16.mxu0 %v14364_v45  ;;  %v14403_v45 = vld [vmem:[%s17854_s1 + $0x1798] sm:$0xff]  }
 0x2cd   :  { %13280 = vmatpush3.bf16.msra.mxu1 %v14363_v44  ;;  %v14402_v44 = vld [vmem:[%s17854_s1 + $0x17d8] sm:$0xff]  }
 0x2ce   :  { %13281 = vmatprep.subr.bf16.mxu1 %v14366_v47  ;;  %v14405_v47 = vld [vmem:[%s17854_s1 + $0x1710] sm:$0xff]  }
 0x2cf   :  { %13260 = vmatpush3.bf16.msra.mxu0 %v14365_v46  ;;  %v14404_v46 = vld [vmem:[%s17854_s1 + $0x1750] sm:$0xff]  }
 0x2d0   :  { %13261 = vmatprep.subr.bf16.mxu0 %v14368_v49  ;;  %v14407_v49 = vld [vmem:[%s17854_s1 + $0x1790] sm:$0xff]  }
 0x2d1   :  { %13282 = vmatpush3.bf16.msra.mxu1 %v14367_v48  ;;  %v14406_v48 = vld [vmem:[%s17854_s1 + $0x17d0] sm:$0xff]  }
 0x2d2   :  { %13283 = vmatprep.subr.bf16.mxu1 %v14370_v51  ;;  %v14409_v51 = vld [vmem:[%s17854_s1 + $0x1708] sm:$0xff]  }
 0x2d3   :  { %13262 = vmatpush3.bf16.msra.mxu0 %v14369_v50  ;;  %v14408_v50 = vld [vmem:[%s17854_s1 + $0x1748] sm:$0xff]  }
 0x2d4   :  { %13263 = vmatprep.subr.bf16.mxu0 %v14372_v53  ;;  %v14411_v53 = vld [vmem:[%s17854_s1 + $0x1788] sm:$0xff]  }
 0x2d5   :  { %13284 = vmatpush3.bf16.msra.mxu1 %v14371_v52  ;;  %v14410_v52 = vld [vmem:[%s17854_s1 + $0x17c8] sm:$0xff]  }
 0x2d6   :  { %13285 = vmatprep.subr.bf16.mxu1 %v14374_v55  ;;  %v14412_v55 = vld [vmem:[%s17854_s1 + $0x1740] sm:$0xff]  }
 0x2d7   :  { %13264 = vmatpush3.bf16.msra.mxu0 %v14373_v54  ;;  %v39_v54 = vld [vmem:[%s17853_s0 + $0xb8] sm:$0xff] }
 0x2d8   :  { %13265 = vmatprep.subr.bf16.mxu0 %v14376_v57  ;;  %vm70_vm7 = vcmp.ge.f32.partialorder %v39_v54, 0.0  ;;  %v14414_v57 = vld [vmem:[%s17854_s1 + $0x17c0] sm:$0xff]  }
 0x2d9   :  { %13286 = vmatpush3.bf16.msra.mxu1 %v14375_v56  ;;  %v101_v56 = vmul.f32 0.01, %v39_v54 }
 0x2da   :  { %13287 = vmatprep.subr.bf16.mxu1 %v14378_v59  ;;  %v14413_v59 = vld [vmem:[%s17854_s1 + $0x1700] sm:$0xff]  }
 0x2db   :  { %13266 = vmatpush3.bf16.msra.mxu0 %v14377_v58  ;;  %v132_v58 = vsel %vm70_vm7, %v39_v54, %v101_v56  ;;  %v14448_v54 = vld [vmem:[%s17854_s1 + $0x1978] sm:$0xff]   ;;  %v14447_v56 = vld [vmem:[%s17854_s1 + $0x1880] sm:$0xff]  }
 0x2dc   :  { %13267 = vmatprep.subr.bf16.mxu0 %v14380_v60  ;;  %v569_v60 = vrot.slane %v132_v58, %v14783_v43  ;;  %v562_v61 = vcombine.high %v132_v58, %v132_v58 }
 0x2dd   :  { %13288 = vmatpush3.bf16.msra.mxu1 %v14379_v62  ;;  %v14416_v62 = vld [vmem:[%s17854_s1 + $0x1878] sm:$0xff]  }
 0x2de   :  { %13289 = vmatprep.subr.bf16.mxu1 %v14382_v0  ;;  %v577_v63 = vcombine.high %v569_v60, %v569_v60  ;;  %v14415_v0 = vld [vmem:[%s17854_s1 + $0x1780] sm:$0xff]   ;;  %v912_v3 = vpack.c.bf16 %v569_v60, %v569_v60 }
 0x2df   :  { %13268 = vmatpush3.bf16.msra.mxu0 %v14381_v1  ;;  %v576_v1 = vrot.slane %v562_v61, %v14783_v43 }
 0x2e0   :  { %13297 = vmatprep.subr.bf16.mxu0 %v14384_v4  ;;  %v14418_v4 = vld [vmem:[%s17854_s1 + $0x18f8] sm:$0xff]   ;;  %v913_v5 = vpack.c.bf16 %v577_v63, %v577_v63 }
 0x2e1   :  { %13290 = vmatpush3.bf16.msra.mxu1 %v14383_v6  ;;  %v578_v6 = vcombine.high %v576_v1, %v576_v1 }
 0x2e2   :  { %v13005_v10 = vpop.f32.mrf.mxu0  ;;  %13319 = vmatprep.subr.bf16.mxu1 %v14386_v9  ;;  %10587 = vmatmul.mubr.bf16.vlgmr.msra.gmra.mxu0 %v908_v11  ;;  %v14420_v11 = vld [vmem:[%s17854_s1 + $0x1870] sm:$0xff]  }
 0x2e3   :  { %13298 = vmatpush3.bf16.msra.mxu0 %v14385_v12  ;;  %10666 = vmatprep.mubr.bf16.mxu0 %v913_v5  ;;  %v915_v12 = vpack.c.bf16 %v578_v6, %v578_v6  ;;  %v14452_v5 = vld [vmem:[%s17854_s1 + $0x1970] sm:$0xff]  }
 0x2e4   :  { %v13006_v16 = vpop.f32.mrf.mxu0  ;;  %v13027_v17 = vpop.f32.mrf.mxu1  ;;  %10627 = vmatmul.mubr.bf16.vlgmr.msra.gmra.mxu1 %v910_v18  ;;  %13299 = vmatprep.subr.bf16.mxu0 %v14388_v19 }
 0x2e5   :  { %v13007_v21 = vadd.f32 %v13006_v16, %v13005_v10  ;;  %13320 = vmatpush3.bf16.msra.mxu1 %v14387_v15  ;;  %v914_v10 = vpack.c.bf16 %v576_v1, %v576_v1  ;;  %10706 = vmatprep.mubr.bf16.mxu1 %v915_v12  ;;  %v14451_v1 = vld [vmem:[%s17854_s1 + $0x19b8] sm:$0xff]  }
 0x2e6   :  { %v13008_v23 = vpop.f32.mrf.mxu0  ;;  %v13028_v24 = vpop.f32.mrf.mxu1  ;;  %13321 = vmatprep.subr.bf16.mxu1 %v14390_v25  ;;  %v14423_v25 = vld [vmem:[%s17854_s1 + $0x18b0] sm:$0xff]  }
 0x2e7   :  { %v10109_v26 = vadd.f32 %v13007_v21, %v16977_v39  ;;  %v13029_v27 = vadd.f32 %v13028_v24, %v13027_v17  ;;  %13300 = vmatpush3.bf16.msra.mxu0 %v14389_v22  ;;  %v14398_v39 = vld [vmem:[%s17854_s1 + $0x17e0] sm:$0xff]   ;;  %v14422_v17 = vld [vmem:[%s17854_s1 + $0x18f0] sm:$0xff]   ;;  %v14424_v22 = vld [vmem:[%s17854_s1 + $0x1868] sm:$0xff]  }
 0x2e8   :  { %v13009_v29 = vpop.f32.mrf.mxu0  ;;  %v13030_v31 = vpop.f32.mrf.mxu1  ;;  %13301 = vmatprep.subr.bf16.mxu0 %v14392_v30  ;;  %v14427_v30 = vld [vmem:[%s17854_s1 + $0x18a8] sm:$0xff]  }
 0x2e9   :  { %v17081_v32 = vadd.f32 %v13029_v27, %v10109_v26  ;;  %13322 = vmatpush3.bf16.msra.mxu1 %v14391_v28  ;;  %v14426_v26 = vld [vmem:[%s17854_s1 + $0x18e8] sm:$0xff]   ;;  %v14428_v29 = vld [vmem:[%s17854_s1 + $0x1860] sm:$0xff]  }
 0x2ea   :  { %v13031_v35 = vpop.f32.mrf.mxu1  ;;  %13323 = vmatprep.subr.bf16.mxu1 %v14394_v34  ;;  %v14425_v28 = vld [vmem:[%s17854_s1 + $0x1828] sm:$0xff]   ;;  %v14430_v31 = vld [vmem:[%s17854_s1 + $0x18e0] sm:$0xff]  }
 0x2eb   :  { %13302 = vmatpush3.bf16.msra.mxu0 %v14393_v33  ;;  %v14432_v33 = vld [vmem:[%s17854_s1 + $0x1858] sm:$0xff]   ;;  %v14431_v34 = vld [vmem:[%s17854_s1 + $0x18a0] sm:$0xff]  }
 0x2ec   :  { %13303 = vmatprep.subr.bf16.mxu0 %v14396_v37  ;;  %v14434_v35 = vld [vmem:[%s17854_s1 + $0x18d8] sm:$0xff]   ;;  %v14436_v37 = vld [vmem:[%s17854_s1 + $0x1850] sm:$0xff]  }
 0x2ed   :  { %13324 = vmatpush3.bf16.msra.mxu1 %v14395_v36  ;;  %v14433_v36 = vld [vmem:[%s17854_s1 + $0x1818] sm:$0xff]  }
 0x2ee   :  { %13325 = vmatprep.subr.bf16.mxu1 %v14398_v39  ;;  %v14438_v39 = vld [vmem:[%s17854_s1 + $0x18d0] sm:$0xff]  }
 0x2ef   :  { %13304 = vmatpush3.bf16.msra.mxu0 %v14397_v38  ;;  %v14435_v38 = vld [vmem:[%s17854_s1 + $0x1898] sm:$0xff]  }
 0x2f0   :  { %13305 = vmatprep.subr.bf16.mxu0 %v14400_v41  ;;  %v14440_v41 = vld [vmem:[%s17854_s1 + $0x1848] sm:$0xff]  }
 0x2f1   :  { %13326 = vmatpush3.bf16.msra.mxu1 %v14399_v40  ;;  %v14437_v40 = vld [vmem:[%s17854_s1 + $0x1810] sm:$0xff]  }
 0x2f2   :  { %13327 = vmatprep.subr.bf16.mxu1 %v14402_v44  ;;  %v14442_v44 = vld [vmem:[%s17854_s1 + $0x18c8] sm:$0xff]  }
 0x2f3   :  { %13306 = vmatpush3.bf16.msra.mxu0 %v14401_v42  ;;  %v14439_v42 = vld [vmem:[%s17854_s1 + $0x1890] sm:$0xff]  }
 0x2f4   :  { %13307 = vmatprep.subr.bf16.mxu0 %v14404_v46  ;;  %v14444_v46 = vld [vmem:[%s17854_s1 + $0x1840] sm:$0xff]  }
 0x2f5   :  { %13328 = vmatpush3.bf16.msra.mxu1 %v14403_v45  ;;  %v14441_v45 = vld [vmem:[%s17854_s1 + $0x1808] sm:$0xff]  }
 0x2f6   :  { %13329 = vmatprep.subr.bf16.mxu1 %v14406_v48  ;;  %v14443_v48 = vld [vmem:[%s17854_s1 + $0x1888] sm:$0xff]  }
 0x2f7   :  { %13308 = vmatpush3.bf16.msra.mxu0 %v14405_v47  ;;  %v40_v47 = vld [vmem:[%s17853_s0 + $0xc0] sm:$0xff] }
 0x2f8   :  { %13309 = vmatprep.subr.bf16.mxu0 %v14408_v50  ;;  %vm71_vm8 = vcmp.ge.f32.partialorder %v40_v47, 0.0  ;;  %v14446_v50 = vld [vmem:[%s17854_s1 + $0x18c0] sm:$0xff]  }
 0x2f9   :  { %13330 = vmatpush3.bf16.msra.mxu1 %v14407_v49  ;;  %v102_v49 = vmul.f32 0.01, %v40_v47 }
 0x2fa   :  { %13331 = vmatprep.subr.bf16.mxu1 %v14410_v52 }
 0x2fb   :  { %13310 = vmatpush3.bf16.msra.mxu0 %v14409_v51  ;;  %v14445_v51 = vld [vmem:[%s17854_s1 + $0x1800] sm:$0xff]   ;;  %v133_v52 = vsel %vm71_vm8, %v40_v47, %v102_v49  ;;  %v14480_v47 = vld [vmem:[%s17854_s1 + $0x1a78] sm:$0xff]  }
 0x2fc   :  { %13311 = vmatprep.subr.bf16.mxu0 %v14412_v55  ;;  %v579_v55 = vcombine.high %v133_v52, %v133_v52  ;;  %v14479_v49 = vld [vmem:[%s17854_s1 + $0x1980] sm:$0xff]  }
 0x2fd   :  { %13332 = vmatpush3.bf16.msra.mxu1 %v14411_v53  ;;  %v586_v53 = vrot.slane %v133_v52, %v14783_v43  ;;  %v14482_v52 = vld [vmem:[%s17854_s1 + $0x1af8] sm:$0xff]  }
 0x2fe   :  { %13333 = vmatprep.subr.bf16.mxu1 %v14414_v57  ;;  %v593_v58 = vrot.slane %v579_v55, %v14783_v43  ;;  %v14481_v55 = vld [vmem:[%s17854_s1 + $0x1a38] sm:$0xff]  }
 0x2ff   :  { %13312 = vmatpush3.bf16.msra.mxu0 %v14413_v59  ;;  %v594_v57 = vcombine.high %v586_v53, %v586_v53  ;;  %v14450_v59 = vld [vmem:[%s17854_s1 + $0x19f8] sm:$0xff]   ;;  %v916_v61 = vpack.c.bf16 %v586_v53, %v586_v53 }
 0x300   :  { %13341 = vmatprep.subr.bf16.mxu0 %v14416_v62  ;;  %v14449_v62 = vld [vmem:[%s17854_s1 + $0x1938] sm:$0xff]  }
 0x301   :  { %13334 = vmatpush3.bf16.msra.mxu1 %v14415_v0  ;;  %v917_v63 = vpack.c.bf16 %v594_v57, %v594_v57  ;;  %v595_v0 = vcombine.high %v593_v58, %v593_v58 }
 0x302   :  { %v13049_v2 = vpop.f32.mrf.mxu0  ;;  %10667 = vmatmul.mubr.bf16.vlgmr.msra.gmra.mxu0 %v912_v3  ;;  %13363 = vmatprep.subr.bf16.mxu1 %v14418_v4  ;;  %v918_v4 = vpack.c.bf16 %v593_v58, %v593_v58  ;;  %v14483_v58 = vld [vmem:[%s17854_s1 + $0x1ab8] sm:$0xff]  }
 0x303   :  { %13342 = vmatpush3.bf16.msra.mxu0 %v14417_v7  ;;  %10746 = vmatprep.mubr.bf16.mxu0 %v917_v63  ;;  %v919_v6 = vpack.c.bf16 %v595_v0, %v595_v0 }
 0x304   :  { %v13050_v8 = vpop.f32.mrf.mxu0  ;;  %v13071_v9 = vpop.f32.mrf.mxu1  ;;  %10707 = vmatmul.mubr.bf16.vlgmr.msra.gmra.mxu1 %v914_v10  ;;  %13343 = vmatprep.subr.bf16.mxu0 %v14420_v11  ;;  %v14454_v11 = vld [vmem:[%s17854_s1 + $0x19f0] sm:$0xff]  }
 0x305   :  { %v13051_v13 = vadd.f32 %v13050_v8, %v13049_v2  ;;  %13364 = vmatpush3.bf16.msra.mxu1 %v14419_v14  ;;  %v14453_v8 = vld [vmem:[%s17854_s1 + $0x1930] sm:$0xff]   ;;  %10786 = vmatprep.mubr.bf16.mxu1 %v919_v6 }
 0x306   :  { %v13052_v15 = vpop.f32.mrf.mxu0  ;;  %v13072_v16 = vpop.f32.mrf.mxu1  ;;  %13365 = vmatprep.subr.bf16.mxu1 %v14422_v17  ;;  %v14455_v14 = vld [vmem:[%s17854_s1 + $0x19b0] sm:$0xff]  }
 0x307   :  { %v10189_v18 = vadd.f32 %v13051_v13, %v17081_v32  ;;  %v13073_v19 = vadd.f32 %v13072_v16, %v13071_v9  ;;  %13344 = vmatpush3.bf16.msra.mxu0 %v14421_v20  ;;  %v14429_v32 = vld [vmem:[%s17854_s1 + $0x1820] sm:$0xff]   ;;  %v14456_v16 = vld [vmem:[%s17854_s1 + $0x1968] sm:$0xff]  }
 0x308   :  { %v13053_v21 = vpop.f32.mrf.mxu0  ;;  %v13074_v23 = vpop.f32.mrf.mxu1  ;;  %13345 = vmatprep.subr.bf16.mxu0 %v14424_v22  ;;  %v14458_v20 = vld [vmem:[%s17854_s1 + $0x19e8] sm:$0xff]  }
 0x309   :  { %v17182_v24 = vadd.f32 %v13073_v19, %v10189_v18  ;;  %13366 = vmatpush3.bf16.msra.mxu1 %v14423_v25  ;;  %v14457_v19 = vld [vmem:[%s17854_s1 + $0x1928] sm:$0xff]   ;;  %v14460_v23 = vld [vmem:[%s17854_s1 + $0x1960] sm:$0xff]  }
 0x30a   :  { %v13075_v27 = vpop.f32.mrf.mxu1  ;;  %13367 = vmatprep.subr.bf16.mxu1 %v14426_v26  ;;  %v14459_v22 = vld [vmem:[%s17854_s1 + $0x19a8] sm:$0xff]   ;;  %v14462_v25 = vld [vmem:[%s17854_s1 + $0x19e0] sm:$0xff]  }
 0x30b   :  { %13346 = vmatpush3.bf16.msra.mxu0 %v14425_v28  ;;  %v14463_v26 = vld [vmem:[%s17854_s1 + $0x19a0] sm:$0xff]   ;;  %v14464_v27 = vld [vmem:[%s17854_s1 + $0x1958] sm:$0xff]  }
 0x30c   :  { %13347 = vmatprep.subr.bf16.mxu0 %v14428_v29  ;;  %v14465_v28 = vld [vmem:[%s17854_s1 + $0x1918] sm:$0xff]  }
 0x30d   :  { %13368 = vmatpush3.bf16.msra.mxu1 %v14427_v30  ;;  %v14466_v29 = vld [vmem:[%s17854_s1 + $0x19d8] sm:$0xff]  }
 0x30e   :  { %13369 = vmatprep.subr.bf16.mxu1 %v14430_v31  ;;  %v14467_v30 = vld [vmem:[%s17854_s1 + $0x1998] sm:$0xff]   ;;  %v14468_v31 = vld [vmem:[%s17854_s1 + $0x1950] sm:$0xff]  }
 0x30f   :  { %13348 = vmatpush3.bf16.msra.mxu0 %v14429_v32  ;;  %v14469_v32 = vld [vmem:[%s17854_s1 + $0x1910] sm:$0xff]  }
 0x310   :  { %13349 = vmatprep.subr.bf16.mxu0 %v14432_v33  ;;  %v14470_v33 = vld [vmem:[%s17854_s1 + $0x19d0] sm:$0xff]  }
 0x311   :  { %13370 = vmatpush3.bf16.msra.mxu1 %v14431_v34  ;;  %v14471_v34 = vld [vmem:[%s17854_s1 + $0x1990] sm:$0xff]  }
 0x312   :  { %13371 = vmatprep.subr.bf16.mxu1 %v14434_v35  ;;  %v14472_v35 = vld [vmem:[%s17854_s1 + $0x1948] sm:$0xff]  }
 0x313   :  { %13350 = vmatpush3.bf16.msra.mxu0 %v14433_v36  ;;  %v14473_v36 = vld [vmem:[%s17854_s1 + $0x1908] sm:$0xff]  }
 0x314   :  { %13351 = vmatprep.subr.bf16.mxu0 %v14436_v37  ;;  %v14474_v37 = vld [vmem:[%s17854_s1 + $0x19c8] sm:$0xff]  }
 0x315   :  { %13372 = vmatpush3.bf16.msra.mxu1 %v14435_v38  ;;  %v14476_v38 = vld [vmem:[%s17854_s1 + $0x1940] sm:$0xff]  }
 0x316   :  { %13373 = vmatprep.subr.bf16.mxu1 %v14438_v39  ;;  %v41_v39 = vld [vmem:[%s17853_s0 + $0xc8] sm:$0xff] }
 0x317   :  { %13352 = vmatpush3.bf16.msra.mxu0 %v14437_v40  ;;  %v14475_v40 = vld [vmem:[%s17854_s1 + $0x1988] sm:$0xff]   ;;  %vm72_vm9 = vcmp.ge.f32.partialorder %v41_v39, 0.0 }
 0x318   :  { %13353 = vmatprep.subr.bf16.mxu0 %v14440_v41  ;;  %v103_v41 = vmul.f32 0.01, %v41_v39 }
 0x319   :  { %13374 = vmatpush3.bf16.msra.mxu1 %v14439_v42  ;;  %v14478_v42 = vld [vmem:[%s17854_s1 + $0x19c0] sm:$0xff]  }
 0x31a   :  { %13375 = vmatprep.subr.bf16.mxu1 %v14442_v44  ;;  %v14477_v44 = vld [vmem:[%s17854_s1 + $0x1900] sm:$0xff]  }
 0x31b   :  { %13354 = vmatpush3.bf16.msra.mxu0 %v14441_v45  ;;  %v134_v45 = vsel %vm72_vm9, %v41_v39, %v103_v41 }
 0x31c   :  { %13355 = vmatprep.subr.bf16.mxu0 %v14444_v46  ;;  %v603_v46 = vrot.slane %v134_v45, %v14783_v43 }
 0x31d   :  { %13376 = vmatpush3.bf16.msra.mxu1 %v14443_v48  ;;  %v596_v48 = vcombine.high %v134_v45, %v134_v45 }
 0x31e   :  { %13377 = vmatprep.subr.bf16.mxu1 %v14446_v50  ;;  %v611_v50 = vcombine.high %v603_v46, %v603_v46 }
 0x31f   :  { %13356 = vmatpush3.bf16.msra.mxu0 %v14445_v51  ;;  %v610_v51 = vrot.slane %v596_v48, %v14783_v43 }
 0x320   :  { %13385 = vmatprep.subr.bf16.mxu0 %v14448_v54  ;;  %v920_v54 = vpack.c.bf16 %v603_v46, %v603_v46 }
 0x321   :  { %13378 = vmatpush3.bf16.msra.mxu1 %v14447_v56  ;;  %v921_v56 = vpack.c.bf16 %v611_v50, %v611_v50  ;;  %v612_v57 = vcombine.high %v610_v51, %v610_v51  ;;  %v14513_v50 = vld [vmem:[%s17854_s1 + $0x1b38] sm:$0xff]  }
 0x322   :  { %v13093_v60 = vpop.f32.mrf.mxu0  ;;  %13407 = vmatprep.subr.bf16.mxu1 %v14450_v59  ;;  %10747 = vmatmul.mubr.bf16.vlgmr.msra.gmra.mxu0 %v916_v61  ;;  %v922_v61 = vpack.c.bf16 %v610_v51, %v610_v51 }
 0x323   :  { %13386 = vmatpush3.bf16.msra.mxu0 %v14449_v62  ;;  %v14484_v62 = vld [vmem:[%s17854_s1 + $0x1a70] sm:$0xff]   ;;  %10826 = vmatprep.mubr.bf16.mxu0 %v921_v56  ;;  %v923_v63 = vpack.c.bf16 %v612_v57, %v612_v57  ;;  %v14515_v57 = vld [vmem:[%s17854_s1 + $0x1bb8] sm:$0xff]  }
 0x324   :  { %v13094_v2 = vpop.f32.mrf.mxu0  ;;  %v13115_v3 = vpop.f32.mrf.mxu1  ;;  %10787 = vmatmul.mubr.bf16.vlgmr.msra.gmra.mxu1 %v918_v4  ;;  %13387 = vmatprep.subr.bf16.mxu0 %v14452_v5  ;;  %v14486_v4 = vld [vmem:[%s17854_s1 + $0x1af0] sm:$0xff]  }
 0x325   :  { %v13095_v7 = vadd.f32 %v13094_v2, %v13093_v60  ;;  %13408 = vmatpush3.bf16.msra.mxu1 %v14451_v1  ;;  %v14485_v1 = vld [vmem:[%s17854_s1 + $0x1a30] sm:$0xff]   ;;  %10866 = vmatprep.mubr.bf16.mxu1 %v923_v63 }
 0x326   :  { %v13096_v9 = vpop.f32.mrf.mxu0  ;;  %v13116_v10 = vpop.f32.mrf.mxu1  ;;  %13409 = vmatprep.subr.bf16.mxu1 %v14454_v11  ;;  %v14517_v63 = vld [vmem:[%s17854_s1 + $0x1b30] sm:$0xff]  }
 0x327   :  { %v10269_v12 = vadd.f32 %v13095_v7, %v17182_v24  ;;  %v13117_v13 = vadd.f32 %v13116_v10, %v13115_v3  ;;  %13388 = vmatpush3.bf16.msra.mxu0 %v14453_v8  ;;  %v14461_v24 = vld [vmem:[%s17854_s1 + $0x1920] sm:$0xff]   ;;  %v14487_v7 = vld [vmem:[%s17854_s1 + $0x1ab0] sm:$0xff]   ;;  %v14488_v9 = vld [vmem:[%s17854_s1 + $0x1a68] sm:$0xff]  }
 0x328   :  { %v13097_v15 = vpop.f32.mrf.mxu0  ;;  %v13118_v17 = vpop.f32.mrf.mxu1  ;;  %13389 = vmatprep.subr.bf16.mxu0 %v14456_v16  ;;  %v14492_v16 = vld [vmem:[%s17854_s1 + $0x1a60] sm:$0xff]  }
 0x329   :  { %v17289_v18 = vadd.f32 %v13117_v13, %v10269_v12  ;;  %13410 = vmatpush3.bf16.msra.mxu1 %v14455_v14  ;;  %v14489_v12 = vld [vmem:[%s17854_s1 + $0x1a28] sm:$0xff]   ;;  %v14493_v17 = vld [vmem:[%s17854_s1 + $0x1a20] sm:$0xff]  }
 0x32a   :  { %v13119_v21 = vpop.f32.mrf.mxu1  ;;  %13411 = vmatprep.subr.bf16.mxu1 %v14458_v20  ;;  %v14490_v13 = vld [vmem:[%s17854_s1 + $0x1ae8] sm:$0xff]   ;;  %v14496_v20 = vld [vmem:[%s17854_s1 + $0x1a58] sm:$0xff]  }
 0x32b   :  { %13390 = vmatpush3.bf16.msra.mxu0 %v14457_v19  ;;  %v14491_v15 = vld [vmem:[%s17854_s1 + $0x1aa8] sm:$0xff]   ;;  %v14495_v19 = vld [vmem:[%s17854_s1 + $0x1aa0] sm:$0xff]   ;;  %v14497_v21 = vld [vmem:[%s17854_s1 + $0x1a18] sm:$0xff]  }
 0x32c   :  { %13391 = vmatprep.subr.bf16.mxu0 %v14460_v23  ;;  %v14499_v23 = vld [vmem:[%s17854_s1 + $0x1a98] sm:$0xff]  }
 0x32d   :  { %13412 = vmatpush3.bf16.msra.mxu1 %v14459_v22  ;;  %v14498_v22 = vld [vmem:[%s17854_s1 + $0x1ad8] sm:$0xff]  }
 0x32e   :  { %13413 = vmatprep.subr.bf16.mxu1 %v14462_v25  ;;  %v14501_v25 = vld [vmem:[%s17854_s1 + $0x1a10] sm:$0xff]  }
 0x32f   :  { %13392 = vmatpush3.bf16.msra.mxu0 %v14461_v24  ;;  %v14500_v24 = vld [vmem:[%s17854_s1 + $0x1a50] sm:$0xff]  }
 0x330   :  { %13393 = vmatprep.subr.bf16.mxu0 %v14464_v27  ;;  %v14503_v27 = vld [vmem:[%s17854_s1 + $0x1a90] sm:$0xff]  }
 0x331   :  { %13414 = vmatpush3.bf16.msra.mxu1 %v14463_v26  ;;  %v14502_v26 = vld [vmem:[%s17854_s1 + $0x1ad0] sm:$0xff]  }
 0x332   :  { %13415 = vmatprep.subr.bf16.mxu1 %v14466_v29  ;;  %v14505_v29 = vld [vmem:[%s17854_s1 + $0x1a08] sm:$0xff]  }
 0x333   :  { %13394 = vmatpush3.bf16.msra.mxu0 %v14465_v28  ;;  %v14504_v28 = vld [vmem:[%s17854_s1 + $0x1a48] sm:$0xff]  }
 0x334   :  { %13395 = vmatprep.subr.bf16.mxu0 %v14468_v31  ;;  %v14507_v31 = vld [vmem:[%s17854_s1 + $0x1a88] sm:$0xff]  }
 0x335   :  { %13416 = vmatpush3.bf16.msra.mxu1 %v14467_v30  ;;  %v14506_v30 = vld [vmem:[%s17854_s1 + $0x1ac8] sm:$0xff]  }
 0x336   :  { %13417 = vmatprep.subr.bf16.mxu1 %v14470_v33  ;;  %v14508_v33 = vld [vmem:[%s17854_s1 + $0x1a40] sm:$0xff]  }
 0x337   :  { %13396 = vmatpush3.bf16.msra.mxu0 %v14469_v32  ;;  %v42_v32 = vld [vmem:[%s17853_s0 + $0xd0] sm:$0xff] }
 0x338   :  { %13397 = vmatprep.subr.bf16.mxu0 %v14472_v35  ;;  %vm73_vm10 = vcmp.ge.f32.partialorder %v42_v32, 0.0  ;;  %v14510_v35 = vld [vmem:[%s17854_s1 + $0x1ac0] sm:$0xff]  }
 0x339   :  { %13418 = vmatpush3.bf16.msra.mxu1 %v14471_v34  ;;  %v104_v34 = vmul.f32 0.01, %v42_v32 }
 0x33a   :  { %13419 = vmatprep.subr.bf16.mxu1 %v14474_v37  ;;  %v14509_v37 = vld [vmem:[%s17854_s1 + $0x1a00] sm:$0xff]  }
 0x33b   :  { %13398 = vmatpush3.bf16.msra.mxu0 %v14473_v36  ;;  %v135_v36 = vsel %vm73_vm10, %v42_v32, %v104_v34  ;;  %v14544_v32 = vld [vmem:[%s17854_s1 + $0x1c78] sm:$0xff]   ;;  %v14543_v34 = vld [vmem:[%s17854_s1 + $0x1b80] sm:$0xff]  }
 0x33c   :  { %13399 = vmatprep.subr.bf16.mxu0 %v14476_v38  ;;  %v620_v38 = vrot.slane %v135_v36, %v14783_v43  ;;  %v613_v39 = vcombine.high %v135_v36, %v135_v36 }
 0x33d   :  { %13420 = vmatpush3.bf16.msra.mxu1 %v14475_v40  ;;  %v14512_v40 = vld [vmem:[%s17854_s1 + $0x1b78] sm:$0xff]  }
 0x33e   :  { %13421 = vmatprep.subr.bf16.mxu1 %v14478_v42  ;;  %v628_v41 = vcombine.high %v620_v38, %v620_v38  ;;  %v14511_v42 = vld [vmem:[%s17854_s1 + $0x1a80] sm:$0xff]   ;;  %v924_v46 = vpack.c.bf16 %v620_v38, %v620_v38 }
 0x33f   :  { %13400 = vmatpush3.bf16.msra.mxu0 %v14477_v44  ;;  %v627_v44 = vrot.slane %v613_v39, %v14783_v43 }
 0x340   :  { %13429 = vmatprep.subr.bf16.mxu0 %v14480_v47  ;;  %v14514_v47 = vld [vmem:[%s17854_s1 + $0x1bf8] sm:$0xff]   ;;  %v925_v48 = vpack.c.bf16 %v628_v41, %v628_v41 }
 0x341   :  { %13422 = vmatpush3.bf16.msra.mxu1 %v14479_v49  ;;  %v629_v49 = vcombine.high %v627_v44, %v627_v44 }
 0x342   :  { %v13137_v53 = vpop.f32.mrf.mxu0  ;;  %13451 = vmatprep.subr.bf16.mxu1 %v14482_v52  ;;  %10827 = vmatmul.mubr.bf16.vlgmr.msra.gmra.mxu0 %v920_v54  ;;  %v14516_v54 = vld [vmem:[%s17854_s1 + $0x1b70] sm:$0xff]  }
 0x343   :  { %13430 = vmatpush3.bf16.msra.mxu0 %v14481_v55  ;;  %10906 = vmatprep.mubr.bf16.mxu0 %v925_v48  ;;  %v927_v55 = vpack.c.bf16 %v629_v49, %v629_v49  ;;  %v14548_v48 = vld [vmem:[%s17854_s1 + $0x1c70] sm:$0xff]  }
 0x344   :  { %v13138_v59 = vpop.f32.mrf.mxu0  ;;  %v13159_v60 = vpop.f32.mrf.mxu1  ;;  %10867 = vmatmul.mubr.bf16.vlgmr.msra.gmra.mxu1 %v922_v61  ;;  %13431 = vmatprep.subr.bf16.mxu0 %v14484_v62 }
 0x345   :  { %v13139_v0 = vadd.f32 %v13138_v59, %v13137_v53  ;;  %13452 = vmatpush3.bf16.msra.mxu1 %v14483_v58  ;;  %v926_v53 = vpack.c.bf16 %v627_v44, %v627_v44  ;;  %10946 = vmatprep.mubr.bf16.mxu1 %v927_v55  ;;  %v14547_v44 = vld [vmem:[%s17854_s1 + $0x1cb8] sm:$0xff]  }
 0x346   :  { %v13140_v2 = vpop.f32.mrf.mxu0  ;;  %v13160_v3 = vpop.f32.mrf.mxu1  ;;  %13453 = vmatprep.subr.bf16.mxu1 %v14486_v4  ;;  %v14519_v4 = vld [vmem:[%s17854_s1 + $0x1bb0] sm:$0xff]  }
 0x347   :  { %v10349_v5 = vadd.f32 %v13139_v0, %v17289_v18  ;;  %v13161_v6 = vadd.f32 %v13160_v3, %v13159_v60  ;;  %13432 = vmatpush3.bf16.msra.mxu0 %v14485_v1  ;;  %v14494_v18 = vld [vmem:[%s17854_s1 + $0x1ae0] sm:$0xff]   ;;  %v14518_v60 = vld [vmem:[%s17854_s1 + $0x1bf0] sm:$0xff]   ;;  %v14520_v1 = vld [vmem:[%s17854_s1 + $0x1b68] sm:$0xff]  }
 0x348   :  { %v13141_v8 = vpop.f32.mrf.mxu0  ;;  %v13162_v10 = vpop.f32.mrf.mxu1  ;;  %13433 = vmatprep.subr.bf16.mxu0 %v14488_v9  ;;  %v14523_v9 = vld [vmem:[%s17854_s1 + $0x1ba8] sm:$0xff]  }
 0x349   :  { %v17393_v11 = vadd.f32 %v13161_v6, %v10349_v5  ;;  %13454 = vmatpush3.bf16.msra.mxu1 %v14487_v7  ;;  %v14522_v5 = vld [vmem:[%s17854_s1 + $0x1be8] sm:$0xff]   ;;  %v14524_v8 = vld [vmem:[%s17854_s1 + $0x1b60] sm:$0xff]  }
 0x34a   :  { %v13163_v14 = vpop.f32.mrf.mxu1  ;;  %13455 = vmatprep.subr.bf16.mxu1 %v14490_v13  ;;  %v14521_v7 = vld [vmem:[%s17854_s1 + $0x1b28] sm:$0xff]   ;;  %v14526_v10 = vld [vmem:[%s17854_s1 + $0x1be0] sm:$0xff]  }
 0x34b   :  { %13434 = vmatpush3.bf16.msra.mxu0 %v14489_v12  ;;  %v14528_v12 = vld [vmem:[%s17854_s1 + $0x1b58] sm:$0xff]   ;;  %v14527_v13 = vld [vmem:[%s17854_s1 + $0x1ba0] sm:$0xff]  }
 0x34c   :  { %13435 = vmatprep.subr.bf16.mxu0 %v14492_v16  ;;  %v14530_v14 = vld [vmem:[%s17854_s1 + $0x1bd8] sm:$0xff]   ;;  %v14532_v16 = vld [vmem:[%s17854_s1 + $0x1b50] sm:$0xff]  }
 0x34d   :  { %13456 = vmatpush3.bf16.msra.mxu1 %v14491_v15  ;;  %v14529_v15 = vld [vmem:[%s17854_s1 + $0x1b18] sm:$0xff]  }
 0x34e   :  { %13457 = vmatprep.subr.bf16.mxu1 %v14494_v18  ;;  %v14534_v18 = vld [vmem:[%s17854_s1 + $0x1bd0] sm:$0xff]  }
 0x34f   :  { %13436 = vmatpush3.bf16.msra.mxu0 %v14493_v17  ;;  %v14531_v17 = vld [vmem:[%s17854_s1 + $0x1b98] sm:$0xff]  }
 0x350   :  { %13437 = vmatprep.subr.bf16.mxu0 %v14496_v20  ;;  %v14536_v20 = vld [vmem:[%s17854_s1 + $0x1b48] sm:$0xff]  }
 0x351   :  { %13458 = vmatpush3.bf16.msra.mxu1 %v14495_v19  ;;  %v14533_v19 = vld [vmem:[%s17854_s1 + $0x1b10] sm:$0xff]  }
 0x352   :  { %13459 = vmatprep.subr.bf16.mxu1 %v14498_v22  ;;  %v14538_v22 = vld [vmem:[%s17854_s1 + $0x1bc8] sm:$0xff]  }
 0x353   :  { %13438 = vmatpush3.bf16.msra.mxu0 %v14497_v21  ;;  %v14535_v21 = vld [vmem:[%s17854_s1 + $0x1b90] sm:$0xff]  }
 0x354   :  { %13439 = vmatprep.subr.bf16.mxu0 %v14500_v24  ;;  %v14540_v24 = vld [vmem:[%s17854_s1 + $0x1b40] sm:$0xff]  }
 0x355   :  { %13460 = vmatpush3.bf16.msra.mxu1 %v14499_v23  ;;  %v14537_v23 = vld [vmem:[%s17854_s1 + $0x1b08] sm:$0xff]  }
 0x356   :  { %13461 = vmatprep.subr.bf16.mxu1 %v14502_v26  ;;  %v14539_v26 = vld [vmem:[%s17854_s1 + $0x1b88] sm:$0xff]  }
 0x357   :  { %13440 = vmatpush3.bf16.msra.mxu0 %v14501_v25  ;;  %v43_v25 = vld [vmem:[%s17853_s0 + $0xd8] sm:$0xff] }
 0x358   :  { %13441 = vmatprep.subr.bf16.mxu0 %v14504_v28  ;;  %vm74_vm11 = vcmp.ge.f32.partialorder %v43_v25, 0.0  ;;  %v14542_v28 = vld [vmem:[%s17854_s1 + $0x1bc0] sm:$0xff]  }
 0x359   :  { %13462 = vmatpush3.bf16.msra.mxu1 %v14503_v27  ;;  %v105_v27 = vmul.f32 0.01, %v43_v25 }
 0x35a   :  { %13463 = vmatprep.subr.bf16.mxu1 %v14506_v30 }
 0x35b   :  { %13442 = vmatpush3.bf16.msra.mxu0 %v14505_v29  ;;  %v14541_v29 = vld [vmem:[%s17854_s1 + $0x1b00] sm:$0xff]   ;;  %v136_v30 = vsel %vm74_vm11, %v43_v25, %v105_v27  ;;  %v14576_v25 = vld [vmem:[%s17854_s1 + $0x1d78] sm:$0xff]  }
 0x35c   :  { %13443 = vmatprep.subr.bf16.mxu0 %v14508_v33  ;;  %v630_v33 = vcombine.high %v136_v30, %v136_v30  ;;  %v14575_v27 = vld [vmem:[%s17854_s1 + $0x1c80] sm:$0xff]  }
 0x35d   :  { %13464 = vmatpush3.bf16.msra.mxu1 %v14507_v31  ;;  %v637_v31 = vrot.slane %v136_v30, %v14783_v43  ;;  %v14578_v30 = vld [vmem:[%s17854_s1 + $0x1df8] sm:$0xff]  }
 0x35e   :  { %13465 = vmatprep.subr.bf16.mxu1 %v14510_v35  ;;  %v644_v36 = vrot.slane %v630_v33, %v14783_v43  ;;  %v14577_v33 = vld [vmem:[%s17854_s1 + $0x1d38] sm:$0xff]  }
 0x35f   :  { %13444 = vmatpush3.bf16.msra.mxu0 %v14509_v37  ;;  %v645_v35 = vcombine.high %v637_v31, %v637_v31  ;;  %v14546_v37 = vld [vmem:[%s17854_s1 + $0x1cf8] sm:$0xff]   ;;  %v928_v39 = vpack.c.bf16 %v637_v31, %v637_v31 }
 0x360   :  { %13473 = vmatprep.subr.bf16.mxu0 %v14512_v40  ;;  %v14545_v40 = vld [vmem:[%s17854_s1 + $0x1c38] sm:$0xff]  }
 0x361   :  { %13466 = vmatpush3.bf16.msra.mxu1 %v14511_v42  ;;  %v929_v41 = vpack.c.bf16 %v645_v35, %v645_v35  ;;  %v646_v42 = vcombine.high %v644_v36, %v644_v36 }
 0x362   :  { %v13181_v45 = vpop.f32.mrf.mxu0  ;;  %10907 = vmatmul.mubr.bf16.vlgmr.msra.gmra.mxu0 %v924_v46  ;;  %13495 = vmatprep.subr.bf16.mxu1 %v14514_v47  ;;  %v930_v47 = vpack.c.bf16 %v644_v36, %v644_v36  ;;  %v14579_v36 = vld [vmem:[%s17854_s1 + $0x1db8] sm:$0xff]  }
 0x363   :  { %13474 = vmatpush3.bf16.msra.mxu0 %v14513_v50  ;;  %10986 = vmatprep.mubr.bf16.mxu0 %v929_v41  ;;  %v931_v49 = vpack.c.bf16 %v646_v42, %v646_v42 }
 0x364   :  { %v13182_v51 = vpop.f32.mrf.mxu0  ;;  %v13203_v52 = vpop.f32.mrf.mxu1  ;;  %10947 = vmatmul.mubr.bf16.vlgmr.msra.gmra.mxu1 %v926_v53  ;;  %13475 = vmatprep.subr.bf16.mxu0 %v14516_v54  ;;  %v14550_v54 = vld [vmem:[%s17854_s1 + $0x1cf0] sm:$0xff]  }
 0x365   :  { %v13183_v56 = vadd.f32 %v13182_v51, %v13181_v45  ;;  %13496 = vmatpush3.bf16.msra.mxu1 %v14515_v57  ;;  %v14549_v51 = vld [vmem:[%s17854_s1 + $0x1c30] sm:$0xff]   ;;  %11026 = vmatprep.mubr.bf16.mxu1 %v931_v49 }
 0x366   :  { %v13184_v58 = vpop.f32.mrf.mxu0  ;;  %v13204_v59 = vpop.f32.mrf.mxu1  ;;  %13497 = vmatprep.subr.bf16.mxu1 %v14518_v60  ;;  %v14551_v57 = vld [vmem:[%s17854_s1 + $0x1cb0] sm:$0xff]  }
 0x367   :  { %v10429_v61 = vadd.f32 %v13183_v56, %v17393_v11  ;;  %v13205_v62 = vadd.f32 %v13204_v59, %v13203_v52  ;;  %13476 = vmatpush3.bf16.msra.mxu0 %v14517_v63  ;;  %v14525_v11 = vld [vmem:[%s17854_s1 + $0x1b20] sm:$0xff]   ;;  %v14552_v59 = vld [vmem:[%s17854_s1 + $0x1c68] sm:$0xff]  }
 0x368   :  { %v13185_v0 = vpop.f32.mrf.mxu0  ;;  %v13206_v2 = vpop.f32.mrf.mxu1  ;;  %13477 = vmatprep.subr.bf16.mxu0 %v14520_v1  ;;  %v14554_v63 = vld [vmem:[%s17854_s1 + $0x1ce8] sm:$0xff]  }
 0x369   :  { %v17494_v3 = vadd.f32 %v13205_v62, %v10429_v61  ;;  %13498 = vmatpush3.bf16.msra.mxu1 %v14519_v4  ;;  %v14553_v62 = vld [vmem:[%s17854_s1 + $0x1c28] sm:$0xff]   ;;  %v14556_v2 = vld [vmem:[%s17854_s1 + $0x1c60] sm:$0xff]  }
 0x36a   :  { %v13207_v6 = vpop.f32.mrf.mxu1  ;;  %13499 = vmatprep.subr.bf16.mxu1 %v14522_v5  ;;  %v14555_v1 = vld [vmem:[%s17854_s1 + $0x1ca8] sm:$0xff]   ;;  %v14558_v4 = vld [vmem:[%s17854_s1 + $0x1ce0] sm:$0xff]  }
 0x36b   :  { %13478 = vmatpush3.bf16.msra.mxu0 %v14521_v7  ;;  %v14559_v5 = vld [vmem:[%s17854_s1 + $0x1ca0] sm:$0xff]   ;;  %v14560_v6 = vld [vmem:[%s17854_s1 + $0x1c58] sm:$0xff]  }
 0x36c   :  { %13479 = vmatprep.subr.bf16.mxu0 %v14524_v8  ;;  %v14561_v7 = vld [vmem:[%s17854_s1 + $0x1c18] sm:$0xff]  }
 0x36d   :  { %13500 = vmatpush3.bf16.msra.mxu1 %v14523_v9  ;;  %v14562_v8 = vld [vmem:[%s17854_s1 + $0x1cd8] sm:$0xff]  }
 0x36e   :  { %13501 = vmatprep.subr.bf16.mxu1 %v14526_v10  ;;  %v14563_v9 = vld [vmem:[%s17854_s1 + $0x1c98] sm:$0xff]   ;;  %v14564_v10 = vld [vmem:[%s17854_s1 + $0x1c50] sm:$0xff]  }
 0x36f   :  { %13480 = vmatpush3.bf16.msra.mxu0 %v14525_v11  ;;  %v14565_v11 = vld [vmem:[%s17854_s1 + $0x1c10] sm:$0xff]  }
 0x370   :  { %13481 = vmatprep.subr.bf16.mxu0 %v14528_v12  ;;  %v14566_v12 = vld [vmem:[%s17854_s1 + $0x1cd0] sm:$0xff]  }
 0x371   :  { %13502 = vmatpush3.bf16.msra.mxu1 %v14527_v13  ;;  %v14567_v13 = vld [vmem:[%s17854_s1 + $0x1c90] sm:$0xff]  }
 0x372   :  { %13503 = vmatprep.subr.bf16.mxu1 %v14530_v14  ;;  %v14568_v14 = vld [vmem:[%s17854_s1 + $0x1c48] sm:$0xff]  }
 0x373   :  { %13482 = vmatpush3.bf16.msra.mxu0 %v14529_v15  ;;  %v14569_v15 = vld [vmem:[%s17854_s1 + $0x1c08] sm:$0xff]  }
 0x374   :  { %13483 = vmatprep.subr.bf16.mxu0 %v14532_v16  ;;  %v14570_v16 = vld [vmem:[%s17854_s1 + $0x1cc8] sm:$0xff]  }
 0x375   :  { %13504 = vmatpush3.bf16.msra.mxu1 %v14531_v17  ;;  %v14572_v17 = vld [vmem:[%s17854_s1 + $0x1c40] sm:$0xff]  }
 0x376   :  { %13505 = vmatprep.subr.bf16.mxu1 %v14534_v18  ;;  %v44_v18 = vld [vmem:[%s17853_s0 + $0xe0] sm:$0xff] }
 0x377   :  { %13484 = vmatpush3.bf16.msra.mxu0 %v14533_v19  ;;  %v14571_v19 = vld [vmem:[%s17854_s1 + $0x1c88] sm:$0xff]   ;;  %vm75_vm12 = vcmp.ge.f32.partialorder %v44_v18, 0.0 }
 0x378   :  { %13485 = vmatprep.subr.bf16.mxu0 %v14536_v20  ;;  %v106_v20 = vmul.f32 0.01, %v44_v18 }
 0x379   :  { %13506 = vmatpush3.bf16.msra.mxu1 %v14535_v21  ;;  %v14574_v21 = vld [vmem:[%s17854_s1 + $0x1cc0] sm:$0xff]  }
 0x37a   :  { %13507 = vmatprep.subr.bf16.mxu1 %v14538_v22  ;;  %v14573_v22 = vld [vmem:[%s17854_s1 + $0x1c00] sm:$0xff]  }
 0x37b   :  { %13486 = vmatpush3.bf16.msra.mxu0 %v14537_v23  ;;  %v137_v23 = vsel %vm75_vm12, %v44_v18, %v106_v20 }
 0x37c   :  { %13487 = vmatprep.subr.bf16.mxu0 %v14540_v24  ;;  %v654_v24 = vrot.slane %v137_v23, %v14783_v43 }
 0x37d   :  { %13508 = vmatpush3.bf16.msra.mxu1 %v14539_v26  ;;  %v647_v26 = vcombine.high %v137_v23, %v137_v23 }
 0x37e   :  { %13509 = vmatprep.subr.bf16.mxu1 %v14542_v28  ;;  %v662_v28 = vcombine.high %v654_v24, %v654_v24  ;;  %v932_v31 = vpack.c.bf16 %v654_v24, %v654_v24 }
 0x37f   :  { %13488 = vmatpush3.bf16.msra.mxu0 %v14541_v29  ;;  %v661_v29 = vrot.slane %v647_v26, %v14783_v43 }
 0x380   :  { %13517 = vmatprep.subr.bf16.mxu0 %v14544_v32 }
 0x381   :  { %13510 = vmatpush3.bf16.msra.mxu1 %v14543_v34  ;;  %v933_v34 = vpack.c.bf16 %v662_v28, %v662_v28  ;;  %v663_v35 = vcombine.high %v661_v29, %v661_v29 }
 0x382   :  { %v13225_v38 = vpop.f32.mrf.mxu0  ;;  %13539 = vmatprep.subr.bf16.mxu1 %v14546_v37  ;;  %10987 = vmatmul.mubr.bf16.vlgmr.msra.gmra.mxu0 %v928_v39  ;;  %v934_v37 = vpack.c.bf16 %v661_v29, %v661_v29 }
 0x383   :  { %13518 = vmatpush3.bf16.msra.mxu0 %v14545_v40  ;;  %v14580_v40 = vld [vmem:[%s17854_s1 + $0x1d70] sm:$0xff]   ;;  %11066 = vmatprep.mubr.bf16.mxu0 %v933_v34  ;;  %v935_v41 = vpack.c.bf16 %v663_v35, %v663_v35 }
 0x384   :  { %v13226_v45 = vpop.f32.mrf.mxu0  ;;  %v13247_v46 = vpop.f32.mrf.mxu1  ;;  %11027 = vmatmul.mubr.bf16.vlgmr.msra.gmra.mxu1 %v930_v47  ;;  %13519 = vmatprep.subr.bf16.mxu0 %v14548_v48  ;;  %v14582_v47 = vld [vmem:[%s17854_s1 + $0x1df0] sm:$0xff]  }
 0x385   :  { %v13227_v50 = vadd.f32 %v13226_v45, %v13225_v38  ;;  %13540 = vmatpush3.bf16.msra.mxu1 %v14547_v44  ;;  %v14581_v44 = vld [vmem:[%s17854_s1 + $0x1d30] sm:$0xff]   ;;  %11106 = vmatprep.mubr.bf16.mxu1 %v935_v41 }
 0x386   :  { %v13228_v52 = vpop.f32.mrf.mxu0  ;;  %v13248_v53 = vpop.f32.mrf.mxu1  ;;  %13541 = vmatprep.subr.bf16.mxu1 %v14550_v54 }
 0x387   :  { %v10509_v55 = vadd.f32 %v13227_v50, %v17494_v3  ;;  %v13249_v56 = vadd.f32 %v13248_v53, %v13247_v46  ;;  %13520 = vmatpush3.bf16.msra.mxu0 %v14549_v51  ;;  %v14557_v3 = vld [vmem:[%s17854_s1 + $0x1c20] sm:$0xff]   ;;  %v14583_v50 = vld [vmem:[%s17854_s1 + $0x1db0] sm:$0xff]   ;;  %v14584_v52 = vld [vmem:[%s17854_s1 + $0x1d68] sm:$0xff]  }
 0x388   :  { %v13229_v58 = vpop.f32.mrf.mxu0  ;;  %v13250_v60 = vpop.f32.mrf.mxu1  ;;  %13521 = vmatprep.subr.bf16.mxu0 %v14552_v59  ;;  %v14588_v59 = vld [vmem:[%s17854_s1 + $0x1d60] sm:$0xff]  }
 0x389   :  { %v17601_v61 = vadd.f32 %v13249_v56, %v10509_v55  ;;  %13542 = vmatpush3.bf16.msra.mxu1 %v14551_v57  ;;  %v14585_v55 = vld [vmem:[%s17854_s1 + $0x1d28] sm:$0xff]   ;;  %v14589_v60 = vld [vmem:[%s17854_s1 + $0x1d20] sm:$0xff]  }
 0x38a   :  { %v13251_v0 = vpop.f32.mrf.mxu1  ;;  %13543 = vmatprep.subr.bf16.mxu1 %v14554_v63  ;;  %v14586_v56 = vld [vmem:[%s17854_s1 + $0x1de8] sm:$0xff]   ;;  %v14592_v63 = vld [vmem:[%s17854_s1 + $0x1d58] sm:$0xff]  }
 0x38b   :  { %13522 = vmatpush3.bf16.msra.mxu0 %v14553_v62  ;;  %v14587_v58 = vld [vmem:[%s17854_s1 + $0x1da8] sm:$0xff]   ;;  %v14591_v62 = vld [vmem:[%s17854_s1 + $0x1da0] sm:$0xff]   ;;  %v14593_v0 = vld [vmem:[%s17854_s1 + $0x1d18] sm:$0xff]  }
 0x38c   :  { %13523 = vmatprep.subr.bf16.mxu0 %v14556_v2  ;;  %v14595_v2 = vld [vmem:[%s17854_s1 + $0x1d98] sm:$0xff]  }
 0x38d   :  { %13544 = vmatpush3.bf16.msra.mxu1 %v14555_v1  ;;  %v14594_v1 = vld [vmem:[%s17854_s1 + $0x1dd8] sm:$0xff]  }
 0x38e   :  { %13545 = vmatprep.subr.bf16.mxu1 %v14558_v4  ;;  %v14597_v4 = vld [vmem:[%s17854_s1 + $0x1d10] sm:$0xff]  }
 0x38f   :  { %13524 = vmatpush3.bf16.msra.mxu0 %v14557_v3  ;;  %v14596_v3 = vld [vmem:[%s17854_s1 + $0x1d50] sm:$0xff]  }
 0x390   :  { %13525 = vmatprep.subr.bf16.mxu0 %v14560_v6  ;;  %v14599_v6 = vld [vmem:[%s17854_s1 + $0x1d90] sm:$0xff]  }
 0x391   :  { %13546 = vmatpush3.bf16.msra.mxu1 %v14559_v5  ;;  %v14598_v5 = vld [vmem:[%s17854_s1 + $0x1dd0] sm:$0xff]  }
 0x392   :  { %13547 = vmatprep.subr.bf16.mxu1 %v14562_v8  ;;  %v14601_v8 = vld [vmem:[%s17854_s1 + $0x1d08] sm:$0xff]  }
 0x393   :  { %13526 = vmatpush3.bf16.msra.mxu0 %v14561_v7  ;;  %v14600_v7 = vld [vmem:[%s17854_s1 + $0x1d48] sm:$0xff]  }
 0x394   :  { %13527 = vmatprep.subr.bf16.mxu0 %v14564_v10  ;;  %v14603_v10 = vld [vmem:[%s17854_s1 + $0x1d88] sm:$0xff]  }
 0x395   :  { %13548 = vmatpush3.bf16.msra.mxu1 %v14563_v9  ;;  %v14602_v9 = vld [vmem:[%s17854_s1 + $0x1dc8] sm:$0xff]  }
 0x396   :  { %13549 = vmatprep.subr.bf16.mxu1 %v14566_v12  ;;  %v14604_v12 = vld [vmem:[%s17854_s1 + $0x1d40] sm:$0xff]  }
 0x397   :  { %13528 = vmatpush3.bf16.msra.mxu0 %v14565_v11  ;;  %v45_v11 = vld [vmem:[%s17853_s0 + $0xe8] sm:$0xff] }
 0x398   :  { %13529 = vmatprep.subr.bf16.mxu0 %v14568_v14  ;;  %vm76_vm13 = vcmp.ge.f32.partialorder %v45_v11, 0.0  ;;  %v14606_v14 = vld [vmem:[%s17854_s1 + $0x1dc0] sm:$0xff]  }
 0x399   :  { %13550 = vmatpush3.bf16.msra.mxu1 %v14567_v13  ;;  %v107_v13 = vmul.f32 0.01, %v45_v11 }
 0x39a   :  { %13551 = vmatprep.subr.bf16.mxu1 %v14570_v16  ;;  %v14605_v16 = vld [vmem:[%s17854_s1 + $0x1d00] sm:$0xff]  }
 0x39b   :  { %13530 = vmatpush3.bf16.msra.mxu0 %v14569_v15  ;;  %v138_v15 = vsel %vm76_vm13, %v45_v11, %v107_v13 }
 0x39c   :  { %13531 = vmatprep.subr.bf16.mxu0 %v14572_v17  ;;  %v671_v17 = vrot.slane %v138_v15, %v14783_v43  ;;  %v664_v18 = vcombine.high %v138_v15, %v138_v15 }
 0x39d   :  { %13552 = vmatpush3.bf16.msra.mxu1 %v14571_v19  ;;  %v14608_v19 = vld [vmem:[%s17854_s1 + $0x1e78] sm:$0xff]  }
 0x39e   :  { %13553 = vmatprep.subr.bf16.mxu1 %v14574_v21  ;;  %v679_v20 = vcombine.high %v671_v17, %v671_v17  ;;  %v14607_v21 = vld [vmem:[%s17854_s1 + $0x1d80] sm:$0xff]   ;;  %v936_v23 = vpack.c.bf16 %v671_v17, %v671_v17 }
 0x39f   :  { %13532 = vmatpush3.bf16.msra.mxu0 %v14573_v22  ;;  %v678_v22 = vrot.slane %v664_v18, %v14783_v43 }
 0x3a0   :  { %13561 = vmatprep.subr.bf16.mxu0 %v14576_v25  ;;  %v937_v25 = vpack.c.bf16 %v679_v20, %v679_v20 }
 0x3a1   :  { %13554 = vmatpush3.bf16.msra.mxu1 %v14575_v27  ;;  %v680_v26 = vcombine.high %v678_v22, %v678_v22  ;;  %v14609_v27 = vld [vmem:[%s17854_s1 + $0x1e38] sm:$0xff]   ;;  %v938_v28 = vpack.c.bf16 %v678_v22, %v678_v22 }
 0x3a2   :  { %v13269_v32 = vpop.f32.mrf.mxu0  ;;  %13583 = vmatprep.subr.bf16.mxu1 %v14578_v30  ;;  %11067 = vmatmul.mubr.bf16.vlgmr.msra.gmra.mxu0 %v932_v31  ;;  %v14610_v31 = vld [vmem:[%s17854_s1 + $0x1e70] sm:$0xff]  }
 0x3a3   :  { %13562 = vmatpush3.bf16.msra.mxu0 %v14577_v33  ;;  %11146 = vmatprep.mubr.bf16.mxu0 %v937_v25 }
 0x3a4   :  { %v13270_v38 = vpop.f32.mrf.mxu0  ;;  %v13291_v39 = vpop.f32.mrf.mxu1  ;;  %11107 = vmatmul.mubr.bf16.vlgmr.msra.gmra.mxu1 %v934_v37  ;;  %13563 = vmatprep.subr.bf16.mxu0 %v14580_v40  ;;  %v14655_v37 = vmov 0.0   ;;  %v14612_v40 = vld [vmem:[%s17854_s1 + $0x1e68] sm:$0xff]  }
 0x3a5   :  { %v13271_v42 = vadd.f32 %v13270_v38, %v13269_v32  ;;  %13584 = vmatpush3.bf16.msra.mxu1 %v14579_v36  ;;  %v939_v32 = vpack.c.bf16 %v680_v26, %v680_v26  ;;  %v14611_v36 = vld [vmem:[%s17854_s1 + $0x1e30] sm:$0xff]  }
 0x3a6   :  { %v13272_v45 = vpop.f32.mrf.mxu0  ;;  %v13292_v46 = vpop.f32.mrf.mxu1  ;;  %13585 = vmatprep.subr.bf16.mxu1 %v14582_v47 }
 0x3a7   :  { %v10589_v48 = vadd.f32 %v13271_v42, %v17601_v61  ;;  %v13293_v49 = vadd.f32 %v13292_v46, %v13291_v39  ;;  %13564 = vmatpush3.bf16.msra.mxu0 %v14581_v44  ;;  %v14590_v61 = vld [vmem:[%s17854_s1 + $0x1de0] sm:$0xff]   ;;  %11186 = vmatprep.mubr.bf16.mxu1 %v939_v32  ;;  %v14618_v42 = vld [vmem:[%s17854_s1 + $0x1e98] sm:$0xff]   ;;  %v14613_v46 = vld [vmem:[%s17854_s1 + $0x1e28] sm:$0xff]  }
 0x3a8   :  { %v13273_v51 = vpop.f32.mrf.mxu0  ;;  %v13294_v53 = vpop.f32.mrf.mxu1  ;;  %13565 = vmatprep.subr.bf16.mxu0 %v14584_v52  ;;  %v14616_v52 = vld [vmem:[%s17854_s1 + $0x1e58] sm:$0xff]  }
 0x3a9   :  { %v17705_v54 = vadd.f32 %v13293_v49, %v10589_v48  ;;  %13586 = vmatpush3.bf16.msra.mxu1 %v14583_v50  ;;  %v14621_v48 = vld [vmem:[%s17854_s1 + $0x1e90] sm:$0xff]   ;;  %v14614_v49 = vld [vmem:[%s17854_s1 + $0x1e60] sm:$0xff]   ;;  %v14624_v50 = vld [vmem:[%s17854_s1 + $0x1e88] sm:$0xff]  }
 0x3aa   :  { %v13295_v57 = vpop.f32.mrf.mxu1  ;;  %13587 = vmatprep.subr.bf16.mxu1 %v14586_v56  ;;  %v14615_v51 = vld [vmem:[%s17854_s1 + $0x1e20] sm:$0xff]   ;;  %v46_v53 = vld [vmem:[%s17853_s0 + $0xf0] sm:$0x3f] }
 0x3ab   :  { %13566 = vmatpush3.bf16.msra.mxu0 %v14585_v55 }
 0x3ac   :  { %13567 = vmatprep.subr.bf16.mxu0 %v14588_v59 }
 0x3ad   :  { %13588 = vmatpush3.bf16.msra.mxu1 %v14587_v58 }
 0x3ae   :  { %13589 = vmatprep.subr.bf16.mxu1 %v14590_v61 }
 0x3af   :  { %13568 = vmatpush3.bf16.msra.mxu0 %v14589_v60 }
 0x3b0   :  { %13569 = vmatprep.subr.bf16.mxu0 %v14592_v63 }
 0x3b1   :  { %13590 = vmatpush3.bf16.msra.mxu1 %v14591_v62 }
 0x3b2   :  { %13591 = vmatprep.subr.bf16.mxu1 %v14594_v1 }
 0x3b3   :  { %13570 = vmatpush3.bf16.msra.mxu0 %v14593_v0 }
 0x3b4   :  { %13571 = vmatprep.subr.bf16.mxu0 %v14596_v3 }
 0x3b5   :  { %13592 = vmatpush3.bf16.msra.mxu1 %v14595_v2 }
 0x3b6   :  { %13593 = vmatprep.subr.bf16.mxu1 %v14598_v5 }
 0x3b7   :  { %13572 = vmatpush3.bf16.msra.mxu0 %v14597_v4 }
 0x3b8   :  { %13573 = vmatprep.subr.bf16.mxu0 %v14600_v7 }
 0x3b9   :  { %13594 = vmatpush3.bf16.msra.mxu1 %v14599_v6 }
 0x3ba   :  { %13595 = vmatprep.subr.bf16.mxu1 %v14602_v9 }
 0x3bb   :  { %13574 = vmatpush3.bf16.msra.mxu0 %v14601_v8 }
 0x3bc   :  { %13575 = vmatprep.subr.bf16.mxu0 %v14604_v12 }
 0x3bd   :  { %13596 = vmatpush3.bf16.msra.mxu1 %v14603_v10 }
 0x3be   :  { %13597 = vmatprep.subr.bf16.mxu1 %v14606_v14 }
 0x3bf   :  { %13576 = vmatpush3.bf16.msra.mxu0 %v14605_v16 }
 0x3c0   :  { %13605 = vmatprep.subr.bf16.mxu0 %v14608_v19 }
 0x3c1   :  { %13598 = vmatpush3.bf16.msra.mxu1 %v14607_v21 }
 0x3c2   :  { %v13313_v24 = vpop.f32.mrf.mxu0  ;;  %11147 = vmatmul.mubr.bf16.vlgmr.msra.gmra.mxu0 %v936_v23  ;;  %13632 = vmatprep.subr.bf16.mxu1 %v14655_v37 }
 0x3c3   :  { %13606 = vmatpush3.bf16.msra.mxu0 %v14609_v27 }
 0x3c4   :  { %v13314_v29 = vpop.f32.mrf.mxu0  ;;  %v13335_v30 = vpop.f32.mrf.mxu1  ;;  %11187 = vmatmul.mubr.bf16.vlgmr.msra.gmra.mxu1 %v938_v28  ;;  %13607 = vmatprep.subr.bf16.mxu0 %v14610_v31 }
 0x3c5   :  { %v13315_v33 = vadd.f32 %v13314_v29, %v13313_v24  ;;  %13640 = vmatprep.mubr.msk.bf16.mxu1 %vm14656_vm14, %v14655_v37  ;;  %13633 = vmatpush3.bf16.msra.mxu1 %v14618_v42 }
 0x3c6   :  { %v13316_v34 = vpop.f32.mrf.mxu0  ;;  %v13336_v35 = vpop.f32.mrf.mxu1  ;;  %13634 = vmatprep.subr.bf16.mxu1 %v14655_v37 }
 0x3c7   :  { %v10669_v38 = vadd.f32 %v13315_v33, %v17705_v54  ;;  %v13337_v39 = vadd.f32 %v13336_v35, %v13335_v30  ;;  %13608 = vmatpush3.bf16.msra.mxu0 %v14611_v36 }
 0x3c8   :  { %v13317_v41 = vpop.f32.mrf.mxu0  ;;  %v13338_v44 = vpop.f32.mrf.mxu1  ;;  %13609 = vmatprep.subr.bf16.mxu0 %v14612_v40 }
 0x3c9   :  { %v10709_v45 = vadd.f32 %v13337_v39, %v10669_v38  ;;  %13635 = vmatpush3.bf16.msra.mxu1 %v14621_v48 }
 0x3ca   :  { %v13339_v47 = vpop.f32.mrf.mxu1  ;;  %13636 = vmatprep.subr.bf16.mxu1 %v14655_v37 }
 0x3cb   :  { %13610 = vmatpush3.bf16.msra.mxu0 %v14613_v46 }
 0x3cc   :  { %13611 = vmatprep.subr.bf16.mxu0 %v14614_v49 }
 0x3cd   :  { %8 = vsyncpa [#allocation3], 0  ;;  %13637 = vmatpush3.bf16.msra.mxu1 %v14624_v50  ;;  %v14627_v54 = vld [vmem:[%s17854_s1 + $0x1e80] sm:$0xff]   ;;  %vm77_vm15 = vcmp.ge.f32.partialorder %v46_v53, 0.0  ;;  %v108_v55 = vmul.f32 0.01, %v46_v53 }
 0x3ce   :  { %v14617_v56 = vld [vmem:[%s17854_s1 + $0x1e18] sm:$0xff]   ;;  %13638 = vmatprep.subr.bf16.mxu1 %v14655_v37  ;;  %v14619_v57 = vld [vmem:[%s17854_s1 + $0x1e50] sm:$0xff]   ;;  %v14622_v0 = vld [vmem:[%s17854_s1 + $0x1e48] sm:$0xff]   ;;  %vm8790_vm0 = vcmask 523264   ;;  %vm11274_vm1 = vcmask 74752  }
 0x3cf   :  { %13612 = vmatpush3.bf16.msra.mxu0 %v14615_v51  ;;  %v139_v58 = vsel %vm77_vm15, %v46_v53, %v108_v55  ;;  %v14620_v61 = vld [vmem:[%s17854_s1 + $0x1e10] sm:$0xff]   ;;  %v14623_v3 = vld [vmem:[%s17854_s1 + $0x1e08] sm:$0xff]   ;;  %v14626_v4 = vld [vmem:[%s17854_s1 + $0x1e00] sm:$0xff]  }
 0x3d0   :  { %13613 = vmatprep.subr.bf16.mxu0 %v14616_v52  ;;  %v681_v59 = vcombine.high %v139_v58, %v139_v58  ;;  %v688_v60 = vrot.slane %v139_v58, %v14783_v43 }
 0x3d1   :  { %13639 = vmatpush3.bf16.msra.mxu1 %v14627_v54 }
 0x3d2   :  { %v695_v62 = vrot.slane %v681_v59, %v14783_v43  ;;  %v696_v63 = vcombine.high %v688_v60, %v688_v60  ;;  %v14625_v43 = vld [vmem:[%s17854_s1 + $0x1e40] sm:$0xff]   ;;  %v940_v5 = vpack.c.bf16 %v688_v60, %v688_v60  ;;  %s14657_s1 = smov [#allocation2]  }
 0x3d3   :  { %13614 = vmatpush3.bf16.msra.mxu0 %v14617_v56  ;;  %s11295_s8 = sshll.u32 %s14657_s1, 4  ;;  %s11296_s8 = int_to_ptr.vmem [resolvable:$true] %s11295_s8 }
 0x3d4   :  { %13615 = vmatprep.subr.bf16.mxu0 %v14619_v57  ;;  %v941_v1 = vpack.c.bf16 %v696_v63, %v696_v63  ;;  %v942_v2 = vpack.c.bf16 %v695_v62, %v695_v62  ;;  %s14632_s9 = scalar_lea.vmem %s11296_s8, 32  ;;  %p14637_p1 = scmp.lt.s32.totalorder %s11296_s8, %s11296_s8 }
 0x3d5   :  { %p14633_p0 = scmp.ne.s32.totalorder %s11296_s8, %s14632_s9  ;;  %p14638_p2 = scmp.lt.s32.totalorder %s14632_s9, %s14632_s9 }
 0x3d6   :  { %11226 = vmatprep.mubr.bf16.mxu0 %v941_v1  ;;  %13641 = vmatmul.mubr.msk.bf16.vlgmr.msra.gmra.mxu1 %vm8790_vm0, %v942_v2 }
 0x3d7   :  { %13616 = vmatpush3.bf16.msra.mxu0 %v14620_v61  ;;  %p14639_p3 = por %p14638_p2, %p14637_p1 }
 0x3d8   :  { %13617 = vmatprep.subr.bf16.mxu0 %v14622_v0 }
 0x3d9   :  { %p14640_p4 = pnand %p14639_p3, %p14633_p0 }
 0x3db   :  { %13618 = vmatpush3.bf16.msra.mxu0 %v14623_v3 }
 0x3dc   :  { %13619 = vmatprep.subr.bf16.mxu0 %v14625_v43 }
 0x3df   :  { %13620 = vmatpush3.bf16.msra.mxu0 %v14626_v4 }
 0x3e2   :  { %v13357_v6 = vpop.f32.mrf.mxu0  ;;  %11227 = vmatmul.mubr.bf16.vlgmr.msra.gmra.mxu0 %v940_v5 }
 0x3e4   :  { %v13358_v7 = vpop.f32.mrf.mxu0  ;;  %v13379_v8 = vpop.f32.mrf.mxu1 }
 0x3e5   :  { %v13359_v9 = vadd.f32 %v13358_v7, %v13357_v6 }
 0x3e6   :  { %v13360_v10 = vpop.f32.mrf.mxu0  ;;  %v13380_v11 = vpop.f32.mrf.mxu1 }
 0x3e7   :  { %v10749_v12 = vadd.f32 %v13359_v9, %v10709_v45  ;;  %v13381_v13 = vadd.f32 %v13380_v11, %v13379_v8 }
 0x3e8   :  { %v13361_v14 = vpop.f32.mrf.mxu0  ;;  %v13382_v15 = vpop.f32.mrf.mxu1 }
 0x3e9   :  { %v10789_v16 = vadd.f32 %v13381_v13, %v10749_v12 }
 0x3ea   :  { %v13383_v17 = vpop.f32.mrf.mxu1 }
 0x402   :  { %v13401_v18 = vpop.f32.mrf.mxu0 }
 0x404   :  { %v13402_v19 = vpop.f32.mrf.mxu0  ;;  %v13423_v20 = vpop.f32.mrf.mxu1 }
 0x405   :  { %v13403_v21 = vadd.f32 %v13402_v19, %v13401_v18 }
 0x406   :  { %v13404_v22 = vpop.f32.mrf.mxu0  ;;  %v13424_v23 = vpop.f32.mrf.mxu1 }
 0x407   :  { %v10829_v24 = vadd.f32 %v13403_v21, %v10789_v16  ;;  %v13425_v25 = vadd.f32 %v13424_v23, %v13423_v20 }
 0x408   :  { %v13405_v26 = vpop.f32.mrf.mxu0  ;;  %v13426_v27 = vpop.f32.mrf.mxu1 }
 0x409   :  { %v10869_v28 = vadd.f32 %v13425_v25, %v10829_v24 }
 0x40a   :  { %v13427_v29 = vpop.f32.mrf.mxu1 }
 0x422   :  { %v13445_v30 = vpop.f32.mrf.mxu0 }
 0x424   :  { %v13446_v31 = vpop.f32.mrf.mxu0  ;;  %v13467_v32 = vpop.f32.mrf.mxu1 }
 0x425   :  { %v13447_v33 = vadd.f32 %v13446_v31, %v13445_v30 }
 0x426   :  { %v13448_v34 = vpop.f32.mrf.mxu0  ;;  %v13468_v35 = vpop.f32.mrf.mxu1 }
 0x427   :  { %v10909_v36 = vadd.f32 %v13447_v33, %v10869_v28  ;;  %v13469_v37 = vadd.f32 %v13468_v35, %v13467_v32 }
 0x428   :  { %v13449_v38 = vpop.f32.mrf.mxu0  ;;  %v13470_v39 = vpop.f32.mrf.mxu1 }
 0x429   :  { %v10949_v40 = vadd.f32 %v13469_v37, %v10909_v36 }
 0x42a   :  { %v13471_v41 = vpop.f32.mrf.mxu1 }
 0x442   :  { %v13489_v42 = vpop.f32.mrf.mxu0 }
 0x444   :  { %v13490_v44 = vpop.f32.mrf.mxu0  ;;  %v13511_v45 = vpop.f32.mrf.mxu1 }
 0x445   :  { %v13491_v46 = vadd.f32 %v13490_v44, %v13489_v42 }
 0x446   :  { %v13492_v47 = vpop.f32.mrf.mxu0  ;;  %v13512_v48 = vpop.f32.mrf.mxu1 }
 0x447   :  { %v10989_v49 = vadd.f32 %v13491_v46, %v10949_v40  ;;  %v13513_v50 = vadd.f32 %v13512_v48, %v13511_v45 }
 0x448   :  { %v13493_v51 = vpop.f32.mrf.mxu0  ;;  %v13514_v52 = vpop.f32.mrf.mxu1 }
 0x449   :  { %v11029_v53 = vadd.f32 %v13513_v50, %v10989_v49 }
 0x44a   :  { %v13515_v54 = vpop.f32.mrf.mxu1 }
 0x462   :  { %v13533_v55 = vpop.f32.mrf.mxu0 }
 0x464   :  { %v13534_v56 = vpop.f32.mrf.mxu0  ;;  %v13555_v57 = vpop.f32.mrf.mxu1 }
 0x465   :  { %v13535_v6 = vadd.f32 %v13534_v56, %v13533_v55 }
 0x466   :  { %v13536_v58 = vpop.f32.mrf.mxu0  ;;  %v13556_v59 = vpop.f32.mrf.mxu1 }
 0x467   :  { %v11069_v9 = vadd.f32 %v13535_v6, %v11029_v53  ;;  %v13557_v10 = vadd.f32 %v13556_v59, %v13555_v57 }
 0x468   :  { %v13537_v60 = vpop.f32.mrf.mxu0  ;;  %v13558_v61 = vpop.f32.mrf.mxu1 }
 0x469   :  { %v11109_v14 = vadd.f32 %v13557_v10, %v11069_v9 }
 0x46a   :  { %v13559_v62 = vpop.f32.mrf.mxu1 }
 0x482   :  { %v13577_v63 = vpop.f32.mrf.mxu0 }
 0x484   :  { %v13578_v0 = vpop.f32.mrf.mxu0  ;;  %v13599_v1 = vpop.f32.mrf.mxu1 }
 0x485   :  { %v13579_v12 = vadd.f32 %v13578_v0, %v13577_v63 }
 0x486   :  { %v13580_v2 = vpop.f32.mrf.mxu0  ;;  %v13600_v3 = vpop.f32.mrf.mxu1 }
 0x487   :  { %v11149_v15 = vadd.f32 %v13579_v12, %v11109_v14  ;;  %v13601_v16 = vadd.f32 %v13600_v3, %v13599_v1 }
 0x488   :  { %v13581_v43 = vpop.f32.mrf.mxu0  ;;  %v13602_v4 = vpop.f32.mrf.mxu1 }
 0x489   :  { %v11189_v19 = vadd.f32 %v13601_v16, %v11149_v15 }
 0x48a   :  { %v13603_v5 = vpop.f32.mrf.mxu1 }
 0x496   :  { %v11268_v7 = vpop.f32.mrf.mxu1 }
 0x498   :  { %v13642_v8 = vpop.f32.mrf.mxu1 }
 0x49a   :  { %v11271_v11 = vpop.f32.mrf.mxu1 }
 0x49c   :  { %v13643_v13 = vpop.f32.mrf.mxu1 }
 0x4a2   :  { %v13621_v17 = vpop.f32.mrf.mxu0 }
 0x4a4   :  { %v13622_v18 = vpop.f32.mrf.mxu0 }
 0x4a5   :  { %v13623_v20 = vadd.f32 %v13622_v18, %v13621_v17 }
 0x4a6   :  { %v13624_v21 = vpop.f32.mrf.mxu0 }
 0x4a7   :  { %v11229_v22 = vadd.f32 %v13623_v20, %v11189_v19 }
 0x4a8   :  { %v13625_v23 = vpop.f32.mrf.mxu0 }
 0x4a9   :  { %v11269_v24 = vadd.f32 %v11268_v7, %v11229_v22 }
 0x4ab   :  { %v11275_v25 = vsel %vm11274_vm1, %v11269_v24, -inf }
 0x4ac   :  { %11276 = vmax.xlane.f32.xlu0 %v11275_v25 }
 0x535   :  { %v11277_v26 = vpop.xlane.xlu0 %11276 }
 0x536   :  { %v11278_v27 = vsub.f32 %v11269_v24, %v11277_v26 }
 0x538   :  { %v11279_v28 = vmul.f32 1.442695, %v11278_v27 }
 0x53a   :  { %14628 = vpow2.f32 %v11279_v28 }
 0x547   :  { %v14629_v29 = vpop.eup %14628 }
 0x548   :  { %v11281_v30 = vsel %vm11274_vm1, %v14629_v29, 0.0 }
 0x549   :  { %11282 = vadd.xlane.f32.xlu0 %v11281_v30 }
 0x5d2   :  { %v11283_v31 = vpop.xlane.xlu0 %11282 }
 0x5d3   :  { %14630 = vlog2.f32 %v11283_v31 }
 0x5e0   :  { %v14631_v32 = vpop.eup %14630 }
 0x5e1   :  { %v11285_v33 = vmul.f32 0.6931472, %v14631_v32 }
 0x5e3   :  { %v11286_v34 = vadd.f32 %v11285_v33, %v11277_v26 }
 0x5e5   :  { %v11287_v35 = vsub.f32 %v11269_v24, %v11286_v34 }
 0x5e7   :  { %11288 = vst.msk [vmem:[#allocation2] sm:$0x3] %vm11274_vm1, %v11287_v35 }
 0x5e8   :  { %14643 = shalt.err (!%p14640_p4)
}
 0x5e9   :  { %11298 = dma.vmem_to_hbm [thread:$0]  %s11296_s8, 32, %s17856_s3, [#allocation3]  }
 0x5ea   :  { %14652 = dma.done.wait [#allocation3], 32  }
 0x5eb   :  { %14653 = vsyncadd [#allocation3], 4294967264 }
 0x5ec   :  { %11302 = vsyncpa [#allocation3], 1 }

</bundles_post_ra>
